<compile_context>
chip_gen: v6e
topology: v6e:2x2x1
jax: 0.10.0
libtpu: 0.0.40
codegen_flags: <defaults>
</compile_context>

<pallas_src>
import functools

import jax
import jax.numpy as jnp
from jax.experimental import pallas as pl
from jax.experimental.pallas import tpu as pltpu


ACT_NONE, ACT_RELU, ACT_SIGMOID = 0, 1, 2

_VMEM_LIMIT = 40 * 1024 * 1024   # < v7x's 64 MiB physical, >> actual footprint


def _apply_act(y, act):
    if act == ACT_RELU:
        return jnp.maximum(y, 0.0)
    if act == ACT_SIGMOID:
        return jax.nn.sigmoid(y)
    return y


def _pick_row_tile(n_rows, n_cols, target_m=1024):
    """Largest divisor tr of n_rows with tr*n_cols <= target_m matmul rows;
    prefer >=2 row blocks (v7x megacore) when n_rows allows it."""
    divisors = [d for d in range(1, n_rows + 1) if n_rows % d == 0]
    fitting = [d for d in divisors if d * n_cols <= target_m] or [1]
    tr = max(fitting)
    if tr == n_rows and n_rows > 1:
        tr = max(d for d in divisors if d < n_rows)
    return tr


# ----------------------------------------------------------------------------
# Fused 2x2 valid conv kernel (used for Conv2d via space-to-depth)
# ----------------------------------------------------------------------------
def _conv2x2_kernel(x_ref, w_ref, b_ref, o_ref, *, act, tr, wo):
    # x_ref: (Hi, Wi, Cs) one batch image, resident; w_ref: (4*Cs, Cout) resident
    # b_ref: (1, Cout) f32;  o_ref: (tr, wo, Cout) output row block
    r = pl.program_id(1)
    row0 = r * tr
    if tr % 8 == 0:
        row0 = pl.multiple_of(row0, tr)
    taps = []
    for kh in range(2):
        for kw in range(2):
            taps.append(x_ref[pl.ds(row0 + kh, tr), pl.ds(kw, wo), :])
    patches = jnp.concatenate(taps, axis=-1)                    # (tr, wo, 4*Cs)
    patches = patches.reshape(tr * wo, patches.shape[-1])
    y = jnp.dot(patches, w_ref[...], preferred_element_type=jnp.float32)
    y = _apply_act(y + b_ref[...], act)
    o_ref[...] = y.reshape(tr, wo, -1).astype(o_ref.dtype)


def conv4x4s2(x_nhwc, w_packed, bias_2d, act, out_dtype=jnp.bfloat16):
    """Torch Conv2d(k=4, s=2, p=1): space-to-depth(2) of pad(x,1) + fused 2x2 conv."""
    B, H, W, Cin = x_nhwc.shape
    assert H % 2 == 0 and W % 2 == 0, "even spatial dims required"
    K4, Cout = w_packed.shape
    assert K4 == 16 * Cin

    xp = jnp.pad(x_nhwc.astype(jnp.bfloat16), ((0, 0), (1, 1), (1, 1), (0, 0)))
    Hs, Ws = (H + 2) // 2, (W + 2) // 2
    # space-to-depth(2): channel index = (a*2 + b)*Cin + c for sub-pixel (a, b)
    xs = xp.reshape(B, Hs, 2, Ws, 2, Cin).transpose(0, 1, 3, 2, 4, 5)
    xs = xs.reshape(B, Hs, Ws, 4 * Cin)

    Ho, Wo = H // 2, W // 2                                   # == Hs - 1, Ws - 1
    tr = _pick_row_tile(Ho, Wo)
    grid = (B, Ho // tr)

    m_total = B * Ho * Wo
    cost = pl.CostEstimate(
        flops=2 * m_total * K4 * Cout,
        transcendentals=m_total * Cout if act == ACT_SIGMOID else 0,
        bytes_accessed=(xs.size * 2 + w_packed.size * 2 + bias_2d.size * 4
                        + m_total * Cout * jnp.dtype(out_dtype).itemsize))

    return pl.pallas_call(
        functools.partial(_conv2x2_kernel, act=act, tr=tr, wo=Wo),
        out_shape=jax.ShapeDtypeStruct((B, Ho, Wo, Cout), out_dtype),
        grid_spec=pltpu.PrefetchScalarGridSpec(
            num_scalar_prefetch=0,
            grid=grid,
            in_specs=[
                pl.BlockSpec((None, Hs, Ws, 4 * Cin), lambda b, r: (b, 0, 0, 0)),
                pl.BlockSpec((K4, Cout), lambda b, r: (0, 0)),
                pl.BlockSpec((1, Cout), lambda b, r: (0, 0)),
            ],
            out_specs=pl.BlockSpec((None, tr, Wo, Cout), lambda b, r: (b, r, 0, 0)),
        ),
        compiler_params=pltpu.CompilerParams(
            dimension_semantics=("parallel", "parallel"),
            vmem_limit_bytes=_VMEM_LIMIT),
        cost_estimate=cost,
    )(xs, w_packed, bias_2d)


# ----------------------------------------------------------------------------
# Fused ConvTranspose2d(k=4, s=2, p=1) kernel (sub-pixel parities, fused weave)
#   out[2u+a, 2v+b] = sum_{kh,kw in 0..1} xpad[u+a+kh, v+b+kw] . W[3-2kh-a, 3-2kw-b]
# ----------------------------------------------------------------------------
def _deconv2x2_kernel(x_ref, w_ref, b_ref, o_ref, *, act, tr, wo):
    # x_ref: (H+2, W+2, Cin) resident; w_ref: (4, 4*Cin, Cout), parity p = a*2+b
    # b_ref: (1, Cout) f32; o_ref: (tr, 2, wo, 2*Cout)
    r = pl.program_id(1)
    row0 = r * tr
    if tr % 8 == 0:
        row0 = pl.multiple_of(row0, tr)
    cin = x_ref.shape[-1]
    rows = []
    for a in range(2):
        halves = []
        for bp in range(2):
            taps = []
            for kh in range(2):
                for kw in range(2):
                    taps.append(
                        x_ref[pl.ds(row0 + a + kh, tr), pl.ds(bp + kw, wo), :])
            patches = jnp.concatenate(taps, axis=-1).reshape(tr * wo, 4 * cin)
            y = jnp.dot(patches, w_ref[a * 2 + bp],
                        preferred_element_type=jnp.float32)
            y = _apply_act(y + b_ref[...], act)
            halves.append(y.reshape(tr, wo, -1))
        rows.append(jnp.concatenate(halves, axis=-1))          # (tr, wo, 2*Cout)
    o_ref[...] = jnp.stack(rows, axis=1).astype(o_ref.dtype)   # (tr, 2, wo, 2*Cout)


def deconv4x4s2(x_nhwc, w_packed, bias_2d, act, out_dtype=jnp.bfloat16):
    """Torch ConvTranspose2d(k=4, s=2, p=1) with the parity weave fused into the
    kernel output layout; the final (B, 2H, 2W, Cout) is a free reshape."""
    B, H, W, Cin = x_nhwc.shape
    four, K4, Cout = w_packed.shape
    assert four == 4 and K4 == 4 * Cin

    xp = jnp.pad(x_nhwc.astype(jnp.bfloat16), ((0, 0), (1, 1), (1, 1), (0, 0)))
    tr = _pick_row_tile(H, W)
    grid = (B, H // tr)

    m_total = B * H * W
    cost = pl.CostEstimate(
        flops=2 * m_total * K4 * Cout * 4,
        transcendentals=4 * m_total * Cout if act == ACT_SIGMOID else 0,
        bytes_accessed=(xp.size * 2 + w_packed.size * 2 + bias_2d.size * 4
                        + 4 * m_total * Cout * jnp.dtype(out_dtype).itemsize))

    out = pl.pallas_call(
        functools.partial(_deconv2x2_kernel, act=act, tr=tr, wo=W),
        out_shape=jax.ShapeDtypeStruct((B, H, 2, W, 2 * Cout), out_dtype),
        grid_spec=pltpu.PrefetchScalarGridSpec(
            num_scalar_prefetch=0,
            grid=grid,
            in_specs=[
                pl.BlockSpec((None, H + 2, W + 2, Cin), lambda b, r: (b, 0, 0, 0)),
                pl.BlockSpec((4, K4, Cout), lambda b, r: (0, 0, 0)),
                pl.BlockSpec((1, Cout), lambda b, r: (0, 0)),
            ],
            out_specs=pl.BlockSpec((None, tr, 2, W, 2 * Cout),
                                   lambda b, r: (b, r, 0, 0, 0)),
        ),
        compiler_params=pltpu.CompilerParams(
            dimension_semantics=("parallel", "parallel"),
            vmem_limit_bytes=_VMEM_LIMIT),
        cost_estimate=cost,
    )(xp, w_packed, bias_2d)
    # (B, H, 2, W, 2, Cout) -> (B, 2H, 2W, Cout): pure row-major merge (no copy).
    return out.reshape(B, 2 * H, 2 * W, Cout)


# ----------------------------------------------------------------------------
# Parameters (PyTorch layout) + one-time packing into kernel layouts
# ----------------------------------------------------------------------------
def init_params(key, num_classes, ndf):
    chans_down = [(num_classes, ndf), (ndf, ndf * 2), (ndf * 2, ndf * 4),
                  (ndf * 4, ndf * 8)]
    chans_up = [(ndf * 8, ndf * 4), (ndf * 4, ndf * 2), (ndf * 2, ndf),
                (ndf, num_classes)]
    params = {}
    keys = jax.random.split(key, 16)
    k = 0
    for i, (cin, cout) in enumerate(chans_down, 1):
        params[f"conv{i}_w"] = 0.05 * jax.random.normal(
            keys[k], (cout, cin, 4, 4), jnp.float32); k += 1
        params[f"conv{i}_b"] = 0.01 * jax.random.normal(
            keys[k], (cout,), jnp.float32); k += 1
    for i, (cin, cout) in enumerate(chans_up, 1):
        params[f"deconv{i}_w"] = 0.05 * jax.random.normal(
            keys[k], (cin, cout, 4, 4), jnp.float32); k += 1
        params[f"deconv{i}_b"] = 0.01 * jax.random.normal(
            keys[k], (cout,), jnp.float32); k += 1
    return params


def _pack_conv_weight(w_oihw):
    """(Cout,Cin,4,4) -> (16*Cin, Cout) bf16, rows ordered (dh, dw, a, b, cin)
    matching the kernel's tap concat and the space-to-depth channel packing."""
    cout, cin, _, _ = w_oihw.shape
    w = jnp.transpose(w_oihw, (2, 3, 1, 0))          # (kh, kw, cin, cout)
    w = w.reshape(2, 2, 2, 2, cin, cout)             # kh=2dh+a, kw=2dw+b
    w = jnp.transpose(w, (0, 2, 1, 3, 4, 5))         # (dh, dw, a, b, cin, cout)
    return w.reshape(16 * cin, cout).astype(jnp.bfloat16)


def _pack_deconv_weight(w_iohw):
    """(Cin,Cout,4,4) -> (4, 4*Cin, Cout) bf16; leading dim = parity a*2+b,
    rows (kh, kw, cin) with tap weight w[:, :, 3-2kh-a, 3-2kw-b]."""
    parities = []
    for a in range(2):
        for b in range(2):
            taps = [w_iohw[:, :, 3 - 2 * kh - a, 3 - 2 * kw - b]
                    for kh in range(2) for kw in range(2)]
            parities.append(jnp.concatenate(taps, axis=0))      # (4*Cin, Cout)
    return jnp.stack(parities, axis=0).astype(jnp.bfloat16)


def pack_params(params):
    """One-time (outside jit) repack into the layouts the kernels consume."""
    packed = {}
    for i in range(1, 5):
        packed[f"conv{i}_w"] = _pack_conv_weight(params[f"conv{i}_w"])
        packed[f"conv{i}_b"] = params[f"conv{i}_b"].astype(jnp.float32).reshape(1, -1)
        packed[f"deconv{i}_w"] = _pack_deconv_weight(params[f"deconv{i}_w"])
        packed[f"deconv{i}_b"] = params[f"deconv{i}_b"].astype(jnp.float32).reshape(1, -1)
    return packed


# ----------------------------------------------------------------------------
# FCDiscriminator forward
# ----------------------------------------------------------------------------
def fc_discriminator_forward(x_nchw, pp):
    x = jnp.transpose(x_nchw, (0, 2, 3, 1)).astype(jnp.bfloat16)   # NCHW -> NHWC
    x = conv4x4s2(x, pp["conv1_w"], pp["conv1_b"], ACT_RELU)
    x = conv4x4s2(x, pp["conv2_w"], pp["conv2_b"], ACT_RELU)
    x = conv4x4s2(x, pp["conv3_w"], pp["conv3_b"], ACT_RELU)
    x = conv4x4s2(x, pp["conv4_w"], pp["conv4_b"], ACT_NONE)        # no act (per module)
    x = deconv4x4s2(x, pp["deconv1_w"], pp["deconv1_b"], ACT_RELU)
    x = deconv4x4s2(x, pp["deconv2_w"], pp["deconv2_b"], ACT_RELU)
    x = deconv4x4s2(x, pp["deconv3_w"], pp["deconv3_b"], ACT_RELU)
    x = deconv4x4s2(x, pp["deconv4_w"], pp["deconv4_b"], ACT_SIGMOID,
                    out_dtype=jnp.float32)
    return jnp.transpose(x, (0, 3, 1, 2))                           # NHWC -> NCHW


# ----------------------------------------------------------------------------
# Pure-XLA f32 reference (torch-equivalent) for a numerical sanity check
# ----------------------------------------------------------------------------
def _ref_forward(x_nchw, params):
    f32 = jnp.float32
    x = x_nchw.astype(f32)

    def conv(x, w, b):
        y = jax.lax.conv_general_dilated(
            x, w.astype(f32), window_strides=(2, 2), padding=((1, 1), (1, 1)),
            dimension_numbers=("NCHW", "OIHW", "NCHW"))
        return y + b.reshape(1, -1, 1, 1)

    def deconv(x, w, b):
        w_conv = jnp.transpose(w[:, :, ::-1, ::-1], (1, 0, 2, 3)).astype(f32)
        y = jax.lax.conv_general_dilated(
            x, w_conv, window_strides=(1, 1), padding=((2, 2), (2, 2)),
            lhs_dilation=(2, 2), dimension_numbers=("NCHW", "OIHW", "NCHW"))
        return y + b.reshape(1, -1, 1, 1)

    r = jax.nn.relu
    x = r(conv(x, params["conv1_w"], params["conv1_b"]))
    x = r(conv(x, params["conv2_w"], params["conv2_b"]))
    x = r(conv(x, params["conv3_w"], params["conv3_b"]))
    x = conv(x, params["conv4_w"], params["conv4_b"])
    x = r(deconv(x, params["deconv1_w"], params["deconv1_b"]))
    x = r(deconv(x, params["deconv2_w"], params["deconv2_b"]))
    x = r(deconv(x, params["deconv3_w"], params["deconv3_b"]))
    x = jax.nn.sigmoid(deconv(x, params["deconv4_w"], params["deconv4_b"]))
    return x


def _check(num_classes, ndf, batch, spatial, tol=5e-2):
    key = jax.random.PRNGKey(0)
    kx, kp = jax.random.split(key)
    x = jax.random.normal(kx, (batch, num_classes, spatial, spatial), jnp.float32)
    params = init_params(kp, num_classes, ndf)
    packed = pack_params(params)                   # one-time weight packing
    fwd = jax.jit(fc_discriminator_forward)
    out = jax.block_until_ready(fwd(x, packed))
    assert out.shape == (batch, num_classes, spatial, spatial), out.shape
    assert bool(jnp.all(jnp.isfinite(out)))
    assert bool(jnp.all((out >= 0.0) & (out <= 1.0)))       # sigmoid range
    ref = jax.block_until_ready(jax.jit(_ref_forward)(x, params))
    err = float(jnp.max(jnp.abs(out - ref)))
    assert err < tol, f"max abs err vs reference: {err}"


if __name__ == "__main__":
    # Main small test (matches the implied input x: [2, 4, 16, 16]).
    _check(num_classes=4, ndf=16, batch=2, spatial=16)
    # Extra shape (larger spatial, non-128-multiple channels, odd num_classes)
    # to validate the sub-pixel/parity index math at a different size.
    _check(num_classes=3, ndf=24, batch=1, spatial=32)
    print("KERNEL_OK")
</pallas_src>

<mosaic_0001>
module attributes {stable_mosaic.version = 11 : i64} {
  func.func @_conv2x2_kernel(%arg0: i32, %arg1: i32, %arg2: memref<1x9x9x16xbf16, #tpu.memory_space<vmem>>, %arg3: memref<64x16xbf16, #tpu.memory_space<vmem>>, %arg4: memref<1x16xf32, #tpu.memory_space<vmem>>, %arg5: memref<1x4x8x16xbf16, #tpu.memory_space<vmem>>) attributes {dimension_semantics = [#tpu.dimension_semantics<parallel>, #tpu.dimension_semantics<parallel>], iteration_bounds = array<i64: 2, 2>, scalar_prefetch = 0 : i64, scratch_operands = 0 : i64, tpu.core_type = #tpu.core_type<tc>, window_params = [{transform_indices = @transform_0, window_bounds = array<i64: 1, 9, 9, 16>}, {pipeline_mode = #tpu.pipeline_mode<synchronous>, transform_indices = @transform_1, window_bounds = array<i64: 64, 16>}, {pipeline_mode = #tpu.pipeline_mode<synchronous>, transform_indices = @transform_2, window_bounds = array<i64: 1, 16>}, {transform_indices = @transform_3, window_bounds = array<i64: 1, 4, 8, 16>}]} {
    %c4_i32 = arith.constant 4 : i32
    %0 = arith.muli %arg1, %c4_i32 : i32
    %c0_i32 = arith.constant 0 : i32
    %1 = arith.addi %0, %c0_i32 : i32
    %c0 = arith.constant 0 : index
    %2 = arith.index_cast %1 : i32 to index
    %c0_0 = arith.constant 0 : index
    %c0_1 = arith.constant 0 : index
    %3 = vector.load %arg2[%c0, %2, %c0_0, %c0_1] : memref<1x9x9x16xbf16, #tpu.memory_space<vmem>>, vector<1x4x8x16xbf16>
    %4 = vector.shape_cast %3 : vector<1x4x8x16xbf16> to vector<4x8x16xbf16>
    %c0_i32_2 = arith.constant 0 : i32
    %5 = arith.addi %0, %c0_i32_2 : i32
    %c0_3 = arith.constant 0 : index
    %6 = arith.index_cast %5 : i32 to index
    %c1 = arith.constant 1 : index
    %c0_4 = arith.constant 0 : index
    %7 = vector.load %arg2[%c0_3, %6, %c1, %c0_4] : memref<1x9x9x16xbf16, #tpu.memory_space<vmem>>, vector<1x4x8x16xbf16>
    %8 = vector.shape_cast %7 : vector<1x4x8x16xbf16> to vector<4x8x16xbf16>
    %c1_i32 = arith.constant 1 : i32
    %9 = arith.addi %0, %c1_i32 : i32
    %c0_5 = arith.constant 0 : index
    %10 = arith.index_cast %9 : i32 to index
    %c0_6 = arith.constant 0 : index
    %c0_7 = arith.constant 0 : index
    %11 = vector.load %arg2[%c0_5, %10, %c0_6, %c0_7] : memref<1x9x9x16xbf16, #tpu.memory_space<vmem>>, vector<1x4x8x16xbf16>
    %12 = vector.shape_cast %11 : vector<1x4x8x16xbf16> to vector<4x8x16xbf16>
    %c1_i32_8 = arith.constant 1 : i32
    %13 = arith.addi %0, %c1_i32_8 : i32
    %c0_9 = arith.constant 0 : index
    %14 = arith.index_cast %13 : i32 to index
    %c1_10 = arith.constant 1 : index
    %c0_11 = arith.constant 0 : index
    %15 = vector.load %arg2[%c0_9, %14, %c1_10, %c0_11] : memref<1x9x9x16xbf16, #tpu.memory_space<vmem>>, vector<1x4x8x16xbf16>
    %16 = vector.shape_cast %15 : vector<1x4x8x16xbf16> to vector<4x8x16xbf16>
    %17 = tpu.concatenate %4, %8, %12, %16 in 2 : vector<4x8x16xbf16>, vector<4x8x16xbf16>, vector<4x8x16xbf16>, vector<4x8x16xbf16> -> vector<4x8x64xbf16>
    %18 = vector.shape_cast %17 : vector<4x8x64xbf16> to vector<32x64xbf16>
    %c0_12 = arith.constant 0 : index
    %c0_13 = arith.constant 0 : index
    %19 = vector.load %arg3[%c0_12, %c0_13] : memref<64x16xbf16, #tpu.memory_space<vmem>>, vector<64x16xbf16>
    %cst = arith.constant dense<0.000000e+00> : vector<32x16xf32>
    %20 = tpu.matmul %18, %19, %cst {dimension_numbers = #tpu.dot_dimension_numbers<[1], [0], [0], [1], [0, 0, 1, 1], [], []>} : vector<32x64xbf16>, vector<64x16xbf16>, vector<32x16xf32> -> vector<32x16xf32>
    %c0_14 = arith.constant 0 : index
    %c0_15 = arith.constant 0 : index
    %21 = vector.load %arg4[%c0_14, %c0_15] : memref<1x16xf32, #tpu.memory_space<vmem>>, vector<1x16xf32>
    %22 = vector.broadcast %21 : vector<1x16xf32> to vector<32x16xf32>
    %23 = arith.addf %20, %22 : vector<32x16xf32>
    %cst_16 = arith.constant 0.000000e+00 : f32
    %24 = vector.broadcast %cst_16 : f32 to vector<32x16xf32>
    %25 = arith.maximumf %23, %24 : vector<32x16xf32>
    %26 = vector.shape_cast %25 : vector<32x16xf32> to vector<4x8x16xf32>
    %27 = arith.truncf %26 : vector<4x8x16xf32> to vector<4x8x16xbf16>
    %c0_17 = arith.constant 0 : index
    %c0_18 = arith.constant 0 : index
    %c0_19 = arith.constant 0 : index
    %c0_20 = arith.constant 0 : index
    %28 = vector.load %arg5[%c0_17, %c0_18, %c0_19, %c0_20] : memref<1x4x8x16xbf16, #tpu.memory_space<vmem>>, vector<1x4x8x16xbf16>
    %29 = vector.shape_cast %28 : vector<1x4x8x16xbf16> to vector<4x8x16xbf16>
    %30 = vector.shape_cast %27 : vector<4x8x16xbf16> to vector<1x4x8x16xbf16>
    tpu.vector_store %arg5[%c0_17, %c0_18, %c0_19, %c0_20], %30 {strides = array<i32>} : memref<1x4x8x16xbf16, #tpu.memory_space<vmem>>, vector<1x4x8x16xbf16>,
    return
  }
  func.func @transform_0(%arg0: i32, %arg1: i32) -> (i32, i32, i32, i32) {
    %c0_i32 = arith.constant 0 : i32
    %c0_i32_0 = arith.constant 0 : i32
    %c0_i32_1 = arith.constant 0 : i32
    %c0_i32_2 = arith.constant 0 : i32
    return %arg0, %c0_i32, %c0_i32_0, %c0_i32_1 : i32, i32, i32, i32
  }
  func.func @transform_1(%arg0: i32, %arg1: i32) -> (i32, i32) {
    %c0_i32 = arith.constant 0 : i32
    %c0_i32_0 = arith.constant 0 : i32
    %c0_i32_1 = arith.constant 0 : i32
    return %c0_i32, %c0_i32_0 : i32, i32
  }
  func.func @transform_2(%arg0: i32, %arg1: i32) -> (i32, i32) {
    %c0_i32 = arith.constant 0 : i32
    %c0_i32_0 = arith.constant 0 : i32
    %c0_i32_1 = arith.constant 0 : i32
    return %c0_i32, %c0_i32_0 : i32, i32
  }
  func.func @transform_3(%arg0: i32, %arg1: i32) -> (i32, i32, i32, i32) {
    %c0_i32 = arith.constant 0 : i32
    %c0_i32_0 = arith.constant 0 : i32
    %c0_i32_1 = arith.constant 0 : i32
    return %arg0, %arg1, %c0_i32, %c0_i32_0 : i32, i32, i32, i32
  }
}

module attributes {stable_mosaic.version = 11 : i64} {
  func.func @_conv2x2_kernel(%arg0: i32, %arg1: i32, %arg2: memref<1x5x5x64xbf16, #tpu.memory_space<vmem>>, %arg3: memref<256x32xbf16, #tpu.memory_space<vmem>>, %arg4: memref<1x32xf32, #tpu.memory_space<vmem>>, %arg5: memref<1x2x4x32xbf16, #tpu.memory_space<vmem>>) attributes {dimension_semantics = [#tpu.dimension_semantics<parallel>, #tpu.dimension_semantics<parallel>], iteration_bounds = array<i64: 2, 2>, scalar_prefetch = 0 : i64, scratch_operands = 0 : i64, tpu.core_type = #tpu.core_type<tc>, window_params = [{transform_indices = @transform_0, window_bounds = array<i64: 1, 5, 5, 64>}, {pipeline_mode = #tpu.pipeline_mode<synchronous>, transform_indices = @transform_1, window_bounds = array<i64: 256, 32>}, {pipeline_mode = #tpu.pipeline_mode<synchronous>, transform_indices = @transform_2, window_bounds = array<i64: 1, 32>}, {transform_indices = @transform_3, window_bounds = array<i64: 1, 2, 4, 32>}]} {
    %c2_i32 = arith.constant 2 : i32
    %0 = arith.muli %arg1, %c2_i32 : i32
    %c0_i32 = arith.constant 0 : i32
    %1 = arith.addi %0, %c0_i32 : i32
    %c0 = arith.constant 0 : index
    %2 = arith.index_cast %1 : i32 to index
    %c0_0 = arith.constant 0 : index
    %c0_1 = arith.constant 0 : index
    %3 = vector.load %arg2[%c0, %2, %c0_0, %c0_1] : memref<1x5x5x64xbf16, #tpu.memory_space<vmem>>, vector<1x2x4x64xbf16>
    %4 = vector.shape_cast %3 : vector<1x2x4x64xbf16> to vector<2x4x64xbf16>
    %c0_i32_2 = arith.constant 0 : i32
    %5 = arith.addi %0, %c0_i32_2 : i32
    %c0_3 = arith.constant 0 : index
    %6 = arith.index_cast %5 : i32 to index
    %c1 = arith.constant 1 : index
    %c0_4 = arith.constant 0 : index
    %7 = vector.load %arg2[%c0_3, %6, %c1, %c0_4] : memref<1x5x5x64xbf16, #tpu.memory_space<vmem>>, vector<1x2x4x64xbf16>
    %8 = vector.shape_cast %7 : vector<1x2x4x64xbf16> to vector<2x4x64xbf16>
    %c1_i32 = arith.constant 1 : i32
    %9 = arith.addi %0, %c1_i32 : i32
    %c0_5 = arith.constant 0 : index
    %10 = arith.index_cast %9 : i32 to index
    %c0_6 = arith.constant 0 : index
    %c0_7 = arith.constant 0 : index
    %11 = vector.load %arg2[%c0_5, %10, %c0_6, %c0_7] : memref<1x5x5x64xbf16, #tpu.memory_space<vmem>>, vector<1x2x4x64xbf16>
    %12 = vector.shape_cast %11 : vector<1x2x4x64xbf16> to vector<2x4x64xbf16>
    %c1_i32_8 = arith.constant 1 : i32
    %13 = arith.addi %0, %c1_i32_8 : i32
    %c0_9 = arith.constant 0 : index
    %14 = arith.index_cast %13 : i32 to index
    %c1_10 = arith.constant 1 : index
    %c0_11 = arith.constant 0 : index
    %15 = vector.load %arg2[%c0_9, %14, %c1_10, %c0_11] : memref<1x5x5x64xbf16, #tpu.memory_space<vmem>>, vector<1x2x4x64xbf16>
    %16 = vector.shape_cast %15 : vector<1x2x4x64xbf16> to vector<2x4x64xbf16>
    %17 = tpu.concatenate %4, %8, %12, %16 in 2 : vector<2x4x64xbf16>, vector<2x4x64xbf16>, vector<2x4x64xbf16>, vector<2x4x64xbf16> -> vector<2x4x256xbf16>
    %18 = vector.shape_cast %17 : vector<2x4x256xbf16> to vector<8x256xbf16>
    %c0_12 = arith.constant 0 : index
    %c0_13 = arith.constant 0 : index
    %19 = vector.load %arg3[%c0_12, %c0_13] : memref<256x32xbf16, #tpu.memory_space<vmem>>, vector<256x32xbf16>
    %cst = arith.constant dense<0.000000e+00> : vector<8x32xf32>
    %20 = tpu.matmul %18, %19, %cst {dimension_numbers = #tpu.dot_dimension_numbers<[1], [0], [0], [1], [0, 0, 1, 1], [], []>} : vector<8x256xbf16>, vector<256x32xbf16>, vector<8x32xf32> -> vector<8x32xf32>
    %c0_14 = arith.constant 0 : index
    %c0_15 = arith.constant 0 : index
    %21 = vector.load %arg4[%c0_14, %c0_15] : memref<1x32xf32, #tpu.memory_space<vmem>>, vector<1x32xf32>
    %22 = vector.broadcast %21 : vector<1x32xf32> to vector<8x32xf32>
    %23 = arith.addf %20, %22 : vector<8x32xf32>
    %cst_16 = arith.constant 0.000000e+00 : f32
    %24 = vector.broadcast %cst_16 : f32 to vector<8x32xf32>
    %25 = arith.maximumf %23, %24 : vector<8x32xf32>
    %26 = vector.shape_cast %25 : vector<8x32xf32> to vector<2x4x32xf32>
    %27 = arith.truncf %26 : vector<2x4x32xf32> to vector<2x4x32xbf16>
    %c0_17 = arith.constant 0 : index
    %c0_18 = arith.constant 0 : index
    %c0_19 = arith.constant 0 : index
    %c0_20 = arith.constant 0 : index
    %28 = vector.load %arg5[%c0_17, %c0_18, %c0_19, %c0_20] : memref<1x2x4x32xbf16, #tpu.memory_space<vmem>>, vector<1x2x4x32xbf16>
    %29 = vector.shape_cast %28 : vector<1x2x4x32xbf16> to vector<2x4x32xbf16>
    %30 = vector.shape_cast %27 : vector<2x4x32xbf16> to vector<1x2x4x32xbf16>
    tpu.vector_store %arg5[%c0_17, %c0_18, %c0_19, %c0_20], %30 {strides = array<i32>} : memref<1x2x4x32xbf16, #tpu.memory_space<vmem>>, vector<1x2x4x32xbf16>,
    return
  }
  func.func @transform_0(%arg0: i32, %arg1: i32) -> (i32, i32, i32, i32) {
    %c0_i32 = arith.constant 0 : i32
    %c0_i32_0 = arith.constant 0 : i32
    %c0_i32_1 = arith.constant 0 : i32
    %c0_i32_2 = arith.constant 0 : i32
    return %arg0, %c0_i32, %c0_i32_0, %c0_i32_1 : i32, i32, i32, i32
  }
  func.func @transform_1(%arg0: i32, %arg1: i32) -> (i32, i32) {
    %c0_i32 = arith.constant 0 : i32
    %c0_i32_0 = arith.constant 0 : i32
    %c0_i32_1 = arith.constant 0 : i32
    return %c0_i32, %c0_i32_0 : i32, i32
  }
  func.func @transform_2(%arg0: i32, %arg1: i32) -> (i32, i32) {
    %c0_i32 = arith.constant 0 : i32
    %c0_i32_0 = arith.constant 0 : i32
    %c0_i32_1 = arith.constant 0 : i32
    return %c0_i32, %c0_i32_0 : i32, i32
  }
  func.func @transform_3(%arg0: i32, %arg1: i32) -> (i32, i32, i32, i32) {
    %c0_i32 = arith.constant 0 : i32
    %c0_i32_0 = arith.constant 0 : i32
    %c0_i32_1 = arith.constant 0 : i32
    return %arg0, %arg1, %c0_i32, %c0_i32_0 : i32, i32, i32, i32
  }
}

module attributes {stable_mosaic.version = 11 : i64} {
  func.func @_conv2x2_kernel(%arg0: i32, %arg1: i32, %arg2: memref<1x3x3x128xbf16, #tpu.memory_space<vmem>>, %arg3: memref<512x64xbf16, #tpu.memory_space<vmem>>, %arg4: memref<1x64xf32, #tpu.memory_space<vmem>>, %arg5: memref<1x1x2x64xbf16, #tpu.memory_space<vmem>>) attributes {dimension_semantics = [#tpu.dimension_semantics<parallel>, #tpu.dimension_semantics<parallel>], iteration_bounds = array<i64: 2, 2>, scalar_prefetch = 0 : i64, scratch_operands = 0 : i64, tpu.core_type = #tpu.core_type<tc>, window_params = [{transform_indices = @transform_0, window_bounds = array<i64: 1, 3, 3, 128>}, {pipeline_mode = #tpu.pipeline_mode<synchronous>, transform_indices = @transform_1, window_bounds = array<i64: 512, 64>}, {pipeline_mode = #tpu.pipeline_mode<synchronous>, transform_indices = @transform_2, window_bounds = array<i64: 1, 64>}, {transform_indices = @transform_3, window_bounds = array<i64: 1, 1, 2, 64>}]} {
    %c1_i32 = arith.constant 1 : i32
    %0 = arith.muli %arg1, %c1_i32 : i32
    %c0_i32 = arith.constant 0 : i32
    %1 = arith.addi %0, %c0_i32 : i32
    %c0 = arith.constant 0 : index
    %2 = arith.index_cast %1 : i32 to index
    %c0_0 = arith.constant 0 : index
    %c0_1 = arith.constant 0 : index
    %3 = vector.load %arg2[%c0, %2, %c0_0, %c0_1] : memref<1x3x3x128xbf16, #tpu.memory_space<vmem>>, vector<1x1x2x128xbf16>
    %4 = vector.shape_cast %3 : vector<1x1x2x128xbf16> to vector<1x2x128xbf16>
    %c0_i32_2 = arith.constant 0 : i32
    %5 = arith.addi %0, %c0_i32_2 : i32
    %c0_3 = arith.constant 0 : index
    %6 = arith.index_cast %5 : i32 to index
    %c1 = arith.constant 1 : index
    %c0_4 = arith.constant 0 : index
    %7 = vector.load %arg2[%c0_3, %6, %c1, %c0_4] : memref<1x3x3x128xbf16, #tpu.memory_space<vmem>>, vector<1x1x2x128xbf16>
    %8 = vector.shape_cast %7 : vector<1x1x2x128xbf16> to vector<1x2x128xbf16>
    %c1_i32_5 = arith.constant 1 : i32
    %9 = arith.addi %0, %c1_i32_5 : i32
    %c0_6 = arith.constant 0 : index
    %10 = arith.index_cast %9 : i32 to index
    %c0_7 = arith.constant 0 : index
    %c0_8 = arith.constant 0 : index
    %11 = vector.load %arg2[%c0_6, %10, %c0_7, %c0_8] : memref<1x3x3x128xbf16, #tpu.memory_space<vmem>>, vector<1x1x2x128xbf16>
    %12 = vector.shape_cast %11 : vector<1x1x2x128xbf16> to vector<1x2x128xbf16>
    %c1_i32_9 = arith.constant 1 : i32
    %13 = arith.addi %0, %c1_i32_9 : i32
    %c0_10 = arith.constant 0 : index
    %14 = arith.index_cast %13 : i32 to index
    %c1_11 = arith.constant 1 : index
    %c0_12 = arith.constant 0 : index
    %15 = vector.load %arg2[%c0_10, %14, %c1_11, %c0_12] : memref<1x3x3x128xbf16, #tpu.memory_space<vmem>>, vector<1x1x2x128xbf16>
    %16 = vector.shape_cast %15 : vector<1x1x2x128xbf16> to vector<1x2x128xbf16>
    %17 = tpu.concatenate %4, %8, %12, %16 in 2 : vector<1x2x128xbf16>, vector<1x2x128xbf16>, vector<1x2x128xbf16>, vector<1x2x128xbf16> -> vector<1x2x512xbf16>
    %18 = vector.shape_cast %17 : vector<1x2x512xbf16> to vector<2x512xbf16>
    %c0_13 = arith.constant 0 : index
    %c0_14 = arith.constant 0 : index
    %19 = vector.load %arg3[%c0_13, %c0_14] : memref<512x64xbf16, #tpu.memory_space<vmem>>, vector<512x64xbf16>
    %cst = arith.constant dense<0.000000e+00> : vector<2x64xf32>
    %20 = tpu.matmul %18, %19, %cst {dimension_numbers = #tpu.dot_dimension_numbers<[1], [0], [0], [1], [0, 0, 1, 1], [], []>} : vector<2x512xbf16>, vector<512x64xbf16>, vector<2x64xf32> -> vector<2x64xf32>
    %c0_15 = arith.constant 0 : index
    %c0_16 = arith.constant 0 : index
    %21 = vector.load %arg4[%c0_15, %c0_16] : memref<1x64xf32, #tpu.memory_space<vmem>>, vector<1x64xf32>
    %22 = vector.broadcast %21 : vector<1x64xf32> to vector<2x64xf32>
    %23 = arith.addf %20, %22 : vector<2x64xf32>
    %cst_17 = arith.constant 0.000000e+00 : f32
    %24 = vector.broadcast %cst_17 : f32 to vector<2x64xf32>
    %25 = arith.maximumf %23, %24 : vector<2x64xf32>
    %26 = vector.shape_cast %25 : vector<2x64xf32> to vector<1x2x64xf32>
    %27 = arith.truncf %26 : vector<1x2x64xf32> to vector<1x2x64xbf16>
    %c0_18 = arith.constant 0 : index
    %c0_19 = arith.constant 0 : index
    %c0_20 = arith.constant 0 : index
    %c0_21 = arith.constant 0 : index
    %28 = vector.load %arg5[%c0_18, %c0_19, %c0_20, %c0_21] : memref<1x1x2x64xbf16, #tpu.memory_space<vmem>>, vector<1x1x2x64xbf16>
    %29 = vector.shape_cast %28 : vector<1x1x2x64xbf16> to vector<1x2x64xbf16>
    %30 = vector.shape_cast %27 : vector<1x2x64xbf16> to vector<1x1x2x64xbf16>
    tpu.vector_store %arg5[%c0_18, %c0_19, %c0_20, %c0_21], %30 {strides = array<i32>} : memref<1x1x2x64xbf16, #tpu.memory_space<vmem>>, vector<1x1x2x64xbf16>,
    return
  }
  func.func @transform_0(%arg0: i32, %arg1: i32) -> (i32, i32, i32, i32) {
    %c0_i32 = arith.constant 0 : i32
    %c0_i32_0 = arith.constant 0 : i32
    %c0_i32_1 = arith.constant 0 : i32
    %c0_i32_2 = arith.constant 0 : i32
    return %arg0, %c0_i32, %c0_i32_0, %c0_i32_1 : i32, i32, i32, i32
  }
  func.func @transform_1(%arg0: i32, %arg1: i32) -> (i32, i32) {
    %c0_i32 = arith.constant 0 : i32
    %c0_i32_0 = arith.constant 0 : i32
    %c0_i32_1 = arith.constant 0 : i32
    return %c0_i32, %c0_i32_0 : i32, i32
  }
  func.func @transform_2(%arg0: i32, %arg1: i32) -> (i32, i32) {
    %c0_i32 = arith.constant 0 : i32
    %c0_i32_0 = arith.constant 0 : i32
    %c0_i32_1 = arith.constant 0 : i32
    return %c0_i32, %c0_i32_0 : i32, i32
  }
  func.func @transform_3(%arg0: i32, %arg1: i32) -> (i32, i32, i32, i32) {
    %c0_i32 = arith.constant 0 : i32
    %c0_i32_0 = arith.constant 0 : i32
    %c0_i32_1 = arith.constant 0 : i32
    return %arg0, %arg1, %c0_i32, %c0_i32_0 : i32, i32, i32, i32
  }
}

module attributes {stable_mosaic.version = 11 : i64} {
  func.func @_conv2x2_kernel(%arg0: i32, %arg1: i32, %arg2: memref<1x2x2x256xbf16, #tpu.memory_space<vmem>>, %arg3: memref<1024x128xbf16, #tpu.memory_space<vmem>>, %arg4: memref<1x128xf32, #tpu.memory_space<vmem>>, %arg5: memref<1x1x1x128xbf16, #tpu.memory_space<vmem>>) attributes {dimension_semantics = [#tpu.dimension_semantics<parallel>, #tpu.dimension_semantics<parallel>], iteration_bounds = array<i64: 2, 1>, scalar_prefetch = 0 : i64, scratch_operands = 0 : i64, tpu.core_type = #tpu.core_type<tc>, window_params = [{transform_indices = @transform_0, window_bounds = array<i64: 1, 2, 2, 256>}, {pipeline_mode = #tpu.pipeline_mode<synchronous>, transform_indices = @transform_1, window_bounds = array<i64: 1024, 128>}, {pipeline_mode = #tpu.pipeline_mode<synchronous>, transform_indices = @transform_2, window_bounds = array<i64: 1, 128>}, {transform_indices = @transform_3, window_bounds = array<i64: 1, 1, 1, 128>}]} {
    %c1_i32 = arith.constant 1 : i32
    %0 = arith.muli %arg1, %c1_i32 : i32
    %c0_i32 = arith.constant 0 : i32
    %1 = arith.addi %0, %c0_i32 : i32
    %c0 = arith.constant 0 : index
    %2 = arith.index_cast %1 : i32 to index
    %c0_0 = arith.constant 0 : index
    %c0_1 = arith.constant 0 : index
    %3 = vector.load %arg2[%c0, %2, %c0_0, %c0_1] : memref<1x2x2x256xbf16, #tpu.memory_space<vmem>>, vector<1x1x1x256xbf16>
    %4 = vector.shape_cast %3 : vector<1x1x1x256xbf16> to vector<1x1x256xbf16>
    %c0_i32_2 = arith.constant 0 : i32
    %5 = arith.addi %0, %c0_i32_2 : i32
    %c0_3 = arith.constant 0 : index
    %6 = arith.index_cast %5 : i32 to index
    %c1 = arith.constant 1 : index
    %c0_4 = arith.constant 0 : index
    %7 = vector.load %arg2[%c0_3, %6, %c1, %c0_4] : memref<1x2x2x256xbf16, #tpu.memory_space<vmem>>, vector<1x1x1x256xbf16>
    %8 = vector.shape_cast %7 : vector<1x1x1x256xbf16> to vector<1x1x256xbf16>
    %c1_i32_5 = arith.constant 1 : i32
    %9 = arith.addi %0, %c1_i32_5 : i32
    %c0_6 = arith.constant 0 : index
    %10 = arith.index_cast %9 : i32 to index
    %c0_7 = arith.constant 0 : index
    %c0_8 = arith.constant 0 : index
    %11 = vector.load %arg2[%c0_6, %10, %c0_7, %c0_8] : memref<1x2x2x256xbf16, #tpu.memory_space<vmem>>, vector<1x1x1x256xbf16>
    %12 = vector.shape_cast %11 : vector<1x1x1x256xbf16> to vector<1x1x256xbf16>
    %c1_i32_9 = arith.constant 1 : i32
    %13 = arith.addi %0, %c1_i32_9 : i32
    %c0_10 = arith.constant 0 : index
    %14 = arith.index_cast %13 : i32 to index
    %c1_11 = arith.constant 1 : index
    %c0_12 = arith.constant 0 : index
    %15 = vector.load %arg2[%c0_10, %14, %c1_11, %c0_12] : memref<1x2x2x256xbf16, #tpu.memory_space<vmem>>, vector<1x1x1x256xbf16>
    %16 = vector.shape_cast %15 : vector<1x1x1x256xbf16> to vector<1x1x256xbf16>
    %17 = tpu.concatenate %4, %8, %12, %16 in 2 : vector<1x1x256xbf16>, vector<1x1x256xbf16>, vector<1x1x256xbf16>, vector<1x1x256xbf16> -> vector<1x1x1024xbf16>
    %18 = vector.shape_cast %17 : vector<1x1x1024xbf16> to vector<1x1024xbf16>
    %c0_13 = arith.constant 0 : index
    %c0_14 = arith.constant 0 : index
    %19 = vector.load %arg3[%c0_13, %c0_14] : memref<1024x128xbf16, #tpu.memory_space<vmem>>, vector<1024x128xbf16>
    %cst = arith.constant dense<0.000000e+00> : vector<1x128xf32>
    %20 = tpu.matmul %18, %19, %cst {dimension_numbers = #tpu.dot_dimension_numbers<[1], [0], [0], [1], [0, 0, 1, 1], [], []>} : vector<1x1024xbf16>, vector<1024x128xbf16>, vector<1x128xf32> -> vector<1x128xf32>
    %c0_15 = arith.constant 0 : index
    %c0_16 = arith.constant 0 : index
    %21 = vector.load %arg4[%c0_15, %c0_16] : memref<1x128xf32, #tpu.memory_space<vmem>>, vector<1x128xf32>
    %22 = arith.addf %20, %21 : vector<1x128xf32>
    %23 = vector.shape_cast %22 : vector<1x128xf32> to vector<1x1x128xf32>
    %24 = arith.truncf %23 : vector<1x1x128xf32> to vector<1x1x128xbf16>
    %c0_17 = arith.constant 0 : index
    %c0_18 = arith.constant 0 : index
    %c0_19 = arith.constant 0 : index
    %c0_20 = arith.constant 0 : index
    %25 = vector.load %arg5[%c0_17, %c0_18, %c0_19, %c0_20] : memref<1x1x1x128xbf16, #tpu.memory_space<vmem>>, vector<1x1x1x128xbf16>
    %26 = vector.shape_cast %25 : vector<1x1x1x128xbf16> to vector<1x1x128xbf16>
    %27 = vector.shape_cast %24 : vector<1x1x128xbf16> to vector<1x1x1x128xbf16>
    tpu.vector_store %arg5[%c0_17, %c0_18, %c0_19, %c0_20], %27 {strides = array<i32>} : memref<1x1x1x128xbf16, #tpu.memory_space<vmem>>, vector<1x1x1x128xbf16>,
    return
  }
  func.func @transform_0(%arg0: i32, %arg1: i32) -> (i32, i32, i32, i32) {
    %c0_i32 = arith.constant 0 : i32
    %c0_i32_0 = arith.constant 0 : i32
    %c0_i32_1 = arith.constant 0 : i32
    %c0_i32_2 = arith.constant 0 : i32
    return %arg0, %c0_i32, %c0_i32_0, %c0_i32_1 : i32, i32, i32, i32
  }
  func.func @transform_1(%arg0: i32, %arg1: i32) -> (i32, i32) {
    %c0_i32 = arith.constant 0 : i32
    %c0_i32_0 = arith.constant 0 : i32
    %c0_i32_1 = arith.constant 0 : i32
    return %c0_i32, %c0_i32_0 : i32, i32
  }
  func.func @transform_2(%arg0: i32, %arg1: i32) -> (i32, i32) {
    %c0_i32 = arith.constant 0 : i32
    %c0_i32_0 = arith.constant 0 : i32
    %c0_i32_1 = arith.constant 0 : i32
    return %c0_i32, %c0_i32_0 : i32, i32
  }
  func.func @transform_3(%arg0: i32, %arg1: i32) -> (i32, i32, i32, i32) {
    %c0_i32 = arith.constant 0 : i32
    %c0_i32_0 = arith.constant 0 : i32
    %c0_i32_1 = arith.constant 0 : i32
    return %arg0, %arg1, %c0_i32, %c0_i32_0 : i32, i32, i32, i32
  }
}

module attributes {stable_mosaic.version = 11 : i64} {
  func.func @_deconv2x2_kernel(%arg0: i32, %arg1: i32, %arg2: memref<1x3x3x128xbf16, #tpu.memory_space<vmem>>, %arg3: memref<4x512x64xbf16, #tpu.memory_space<vmem>>, %arg4: memref<1x64xf32, #tpu.memory_space<vmem>>, %arg5: memref<1x1x2x1x128xbf16, #tpu.memory_space<vmem>>) attributes {dimension_semantics = [#tpu.dimension_semantics<parallel>, #tpu.dimension_semantics<parallel>], iteration_bounds = array<i64: 2, 1>, scalar_prefetch = 0 : i64, scratch_operands = 0 : i64, tpu.core_type = #tpu.core_type<tc>, window_params = [{transform_indices = @transform_0, window_bounds = array<i64: 1, 3, 3, 128>}, {pipeline_mode = #tpu.pipeline_mode<synchronous>, transform_indices = @transform_1, window_bounds = array<i64: 4, 512, 64>}, {pipeline_mode = #tpu.pipeline_mode<synchronous>, transform_indices = @transform_2, window_bounds = array<i64: 1, 64>}, {transform_indices = @transform_3, window_bounds = array<i64: 1, 1, 2, 1, 128>}]} {
    %c1_i32 = arith.constant 1 : i32
    %0 = arith.muli %arg1, %c1_i32 : i32
    %c0_i32 = arith.constant 0 : i32
    %1 = arith.addi %0, %c0_i32 : i32
    %c0_i32_0 = arith.constant 0 : i32
    %2 = arith.addi %1, %c0_i32_0 : i32
    %c0 = arith.constant 0 : index
    %3 = arith.index_cast %2 : i32 to index
    %c0_1 = arith.constant 0 : index
    %c0_2 = arith.constant 0 : index
    %4 = vector.load %arg2[%c0, %3, %c0_1, %c0_2] : memref<1x3x3x128xbf16, #tpu.memory_space<vmem>>, vector<1x1x1x128xbf16>
    %5 = vector.shape_cast %4 : vector<1x1x1x128xbf16> to vector<1x1x128xbf16>
    %c0_i32_3 = arith.constant 0 : i32
    %6 = arith.addi %0, %c0_i32_3 : i32
    %c0_i32_4 = arith.constant 0 : i32
    %7 = arith.addi %6, %c0_i32_4 : i32
    %c0_5 = arith.constant 0 : index
    %8 = arith.index_cast %7 : i32 to index
    %c1 = arith.constant 1 : index
    %c0_6 = arith.constant 0 : index
    %9 = vector.load %arg2[%c0_5, %8, %c1, %c0_6] : memref<1x3x3x128xbf16, #tpu.memory_space<vmem>>, vector<1x1x1x128xbf16>
    %10 = vector.shape_cast %9 : vector<1x1x1x128xbf16> to vector<1x1x128xbf16>
    %c0_i32_7 = arith.constant 0 : i32
    %11 = arith.addi %0, %c0_i32_7 : i32
    %c1_i32_8 = arith.constant 1 : i32
    %12 = arith.addi %11, %c1_i32_8 : i32
    %c0_9 = arith.constant 0 : index
    %13 = arith.index_cast %12 : i32 to index
    %c0_10 = arith.constant 0 : index
    %c0_11 = arith.constant 0 : index
    %14 = vector.load %arg2[%c0_9, %13, %c0_10, %c0_11] : memref<1x3x3x128xbf16, #tpu.memory_space<vmem>>, vector<1x1x1x128xbf16>
    %15 = vector.shape_cast %14 : vector<1x1x1x128xbf16> to vector<1x1x128xbf16>
    %c0_i32_12 = arith.constant 0 : i32
    %16 = arith.addi %0, %c0_i32_12 : i32
    %c1_i32_13 = arith.constant 1 : i32
    %17 = arith.addi %16, %c1_i32_13 : i32
    %c0_14 = arith.constant 0 : index
    %18 = arith.index_cast %17 : i32 to index
    %c1_15 = arith.constant 1 : index
    %c0_16 = arith.constant 0 : index
    %19 = vector.load %arg2[%c0_14, %18, %c1_15, %c0_16] : memref<1x3x3x128xbf16, #tpu.memory_space<vmem>>, vector<1x1x1x128xbf16>
    %20 = vector.shape_cast %19 : vector<1x1x1x128xbf16> to vector<1x1x128xbf16>
    %21 = tpu.concatenate %5, %10, %15, %20 in 2 : vector<1x1x128xbf16>, vector<1x1x128xbf16>, vector<1x1x128xbf16>, vector<1x1x128xbf16> -> vector<1x1x512xbf16>
    %22 = vector.shape_cast %21 : vector<1x1x512xbf16> to vector<1x512xbf16>
    %c0_17 = arith.constant 0 : index
    %c0_18 = arith.constant 0 : index
    %c0_19 = arith.constant 0 : index
    %23 = vector.load %arg3[%c0_17, %c0_18, %c0_19] : memref<4x512x64xbf16, #tpu.memory_space<vmem>>, vector<1x512x64xbf16>
    %24 = vector.shape_cast %23 : vector<1x512x64xbf16> to vector<512x64xbf16>
    %cst = arith.constant dense<0.000000e+00> : vector<1x64xf32>
    %25 = tpu.matmul %22, %24, %cst {dimension_numbers = #tpu.dot_dimension_numbers<[1], [0], [0], [1], [0, 0, 1, 1], [], []>} : vector<1x512xbf16>, vector<512x64xbf16>, vector<1x64xf32> -> vector<1x64xf32>
    %c0_20 = arith.constant 0 : index
    %c0_21 = arith.constant 0 : index
    %26 = vector.load %arg4[%c0_20, %c0_21] : memref<1x64xf32, #tpu.memory_space<vmem>>, vector<1x64xf32>
    %27 = arith.addf %25, %26 : vector<1x64xf32>
    %cst_22 = arith.constant 0.000000e+00 : f32
    %28 = vector.broadcast %cst_22 : f32 to vector<1x64xf32>
    %29 = arith.maximumf %27, %28 : vector<1x64xf32>
    %30 = vector.shape_cast %29 : vector<1x64xf32> to vector<1x1x64xf32>
    %c0_i32_23 = arith.constant 0 : i32
    %31 = arith.addi %0, %c0_i32_23 : i32
    %c0_i32_24 = arith.constant 0 : i32
    %32 = arith.addi %31, %c0_i32_24 : i32
    %c0_25 = arith.constant 0 : index
    %33 = arith.index_cast %32 : i32 to index
    %c1_26 = arith.constant 1 : index
    %c0_27 = arith.constant 0 : index
    %34 = vector.load %arg2[%c0_25, %33, %c1_26, %c0_27] : memref<1x3x3x128xbf16, #tpu.memory_space<vmem>>, vector<1x1x1x128xbf16>
    %35 = vector.shape_cast %34 : vector<1x1x1x128xbf16> to vector<1x1x128xbf16>
    %c0_i32_28 = arith.constant 0 : i32
    %36 = arith.addi %0, %c0_i32_28 : i32
    %c0_i32_29 = arith.constant 0 : i32
    %37 = arith.addi %36, %c0_i32_29 : i32
    %c0_30 = arith.constant 0 : index
    %38 = arith.index_cast %37 : i32 to index
    %c2 = arith.constant 2 : index
    %c0_31 = arith.constant 0 : index
    %39 = vector.load %arg2[%c0_30, %38, %c2, %c0_31] : memref<1x3x3x128xbf16, #tpu.memory_space<vmem>>, vector<1x1x1x128xbf16>
    %40 = vector.shape_cast %39 : vector<1x1x1x128xbf16> to vector<1x1x128xbf16>
    %c0_i32_32 = arith.constant 0 : i32
    %41 = arith.addi %0, %c0_i32_32 : i32
    %c1_i32_33 = arith.constant 1 : i32
    %42 = arith.addi %41, %c1_i32_33 : i32
    %c0_34 = arith.constant 0 : index
    %43 = arith.index_cast %42 : i32 to index
    %c1_35 = arith.constant 1 : index
    %c0_36 = arith.constant 0 : index
    %44 = vector.load %arg2[%c0_34, %43, %c1_35, %c0_36] : memref<1x3x3x128xbf16, #tpu.memory_space<vmem>>, vector<1x1x1x128xbf16>
    %45 = vector.shape_cast %44 : vector<1x1x1x128xbf16> to vector<1x1x128xbf16>
    %c0_i32_37 = arith.constant 0 : i32
    %46 = arith.addi %0, %c0_i32_37 : i32
    %c1_i32_38 = arith.constant 1 : i32
    %47 = arith.addi %46, %c1_i32_38 : i32
    %c0_39 = arith.constant 0 : index
    %48 = arith.index_cast %47 : i32 to index
    %c2_40 = arith.constant 2 : index
    %c0_41 = arith.constant 0 : index
    %49 = vector.load %arg2[%c0_39, %48, %c2_40, %c0_41] : memref<1x3x3x128xbf16, #tpu.memory_space<vmem>>, vector<1x1x1x128xbf16>
    %50 = vector.shape_cast %49 : vector<1x1x1x128xbf16> to vector<1x1x128xbf16>
    %51 = tpu.concatenate %35, %40, %45, %50 in 2 : vector<1x1x128xbf16>, vector<1x1x128xbf16>, vector<1x1x128xbf16>, vector<1x1x128xbf16> -> vector<1x1x512xbf16>
    %52 = vector.shape_cast %51 : vector<1x1x512xbf16> to vector<1x512xbf16>
    %c1_42 = arith.constant 1 : index
    %c0_43 = arith.constant 0 : index
    %c0_44 = arith.constant 0 : index
    %53 = vector.load %arg3[%c1_42, %c0_43, %c0_44] : memref<4x512x64xbf16, #tpu.memory_space<vmem>>, vector<1x512x64xbf16>
    %54 = vector.shape_cast %53 : vector<1x512x64xbf16> to vector<512x64xbf16>
    %cst_45 = arith.constant dense<0.000000e+00> : vector<1x64xf32>
    %55 = tpu.matmul %52, %54, %cst_45 {dimension_numbers = #tpu.dot_dimension_numbers<[1], [0], [0], [1], [0, 0, 1, 1], [], []>} : vector<1x512xbf16>, vector<512x64xbf16>, vector<1x64xf32> -> vector<1x64xf32>
    %c0_46 = arith.constant 0 : index
    %c0_47 = arith.constant 0 : index
    %56 = vector.load %arg4[%c0_46, %c0_47] : memref<1x64xf32, #tpu.memory_space<vmem>>, vector<1x64xf32>
    %57 = arith.addf %55, %56 : vector<1x64xf32>
    %cst_48 = arith.constant 0.000000e+00 : f32
    %58 = vector.broadcast %cst_48 : f32 to vector<1x64xf32>
    %59 = arith.maximumf %57, %58 : vector<1x64xf32>
    %60 = vector.shape_cast %59 : vector<1x64xf32> to vector<1x1x64xf32>
    %61 = tpu.concatenate %30, %60 in 2 : vector<1x1x64xf32>, vector<1x1x64xf32> -> vector<1x1x128xf32>
    %c1_i32_49 = arith.constant 1 : i32
    %62 = arith.addi %0, %c1_i32_49 : i32
    %c0_i32_50 = arith.constant 0 : i32
    %63 = arith.addi %62, %c0_i32_50 : i32
    %c0_51 = arith.constant 0 : index
    %64 = arith.index_cast %63 : i32 to index
    %c0_52 = arith.constant 0 : index
    %c0_53 = arith.constant 0 : index
    %65 = vector.load %arg2[%c0_51, %64, %c0_52, %c0_53] : memref<1x3x3x128xbf16, #tpu.memory_space<vmem>>, vector<1x1x1x128xbf16>
    %66 = vector.shape_cast %65 : vector<1x1x1x128xbf16> to vector<1x1x128xbf16>
    %c1_i32_54 = arith.constant 1 : i32
    %67 = arith.addi %0, %c1_i32_54 : i32
    %c0_i32_55 = arith.constant 0 : i32
    %68 = arith.addi %67, %c0_i32_55 : i32
    %c0_56 = arith.constant 0 : index
    %69 = arith.index_cast %68 : i32 to index
    %c1_57 = arith.constant 1 : index
    %c0_58 = arith.constant 0 : index
    %70 = vector.load %arg2[%c0_56, %69, %c1_57, %c0_58] : memref<1x3x3x128xbf16, #tpu.memory_space<vmem>>, vector<1x1x1x128xbf16>
    %71 = vector.shape_cast %70 : vector<1x1x1x128xbf16> to vector<1x1x128xbf16>
    %c1_i32_59 = arith.constant 1 : i32
    %72 = arith.addi %0, %c1_i32_59 : i32
    %c1_i32_60 = arith.constant 1 : i32
    %73 = arith.addi %72, %c1_i32_60 : i32
    %c0_61 = arith.constant 0 : index
    %74 = arith.index_cast %73 : i32 to index
    %c0_62 = arith.constant 0 : index
    %c0_63 = arith.constant 0 : index
    %75 = vector.load %arg2[%c0_61, %74, %c0_62, %c0_63] : memref<1x3x3x128xbf16, #tpu.memory_space<vmem>>, vector<1x1x1x128xbf16>
    %76 = vector.shape_cast %75 : vector<1x1x1x128xbf16> to vector<1x1x128xbf16>
    %c1_i32_64 = arith.constant 1 : i32
    %77 = arith.addi %0, %c1_i32_64 : i32
    %c1_i32_65 = arith.constant 1 : i32
    %78 = arith.addi %77, %c1_i32_65 : i32
    %c0_66 = arith.constant 0 : index
    %79 = arith.index_cast %78 : i32 to index
    %c1_67 = arith.constant 1 : index
    %c0_68 = arith.constant 0 : index
    %80 = vector.load %arg2[%c0_66, %79, %c1_67, %c0_68] : memref<1x3x3x128xbf16, #tpu.memory_space<vmem>>, vector<1x1x1x128xbf16>
    %81 = vector.shape_cast %80 : vector<1x1x1x128xbf16> to vector<1x1x128xbf16>
    %82 = tpu.concatenate %66, %71, %76, %81 in 2 : vector<1x1x128xbf16>, vector<1x1x128xbf16>, vector<1x1x128xbf16>, vector<1x1x128xbf16> -> vector<1x1x512xbf16>
    %83 = vector.shape_cast %82 : vector<1x1x512xbf16> to vector<1x512xbf16>
    %c2_69 = arith.constant 2 : index
    %c0_70 = arith.constant 0 : index
    %c0_71 = arith.constant 0 : index
    %84 = vector.load %arg3[%c2_69, %c0_70, %c0_71] : memref<4x512x64xbf16, #tpu.memory_space<vmem>>, vector<1x512x64xbf16>
    %85 = vector.shape_cast %84 : vector<1x512x64xbf16> to vector<512x64xbf16>
    %cst_72 = arith.constant dense<0.000000e+00> : vector<1x64xf32>
    %86 = tpu.matmul %83, %85, %cst_72 {dimension_numbers = #tpu.dot_dimension_numbers<[1], [0], [0], [1], [0, 0, 1, 1], [], []>} : vector<1x512xbf16>, vector<512x64xbf16>, vector<1x64xf32> -> vector<1x64xf32>
    %c0_73 = arith.constant 0 : index
    %c0_74 = arith.constant 0 : index
    %87 = vector.load %arg4[%c0_73, %c0_74] : memref<1x64xf32, #tpu.memory_space<vmem>>, vector<1x64xf32>
    %88 = arith.addf %86, %87 : vector<1x64xf32>
    %cst_75 = arith.constant 0.000000e+00 : f32
    %89 = vector.broadcast %cst_75 : f32 to vector<1x64xf32>
    %90 = arith.maximumf %88, %89 : vector<1x64xf32>
    %91 = vector.shape_cast %90 : vector<1x64xf32> to vector<1x1x64xf32>
    %c1_i32_76 = arith.constant 1 : i32
    %92 = arith.addi %0, %c1_i32_76 : i32
    %c0_i32_77 = arith.constant 0 : i32
    %93 = arith.addi %92, %c0_i32_77 : i32
    %c0_78 = arith.constant 0 : index
    %94 = arith.index_cast %93 : i32 to index
    %c1_79 = arith.constant 1 : index
    %c0_80 = arith.constant 0 : index
    %95 = vector.load %arg2[%c0_78, %94, %c1_79, %c0_80] : memref<1x3x3x128xbf16, #tpu.memory_space<vmem>>, vector<1x1x1x128xbf16>
    %96 = vector.shape_cast %95 : vector<1x1x1x128xbf16> to vector<1x1x128xbf16>
    %c1_i32_81 = arith.constant 1 : i32
    %97 = arith.addi %0, %c1_i32_81 : i32
    %c0_i32_82 = arith.constant 0 : i32
    %98 = arith.addi %97, %c0_i32_82 : i32
    %c0_83 = arith.constant 0 : index
    %99 = arith.index_cast %98 : i32 to index
    %c2_84 = arith.constant 2 : index
    %c0_85 = arith.constant 0 : index
    %100 = vector.load %arg2[%c0_83, %99, %c2_84, %c0_85] : memref<1x3x3x128xbf16, #tpu.memory_space<vmem>>, vector<1x1x1x128xbf16>
    %101 = vector.shape_cast %100 : vector<1x1x1x128xbf16> to vector<1x1x128xbf16>
    %c1_i32_86 = arith.constant 1 : i32
    %102 = arith.addi %0, %c1_i32_86 : i32
    %c1_i32_87 = arith.constant 1 : i32
    %103 = arith.addi %102, %c1_i32_87 : i32
    %c0_88 = arith.constant 0 : index
    %104 = arith.index_cast %103 : i32 to index
    %c1_89 = arith.constant 1 : index
    %c0_90 = arith.constant 0 : index
    %105 = vector.load %arg2[%c0_88, %104, %c1_89, %c0_90] : memref<1x3x3x128xbf16, #tpu.memory_space<vmem>>, vector<1x1x1x128xbf16>
    %106 = vector.shape_cast %105 : vector<1x1x1x128xbf16> to vector<1x1x128xbf16>
    %c1_i32_91 = arith.constant 1 : i32
    %107 = arith.addi %0, %c1_i32_91 : i32
    %c1_i32_92 = arith.constant 1 : i32
    %108 = arith.addi %107, %c1_i32_92 : i32
    %c0_93 = arith.constant 0 : index
    %109 = arith.index_cast %108 : i32 to index
    %c2_94 = arith.constant 2 : index
    %c0_95 = arith.constant 0 : index
    %110 = vector.load %arg2[%c0_93, %109, %c2_94, %c0_95] : memref<1x3x3x128xbf16, #tpu.memory_space<vmem>>, vector<1x1x1x128xbf16>
    %111 = vector.shape_cast %110 : vector<1x1x1x128xbf16> to vector<1x1x128xbf16>
    %112 = tpu.concatenate %96, %101, %106, %111 in 2 : vector<1x1x128xbf16>, vector<1x1x128xbf16>, vector<1x1x128xbf16>, vector<1x1x128xbf16> -> vector<1x1x512xbf16>
    %113 = vector.shape_cast %112 : vector<1x1x512xbf16> to vector<1x512xbf16>
    %c3 = arith.constant 3 : index
    %c0_96 = arith.constant 0 : index
    %c0_97 = arith.constant 0 : index
    %114 = vector.load %arg3[%c3, %c0_96, %c0_97] : memref<4x512x64xbf16, #tpu.memory_space<vmem>>, vector<1x512x64xbf16>
    %115 = vector.shape_cast %114 : vector<1x512x64xbf16> to vector<512x64xbf16>
    %cst_98 = arith.constant dense<0.000000e+00> : vector<1x64xf32>
    %116 = tpu.matmul %113, %115, %cst_98 {dimension_numbers = #tpu.dot_dimension_numbers<[1], [0], [0], [1], [0, 0, 1, 1], [], []>} : vector<1x512xbf16>, vector<512x64xbf16>, vector<1x64xf32> -> vector<1x64xf32>
    %c0_99 = arith.constant 0 : index
    %c0_100 = arith.constant 0 : index
    %117 = vector.load %arg4[%c0_99, %c0_100] : memref<1x64xf32, #tpu.memory_space<vmem>>, vector<1x64xf32>
    %118 = arith.addf %116, %117 : vector<1x64xf32>
    %cst_101 = arith.constant 0.000000e+00 : f32
    %119 = vector.broadcast %cst_101 : f32 to vector<1x64xf32>
    %120 = arith.maximumf %118, %119 : vector<1x64xf32>
    %121 = vector.shape_cast %120 : vector<1x64xf32> to vector<1x1x64xf32>
    %122 = tpu.concatenate %91, %121 in 2 : vector<1x1x64xf32>, vector<1x1x64xf32> -> vector<1x1x128xf32>
    %123 = vector.shape_cast %61 : vector<1x1x128xf32> to vector<1x1x1x128xf32>
    %124 = vector.shape_cast %122 : vector<1x1x128xf32> to vector<1x1x1x128xf32>
    %125 = tpu.concatenate %123, %124 in 1 : vector<1x1x1x128xf32>, vector<1x1x1x128xf32> -> vector<1x2x1x128xf32>
    %126 = arith.truncf %125 : vector<1x2x1x128xf32> to vector<1x2x1x128xbf16>
    %c0_102 = arith.constant 0 : index
    %c0_103 = arith.constant 0 : index
    %c0_104 = arith.constant 0 : index
    %c0_105 = arith.constant 0 : index
    %c0_106 = arith.constant 0 : index
    %127 = vector.load %arg5[%c0_102, %c0_103, %c0_104, %c0_105, %c0_106] : memref<1x1x2x1x128xbf16, #tpu.memory_space<vmem>>, vector<1x1x2x1x128xbf16>
    %128 = vector.shape_cast %127 : vector<1x1x2x1x128xbf16> to vector<1x2x1x128xbf16>
    %129 = vector.shape_cast %126 : vector<1x2x1x128xbf16> to vector<1x1x2x1x128xbf16>
    tpu.vector_store %arg5[%c0_102, %c0_103, %c0_104, %c0_105, %c0_106], %129 {strides = array<i32>} : memref<1x1x2x1x128xbf16, #tpu.memory_space<vmem>>, vector<1x1x2x1x128xbf16>,
    return
  }
  func.func @transform_0(%arg0: i32, %arg1: i32) -> (i32, i32, i32, i32) {
    %c0_i32 = arith.constant 0 : i32
    %c0_i32_0 = arith.constant 0 : i32
    %c0_i32_1 = arith.constant 0 : i32
    %c0_i32_2 = arith.constant 0 : i32
    return %arg0, %c0_i32, %c0_i32_0, %c0_i32_1 : i32, i32, i32, i32
  }
  func.func @transform_1(%arg0: i32, %arg1: i32) -> (i32, i32, i32) {
    %c0_i32 = arith.constant 0 : i32
    %c0_i32_0 = arith.constant 0 : i32
    %c0_i32_1 = arith.constant 0 : i32
    %c0_i32_2 = arith.constant 0 : i32
    return %c0_i32, %c0_i32_0, %c0_i32_1 : i32, i32, i32
  }
  func.func @transform_2(%arg0: i32, %arg1: i32) -> (i32, i32) {
    %c0_i32 = arith.constant 0 : i32
    %c0_i32_0 = arith.constant 0 : i32
    %c0_i32_1 = arith.constant 0 : i32
    return %c0_i32, %c0_i32_0 : i32, i32
  }
  func.func @transform_3(%arg0: i32, %arg1: i32) -> (i32, i32, i32, i32, i32) {
    %c0_i32 = arith.constant 0 : i32
    %c0_i32_0 = arith.constant 0 : i32
    %c0_i32_1 = arith.constant 0 : i32
    %c0_i32_2 = arith.constant 0 : i32
    return %arg0, %arg1, %c0_i32, %c0_i32_0, %c0_i32_1 : i32, i32, i32, i32, i32
  }
}

module attributes {stable_mosaic.version = 11 : i64} {
  func.func @_deconv2x2_kernel(%arg0: i32, %arg1: i32, %arg2: memref<1x4x4x64xbf16, #tpu.memory_space<vmem>>, %arg3: memref<4x256x32xbf16, #tpu.memory_space<vmem>>, %arg4: memref<1x32xf32, #tpu.memory_space<vmem>>, %arg5: memref<1x1x2x2x64xbf16, #tpu.memory_space<vmem>>) attributes {dimension_semantics = [#tpu.dimension_semantics<parallel>, #tpu.dimension_semantics<parallel>], iteration_bounds = array<i64: 2, 2>, scalar_prefetch = 0 : i64, scratch_operands = 0 : i64, tpu.core_type = #tpu.core_type<tc>, window_params = [{transform_indices = @transform_0, window_bounds = array<i64: 1, 4, 4, 64>}, {pipeline_mode = #tpu.pipeline_mode<synchronous>, transform_indices = @transform_1, window_bounds = array<i64: 4, 256, 32>}, {pipeline_mode = #tpu.pipeline_mode<synchronous>, transform_indices = @transform_2, window_bounds = array<i64: 1, 32>}, {transform_indices = @transform_3, window_bounds = array<i64: 1, 1, 2, 2, 64>}]} {
    %c1_i32 = arith.constant 1 : i32
    %0 = arith.muli %arg1, %c1_i32 : i32
    %c0_i32 = arith.constant 0 : i32
    %1 = arith.addi %0, %c0_i32 : i32
    %c0_i32_0 = arith.constant 0 : i32
    %2 = arith.addi %1, %c0_i32_0 : i32
    %c0 = arith.constant 0 : index
    %3 = arith.index_cast %2 : i32 to index
    %c0_1 = arith.constant 0 : index
    %c0_2 = arith.constant 0 : index
    %4 = vector.load %arg2[%c0, %3, %c0_1, %c0_2] : memref<1x4x4x64xbf16, #tpu.memory_space<vmem>>, vector<1x1x2x64xbf16>
    %5 = vector.shape_cast %4 : vector<1x1x2x64xbf16> to vector<1x2x64xbf16>
    %c0_i32_3 = arith.constant 0 : i32
    %6 = arith.addi %0, %c0_i32_3 : i32
    %c0_i32_4 = arith.constant 0 : i32
    %7 = arith.addi %6, %c0_i32_4 : i32
    %c0_5 = arith.constant 0 : index
    %8 = arith.index_cast %7 : i32 to index
    %c1 = arith.constant 1 : index
    %c0_6 = arith.constant 0 : index
    %9 = vector.load %arg2[%c0_5, %8, %c1, %c0_6] : memref<1x4x4x64xbf16, #tpu.memory_space<vmem>>, vector<1x1x2x64xbf16>
    %10 = vector.shape_cast %9 : vector<1x1x2x64xbf16> to vector<1x2x64xbf16>
    %c0_i32_7 = arith.constant 0 : i32
    %11 = arith.addi %0, %c0_i32_7 : i32
    %c1_i32_8 = arith.constant 1 : i32
    %12 = arith.addi %11, %c1_i32_8 : i32
    %c0_9 = arith.constant 0 : index
    %13 = arith.index_cast %12 : i32 to index
    %c0_10 = arith.constant 0 : index
    %c0_11 = arith.constant 0 : index
    %14 = vector.load %arg2[%c0_9, %13, %c0_10, %c0_11] : memref<1x4x4x64xbf16, #tpu.memory_space<vmem>>, vector<1x1x2x64xbf16>
    %15 = vector.shape_cast %14 : vector<1x1x2x64xbf16> to vector<1x2x64xbf16>
    %c0_i32_12 = arith.constant 0 : i32
    %16 = arith.addi %0, %c0_i32_12 : i32
    %c1_i32_13 = arith.constant 1 : i32
    %17 = arith.addi %16, %c1_i32_13 : i32
    %c0_14 = arith.constant 0 : index
    %18 = arith.index_cast %17 : i32 to index
    %c1_15 = arith.constant 1 : index
    %c0_16 = arith.constant 0 : index
    %19 = vector.load %arg2[%c0_14, %18, %c1_15, %c0_16] : memref<1x4x4x64xbf16, #tpu.memory_space<vmem>>, vector<1x1x2x64xbf16>
    %20 = vector.shape_cast %19 : vector<1x1x2x64xbf16> to vector<1x2x64xbf16>
    %21 = tpu.concatenate %5, %10, %15, %20 in 2 : vector<1x2x64xbf16>, vector<1x2x64xbf16>, vector<1x2x64xbf16>, vector<1x2x64xbf16> -> vector<1x2x256xbf16>
    %22 = vector.shape_cast %21 : vector<1x2x256xbf16> to vector<2x256xbf16>
    %c0_17 = arith.constant 0 : index
    %c0_18 = arith.constant 0 : index
    %c0_19 = arith.constant 0 : index
    %23 = vector.load %arg3[%c0_17, %c0_18, %c0_19] : memref<4x256x32xbf16, #tpu.memory_space<vmem>>, vector<1x256x32xbf16>
    %24 = vector.shape_cast %23 : vector<1x256x32xbf16> to vector<256x32xbf16>
    %cst = arith.constant dense<0.000000e+00> : vector<2x32xf32>
    %25 = tpu.matmul %22, %24, %cst {dimension_numbers = #tpu.dot_dimension_numbers<[1], [0], [0], [1], [0, 0, 1, 1], [], []>} : vector<2x256xbf16>, vector<256x32xbf16>, vector<2x32xf32> -> vector<2x32xf32>
    %c0_20 = arith.constant 0 : index
    %c0_21 = arith.constant 0 : index
    %26 = vector.load %arg4[%c0_20, %c0_21] : memref<1x32xf32, #tpu.memory_space<vmem>>, vector<1x32xf32>
    %27 = vector.broadcast %26 : vector<1x32xf32> to vector<2x32xf32>
    %28 = arith.addf %25, %27 : vector<2x32xf32>
    %cst_22 = arith.constant 0.000000e+00 : f32
    %29 = vector.broadcast %cst_22 : f32 to vector<2x32xf32>
    %30 = arith.maximumf %28, %29 : vector<2x32xf32>
    %31 = vector.shape_cast %30 : vector<2x32xf32> to vector<1x2x32xf32>
    %c0_i32_23 = arith.constant 0 : i32
    %32 = arith.addi %0, %c0_i32_23 : i32
    %c0_i32_24 = arith.constant 0 : i32
    %33 = arith.addi %32, %c0_i32_24 : i32
    %c0_25 = arith.constant 0 : index
    %34 = arith.index_cast %33 : i32 to index
    %c1_26 = arith.constant 1 : index
    %c0_27 = arith.constant 0 : index
    %35 = vector.load %arg2[%c0_25, %34, %c1_26, %c0_27] : memref<1x4x4x64xbf16, #tpu.memory_space<vmem>>, vector<1x1x2x64xbf16>
    %36 = vector.shape_cast %35 : vector<1x1x2x64xbf16> to vector<1x2x64xbf16>
    %c0_i32_28 = arith.constant 0 : i32
    %37 = arith.addi %0, %c0_i32_28 : i32
    %c0_i32_29 = arith.constant 0 : i32
    %38 = arith.addi %37, %c0_i32_29 : i32
    %c0_30 = arith.constant 0 : index
    %39 = arith.index_cast %38 : i32 to index
    %c2 = arith.constant 2 : index
    %c0_31 = arith.constant 0 : index
    %40 = vector.load %arg2[%c0_30, %39, %c2, %c0_31] : memref<1x4x4x64xbf16, #tpu.memory_space<vmem>>, vector<1x1x2x64xbf16>
    %41 = vector.shape_cast %40 : vector<1x1x2x64xbf16> to vector<1x2x64xbf16>
    %c0_i32_32 = arith.constant 0 : i32
    %42 = arith.addi %0, %c0_i32_32 : i32
    %c1_i32_33 = arith.constant 1 : i32
    %43 = arith.addi %42, %c1_i32_33 : i32
    %c0_34 = arith.constant 0 : index
    %44 = arith.index_cast %43 : i32 to index
    %c1_35 = arith.constant 1 : index
    %c0_36 = arith.constant 0 : index
    %45 = vector.load %arg2[%c0_34, %44, %c1_35, %c0_36] : memref<1x4x4x64xbf16, #tpu.memory_space<vmem>>, vector<1x1x2x64xbf16>
    %46 = vector.shape_cast %45 : vector<1x1x2x64xbf16> to vector<1x2x64xbf16>
    %c0_i32_37 = arith.constant 0 : i32
    %47 = arith.addi %0, %c0_i32_37 : i32
    %c1_i32_38 = arith.constant 1 : i32
    %48 = arith.addi %47, %c1_i32_38 : i32
    %c0_39 = arith.constant 0 : index
    %49 = arith.index_cast %48 : i32 to index
    %c2_40 = arith.constant 2 : index
    %c0_41 = arith.constant 0 : index
    %50 = vector.load %arg2[%c0_39, %49, %c2_40, %c0_41] : memref<1x4x4x64xbf16, #tpu.memory_space<vmem>>, vector<1x1x2x64xbf16>
    %51 = vector.shape_cast %50 : vector<1x1x2x64xbf16> to vector<1x2x64xbf16>
    %52 = tpu.concatenate %36, %41, %46, %51 in 2 : vector<1x2x64xbf16>, vector<1x2x64xbf16>, vector<1x2x64xbf16>, vector<1x2x64xbf16> -> vector<1x2x256xbf16>
    %53 = vector.shape_cast %52 : vector<1x2x256xbf16> to vector<2x256xbf16>
    %c1_42 = arith.constant 1 : index
    %c0_43 = arith.constant 0 : index
    %c0_44 = arith.constant 0 : index
    %54 = vector.load %arg3[%c1_42, %c0_43, %c0_44] : memref<4x256x32xbf16, #tpu.memory_space<vmem>>, vector<1x256x32xbf16>
    %55 = vector.shape_cast %54 : vector<1x256x32xbf16> to vector<256x32xbf16>
    %cst_45 = arith.constant dense<0.000000e+00> : vector<2x32xf32>
    %56 = tpu.matmul %53, %55, %cst_45 {dimension_numbers = #tpu.dot_dimension_numbers<[1], [0], [0], [1], [0, 0, 1, 1], [], []>} : vector<2x256xbf16>, vector<256x32xbf16>, vector<2x32xf32> -> vector<2x32xf32>
    %c0_46 = arith.constant 0 : index
    %c0_47 = arith.constant 0 : index
    %57 = vector.load %arg4[%c0_46, %c0_47] : memref<1x32xf32, #tpu.memory_space<vmem>>, vector<1x32xf32>
    %58 = vector.broadcast %57 : vector<1x32xf32> to vector<2x32xf32>
    %59 = arith.addf %56, %58 : vector<2x32xf32>
    %cst_48 = arith.constant 0.000000e+00 : f32
    %60 = vector.broadcast %cst_48 : f32 to vector<2x32xf32>
    %61 = arith.maximumf %59, %60 : vector<2x32xf32>
    %62 = vector.shape_cast %61 : vector<2x32xf32> to vector<1x2x32xf32>
    %63 = tpu.concatenate %31, %62 in 2 : vector<1x2x32xf32>, vector<1x2x32xf32> -> vector<1x2x64xf32>
    %c1_i32_49 = arith.constant 1 : i32
    %64 = arith.addi %0, %c1_i32_49 : i32
    %c0_i32_50 = arith.constant 0 : i32
    %65 = arith.addi %64, %c0_i32_50 : i32
    %c0_51 = arith.constant 0 : index
    %66 = arith.index_cast %65 : i32 to index
    %c0_52 = arith.constant 0 : index
    %c0_53 = arith.constant 0 : index
    %67 = vector.load %arg2[%c0_51, %66, %c0_52, %c0_53] : memref<1x4x4x64xbf16, #tpu.memory_space<vmem>>, vector<1x1x2x64xbf16>
    %68 = vector.shape_cast %67 : vector<1x1x2x64xbf16> to vector<1x2x64xbf16>
    %c1_i32_54 = arith.constant 1 : i32
    %69 = arith.addi %0, %c1_i32_54 : i32
    %c0_i32_55 = arith.constant 0 : i32
    %70 = arith.addi %69, %c0_i32_55 : i32
    %c0_56 = arith.constant 0 : index
    %71 = arith.index_cast %70 : i32 to index
    %c1_57 = arith.constant 1 : index
    %c0_58 = arith.constant 0 : index
    %72 = vector.load %arg2[%c0_56, %71, %c1_57, %c0_58] : memref<1x4x4x64xbf16, #tpu.memory_space<vmem>>, vector<1x1x2x64xbf16>
    %73 = vector.shape_cast %72 : vector<1x1x2x64xbf16> to vector<1x2x64xbf16>
    %c1_i32_59 = arith.constant 1 : i32
    %74 = arith.addi %0, %c1_i32_59 : i32
    %c1_i32_60 = arith.constant 1 : i32
    %75 = arith.addi %74, %c1_i32_60 : i32
    %c0_61 = arith.constant 0 : index
    %76 = arith.index_cast %75 : i32 to index
    %c0_62 = arith.constant 0 : index
    %c0_63 = arith.constant 0 : index
    %77 = vector.load %arg2[%c0_61, %76, %c0_62, %c0_63] : memref<1x4x4x64xbf16, #tpu.memory_space<vmem>>, vector<1x1x2x64xbf16>
    %78 = vector.shape_cast %77 : vector<1x1x2x64xbf16> to vector<1x2x64xbf16>
    %c1_i32_64 = arith.constant 1 : i32
    %79 = arith.addi %0, %c1_i32_64 : i32
    %c1_i32_65 = arith.constant 1 : i32
    %80 = arith.addi %79, %c1_i32_65 : i32
    %c0_66 = arith.constant 0 : index
    %81 = arith.index_cast %80 : i32 to index
    %c1_67 = arith.constant 1 : index
    %c0_68 = arith.constant 0 : index
    %82 = vector.load %arg2[%c0_66, %81, %c1_67, %c0_68] : memref<1x4x4x64xbf16, #tpu.memory_space<vmem>>, vector<1x1x2x64xbf16>
    %83 = vector.shape_cast %82 : vector<1x1x2x64xbf16> to vector<1x2x64xbf16>
    %84 = tpu.concatenate %68, %73, %78, %83 in 2 : vector<1x2x64xbf16>, vector<1x2x64xbf16>, vector<1x2x64xbf16>, vector<1x2x64xbf16> -> vector<1x2x256xbf16>
    %85 = vector.shape_cast %84 : vector<1x2x256xbf16> to vector<2x256xbf16>
    %c2_69 = arith.constant 2 : index
    %c0_70 = arith.constant 0 : index
    %c0_71 = arith.constant 0 : index
    %86 = vector.load %arg3[%c2_69, %c0_70, %c0_71] : memref<4x256x32xbf16, #tpu.memory_space<vmem>>, vector<1x256x32xbf16>
    %87 = vector.shape_cast %86 : vector<1x256x32xbf16> to vector<256x32xbf16>
    %cst_72 = arith.constant dense<0.000000e+00> : vector<2x32xf32>
    %88 = tpu.matmul %85, %87, %cst_72 {dimension_numbers = #tpu.dot_dimension_numbers<[1], [0], [0], [1], [0, 0, 1, 1], [], []>} : vector<2x256xbf16>, vector<256x32xbf16>, vector<2x32xf32> -> vector<2x32xf32>
    %c0_73 = arith.constant 0 : index
    %c0_74 = arith.constant 0 : index
    %89 = vector.load %arg4[%c0_73, %c0_74] : memref<1x32xf32, #tpu.memory_space<vmem>>, vector<1x32xf32>
    %90 = vector.broadcast %89 : vector<1x32xf32> to vector<2x32xf32>
    %91 = arith.addf %88, %90 : vector<2x32xf32>
    %cst_75 = arith.constant 0.000000e+00 : f32
    %92 = vector.broadcast %cst_75 : f32 to vector<2x32xf32>
    %93 = arith.maximumf %91, %92 : vector<2x32xf32>
    %94 = vector.shape_cast %93 : vector<2x32xf32> to vector<1x2x32xf32>
    %c1_i32_76 = arith.constant 1 : i32
    %95 = arith.addi %0, %c1_i32_76 : i32
    %c0_i32_77 = arith.constant 0 : i32
    %96 = arith.addi %95, %c0_i32_77 : i32
    %c0_78 = arith.constant 0 : index
    %97 = arith.index_cast %96 : i32 to index
    %c1_79 = arith.constant 1 : index
    %c0_80 = arith.constant 0 : index
    %98 = vector.load %arg2[%c0_78, %97, %c1_79, %c0_80] : memref<1x4x4x64xbf16, #tpu.memory_space<vmem>>, vector<1x1x2x64xbf16>
    %99 = vector.shape_cast %98 : vector<1x1x2x64xbf16> to vector<1x2x64xbf16>
    %c1_i32_81 = arith.constant 1 : i32
    %100 = arith.addi %0, %c1_i32_81 : i32
    %c0_i32_82 = arith.constant 0 : i32
    %101 = arith.addi %100, %c0_i32_82 : i32
    %c0_83 = arith.constant 0 : index
    %102 = arith.index_cast %101 : i32 to index
    %c2_84 = arith.constant 2 : index
    %c0_85 = arith.constant 0 : index
    %103 = vector.load %arg2[%c0_83, %102, %c2_84, %c0_85] : memref<1x4x4x64xbf16, #tpu.memory_space<vmem>>, vector<1x1x2x64xbf16>
    %104 = vector.shape_cast %103 : vector<1x1x2x64xbf16> to vector<1x2x64xbf16>
    %c1_i32_86 = arith.constant 1 : i32
    %105 = arith.addi %0, %c1_i32_86 : i32
    %c1_i32_87 = arith.constant 1 : i32
    %106 = arith.addi %105, %c1_i32_87 : i32
    %c0_88 = arith.constant 0 : index
    %107 = arith.index_cast %106 : i32 to index
    %c1_89 = arith.constant 1 : index
    %c0_90 = arith.constant 0 : index
    %108 = vector.load %arg2[%c0_88, %107, %c1_89, %c0_90] : memref<1x4x4x64xbf16, #tpu.memory_space<vmem>>, vector<1x1x2x64xbf16>
    %109 = vector.shape_cast %108 : vector<1x1x2x64xbf16> to vector<1x2x64xbf16>
    %c1_i32_91 = arith.constant 1 : i32
    %110 = arith.addi %0, %c1_i32_91 : i32
    %c1_i32_92 = arith.constant 1 : i32
    %111 = arith.addi %110, %c1_i32_92 : i32
    %c0_93 = arith.constant 0 : index
    %112 = arith.index_cast %111 : i32 to index
    %c2_94 = arith.constant 2 : index
    %c0_95 = arith.constant 0 : index
    %113 = vector.load %arg2[%c0_93, %112, %c2_94, %c0_95] : memref<1x4x4x64xbf16, #tpu.memory_space<vmem>>, vector<1x1x2x64xbf16>
    %114 = vector.shape_cast %113 : vector<1x1x2x64xbf16> to vector<1x2x64xbf16>
    %115 = tpu.concatenate %99, %104, %109, %114 in 2 : vector<1x2x64xbf16>, vector<1x2x64xbf16>, vector<1x2x64xbf16>, vector<1x2x64xbf16> -> vector<1x2x256xbf16>
    %116 = vector.shape_cast %115 : vector<1x2x256xbf16> to vector<2x256xbf16>
    %c3 = arith.constant 3 : index
    %c0_96 = arith.constant 0 : index
    %c0_97 = arith.constant 0 : index
    %117 = vector.load %arg3[%c3, %c0_96, %c0_97] : memref<4x256x32xbf16, #tpu.memory_space<vmem>>, vector<1x256x32xbf16>
    %118 = vector.shape_cast %117 : vector<1x256x32xbf16> to vector<256x32xbf16>
    %cst_98 = arith.constant dense<0.000000e+00> : vector<2x32xf32>
    %119 = tpu.matmul %116, %118, %cst_98 {dimension_numbers = #tpu.dot_dimension_numbers<[1], [0], [0], [1], [0, 0, 1, 1], [], []>} : vector<2x256xbf16>, vector<256x32xbf16>, vector<2x32xf32> -> vector<2x32xf32>
    %c0_99 = arith.constant 0 : index
    %c0_100 = arith.constant 0 : index
    %120 = vector.load %arg4[%c0_99, %c0_100] : memref<1x32xf32, #tpu.memory_space<vmem>>, vector<1x32xf32>
    %121 = vector.broadcast %120 : vector<1x32xf32> to vector<2x32xf32>
    %122 = arith.addf %119, %121 : vector<2x32xf32>
    %cst_101 = arith.constant 0.000000e+00 : f32
    %123 = vector.broadcast %cst_101 : f32 to vector<2x32xf32>
    %124 = arith.maximumf %122, %123 : vector<2x32xf32>
    %125 = vector.shape_cast %124 : vector<2x32xf32> to vector<1x2x32xf32>
    %126 = tpu.concatenate %94, %125 in 2 : vector<1x2x32xf32>, vector<1x2x32xf32> -> vector<1x2x64xf32>
    %127 = vector.shape_cast %63 : vector<1x2x64xf32> to vector<1x1x2x64xf32>
    %128 = vector.shape_cast %126 : vector<1x2x64xf32> to vector<1x1x2x64xf32>
    %129 = tpu.concatenate %127, %128 in 1 : vector<1x1x2x64xf32>, vector<1x1x2x64xf32> -> vector<1x2x2x64xf32>
    %130 = arith.truncf %129 : vector<1x2x2x64xf32> to vector<1x2x2x64xbf16>
    %c0_102 = arith.constant 0 : index
    %c0_103 = arith.constant 0 : index
    %c0_104 = arith.constant 0 : index
    %c0_105 = arith.constant 0 : index
    %c0_106 = arith.constant 0 : index
    %131 = vector.load %arg5[%c0_102, %c0_103, %c0_104, %c0_105, %c0_106] : memref<1x1x2x2x64xbf16, #tpu.memory_space<vmem>>, vector<1x1x2x2x64xbf16>
    %132 = vector.shape_cast %131 : vector<1x1x2x2x64xbf16> to vector<1x2x2x64xbf16>
    %133 = vector.shape_cast %130 : vector<1x2x2x64xbf16> to vector<1x1x2x2x64xbf16>
    tpu.vector_store %arg5[%c0_102, %c0_103, %c0_104, %c0_105, %c0_106], %133 {strides = array<i32>} : memref<1x1x2x2x64xbf16, #tpu.memory_space<vmem>>, vector<1x1x2x2x64xbf16>,
    return
  }
  func.func @transform_0(%arg0: i32, %arg1: i32) -> (i32, i32, i32, i32) {
    %c0_i32 = arith.constant 0 : i32
    %c0_i32_0 = arith.constant 0 : i32
    %c0_i32_1 = arith.constant 0 : i32
    %c0_i32_2 = arith.constant 0 : i32
    return %arg0, %c0_i32, %c0_i32_0, %c0_i32_1 : i32, i32, i32, i32
  }
  func.func @transform_1(%arg0: i32, %arg1: i32) -> (i32, i32, i32) {
    %c0_i32 = arith.constant 0 : i32
    %c0_i32_0 = arith.constant 0 : i32
    %c0_i32_1 = arith.constant 0 : i32
    %c0_i32_2 = arith.constant 0 : i32
    return %c0_i32, %c0_i32_0, %c0_i32_1 : i32, i32, i32
  }
  func.func @transform_2(%arg0: i32, %arg1: i32) -> (i32, i32) {
    %c0_i32 = arith.constant 0 : i32
    %c0_i32_0 = arith.constant 0 : i32
    %c0_i32_1 = arith.constant 0 : i32
    return %c0_i32, %c0_i32_0 : i32, i32
  }
  func.func @transform_3(%arg0: i32, %arg1: i32) -> (i32, i32, i32, i32, i32) {
    %c0_i32 = arith.constant 0 : i32
    %c0_i32_0 = arith.constant 0 : i32
    %c0_i32_1 = arith.constant 0 : i32
    %c0_i32_2 = arith.constant 0 : i32
    return %arg0, %arg1, %c0_i32, %c0_i32_0, %c0_i32_1 : i32, i32, i32, i32, i32
  }
}

module attributes {stable_mosaic.version = 11 : i64} {
  func.func @_deconv2x2_kernel(%arg0: i32, %arg1: i32, %arg2: memref<1x6x6x32xbf16, #tpu.memory_space<vmem>>, %arg3: memref<4x128x16xbf16, #tpu.memory_space<vmem>>, %arg4: memref<1x16xf32, #tpu.memory_space<vmem>>, %arg5: memref<1x2x2x4x32xbf16, #tpu.memory_space<vmem>>) attributes {dimension_semantics = [#tpu.dimension_semantics<parallel>, #tpu.dimension_semantics<parallel>], iteration_bounds = array<i64: 2, 2>, scalar_prefetch = 0 : i64, scratch_operands = 0 : i64, tpu.core_type = #tpu.core_type<tc>, window_params = [{transform_indices = @transform_0, window_bounds = array<i64: 1, 6, 6, 32>}, {pipeline_mode = #tpu.pipeline_mode<synchronous>, transform_indices = @transform_1, window_bounds = array<i64: 4, 128, 16>}, {pipeline_mode = #tpu.pipeline_mode<synchronous>, transform_indices = @transform_2, window_bounds = array<i64: 1, 16>}, {transform_indices = @transform_3, window_bounds = array<i64: 1, 2, 2, 4, 32>}]} {
    %c2_i32 = arith.constant 2 : i32
    %0 = arith.muli %arg1, %c2_i32 : i32
    %c0_i32 = arith.constant 0 : i32
    %1 = arith.addi %0, %c0_i32 : i32
    %c0_i32_0 = arith.constant 0 : i32
    %2 = arith.addi %1, %c0_i32_0 : i32
    %c0 = arith.constant 0 : index
    %3 = arith.index_cast %2 : i32 to index
    %c0_1 = arith.constant 0 : index
    %c0_2 = arith.constant 0 : index
    %4 = vector.load %arg2[%c0, %3, %c0_1, %c0_2] : memref<1x6x6x32xbf16, #tpu.memory_space<vmem>>, vector<1x2x4x32xbf16>
    %5 = vector.shape_cast %4 : vector<1x2x4x32xbf16> to vector<2x4x32xbf16>
    %c0_i32_3 = arith.constant 0 : i32
    %6 = arith.addi %0, %c0_i32_3 : i32
    %c0_i32_4 = arith.constant 0 : i32
    %7 = arith.addi %6, %c0_i32_4 : i32
    %c0_5 = arith.constant 0 : index
    %8 = arith.index_cast %7 : i32 to index
    %c1 = arith.constant 1 : index
    %c0_6 = arith.constant 0 : index
    %9 = vector.load %arg2[%c0_5, %8, %c1, %c0_6] : memref<1x6x6x32xbf16, #tpu.memory_space<vmem>>, vector<1x2x4x32xbf16>
    %10 = vector.shape_cast %9 : vector<1x2x4x32xbf16> to vector<2x4x32xbf16>
    %c0_i32_7 = arith.constant 0 : i32
    %11 = arith.addi %0, %c0_i32_7 : i32
    %c1_i32 = arith.constant 1 : i32
    %12 = arith.addi %11, %c1_i32 : i32
    %c0_8 = arith.constant 0 : index
    %13 = arith.index_cast %12 : i32 to index
    %c0_9 = arith.constant 0 : index
    %c0_10 = arith.constant 0 : index
    %14 = vector.load %arg2[%c0_8, %13, %c0_9, %c0_10] : memref<1x6x6x32xbf16, #tpu.memory_space<vmem>>, vector<1x2x4x32xbf16>
    %15 = vector.shape_cast %14 : vector<1x2x4x32xbf16> to vector<2x4x32xbf16>
    %c0_i32_11 = arith.constant 0 : i32
    %16 = arith.addi %0, %c0_i32_11 : i32
    %c1_i32_12 = arith.constant 1 : i32
    %17 = arith.addi %16, %c1_i32_12 : i32
    %c0_13 = arith.constant 0 : index
    %18 = arith.index_cast %17 : i32 to index
    %c1_14 = arith.constant 1 : index
    %c0_15 = arith.constant 0 : index
    %19 = vector.load %arg2[%c0_13, %18, %c1_14, %c0_15] : memref<1x6x6x32xbf16, #tpu.memory_space<vmem>>, vector<1x2x4x32xbf16>
    %20 = vector.shape_cast %19 : vector<1x2x4x32xbf16> to vector<2x4x32xbf16>
    %21 = tpu.concatenate %5, %10, %15, %20 in 2 : vector<2x4x32xbf16>, vector<2x4x32xbf16>, vector<2x4x32xbf16>, vector<2x4x32xbf16> -> vector<2x4x128xbf16>
    %22 = vector.shape_cast %21 : vector<2x4x128xbf16> to vector<8x128xbf16>
    %c0_16 = arith.constant 0 : index
    %c0_17 = arith.constant 0 : index
    %c0_18 = arith.constant 0 : index
    %23 = vector.load %arg3[%c0_16, %c0_17, %c0_18] : memref<4x128x16xbf16, #tpu.memory_space<vmem>>, vector<1x128x16xbf16>
    %24 = vector.shape_cast %23 : vector<1x128x16xbf16> to vector<128x16xbf16>
    %cst = arith.constant dense<0.000000e+00> : vector<8x16xf32>
    %25 = tpu.matmul %22, %24, %cst {dimension_numbers = #tpu.dot_dimension_numbers<[1], [0], [0], [1], [0, 0, 1, 1], [], []>} : vector<8x128xbf16>, vector<128x16xbf16>, vector<8x16xf32> -> vector<8x16xf32>
    %c0_19 = arith.constant 0 : index
    %c0_20 = arith.constant 0 : index
    %26 = vector.load %arg4[%c0_19, %c0_20] : memref<1x16xf32, #tpu.memory_space<vmem>>, vector<1x16xf32>
    %27 = vector.broadcast %26 : vector<1x16xf32> to vector<8x16xf32>
    %28 = arith.addf %25, %27 : vector<8x16xf32>
    %cst_21 = arith.constant 0.000000e+00 : f32
    %29 = vector.broadcast %cst_21 : f32 to vector<8x16xf32>
    %30 = arith.maximumf %28, %29 : vector<8x16xf32>
    %31 = vector.shape_cast %30 : vector<8x16xf32> to vector<2x4x16xf32>
    %c0_i32_22 = arith.constant 0 : i32
    %32 = arith.addi %0, %c0_i32_22 : i32
    %c0_i32_23 = arith.constant 0 : i32
    %33 = arith.addi %32, %c0_i32_23 : i32
    %c0_24 = arith.constant 0 : index
    %34 = arith.index_cast %33 : i32 to index
    %c1_25 = arith.constant 1 : index
    %c0_26 = arith.constant 0 : index
    %35 = vector.load %arg2[%c0_24, %34, %c1_25, %c0_26] : memref<1x6x6x32xbf16, #tpu.memory_space<vmem>>, vector<1x2x4x32xbf16>
    %36 = vector.shape_cast %35 : vector<1x2x4x32xbf16> to vector<2x4x32xbf16>
    %c0_i32_27 = arith.constant 0 : i32
    %37 = arith.addi %0, %c0_i32_27 : i32
    %c0_i32_28 = arith.constant 0 : i32
    %38 = arith.addi %37, %c0_i32_28 : i32
    %c0_29 = arith.constant 0 : index
    %39 = arith.index_cast %38 : i32 to index
    %c2 = arith.constant 2 : index
    %c0_30 = arith.constant 0 : index
    %40 = vector.load %arg2[%c0_29, %39, %c2, %c0_30] : memref<1x6x6x32xbf16, #tpu.memory_space<vmem>>, vector<1x2x4x32xbf16>
    %41 = vector.shape_cast %40 : vector<1x2x4x32xbf16> to vector<2x4x32xbf16>
    %c0_i32_31 = arith.constant 0 : i32
    %42 = arith.addi %0, %c0_i32_31 : i32
    %c1_i32_32 = arith.constant 1 : i32
    %43 = arith.addi %42, %c1_i32_32 : i32
    %c0_33 = arith.constant 0 : index
    %44 = arith.index_cast %43 : i32 to index
    %c1_34 = arith.constant 1 : index
    %c0_35 = arith.constant 0 : index
    %45 = vector.load %arg2[%c0_33, %44, %c1_34, %c0_35] : memref<1x6x6x32xbf16, #tpu.memory_space<vmem>>, vector<1x2x4x32xbf16>
    %46 = vector.shape_cast %45 : vector<1x2x4x32xbf16> to vector<2x4x32xbf16>
    %c0_i32_36 = arith.constant 0 : i32
    %47 = arith.addi %0, %c0_i32_36 : i32
    %c1_i32_37 = arith.constant 1 : i32
    %48 = arith.addi %47, %c1_i32_37 : i32
    %c0_38 = arith.constant 0 : index
    %49 = arith.index_cast %48 : i32 to index
    %c2_39 = arith.constant 2 : index
    %c0_40 = arith.constant 0 : index
    %50 = vector.load %arg2[%c0_38, %49, %c2_39, %c0_40] : memref<1x6x6x32xbf16, #tpu.memory_space<vmem>>, vector<1x2x4x32xbf16>
    %51 = vector.shape_cast %50 : vector<1x2x4x32xbf16> to vector<2x4x32xbf16>
    %52 = tpu.concatenate %36, %41, %46, %51 in 2 : vector<2x4x32xbf16>, vector<2x4x32xbf16>, vector<2x4x32xbf16>, vector<2x4x32xbf16> -> vector<2x4x128xbf16>
    %53 = vector.shape_cast %52 : vector<2x4x128xbf16> to vector<8x128xbf16>
    %c1_41 = arith.constant 1 : index
    %c0_42 = arith.constant 0 : index
    %c0_43 = arith.constant 0 : index
    %54 = vector.load %arg3[%c1_41, %c0_42, %c0_43] : memref<4x128x16xbf16, #tpu.memory_space<vmem>>, vector<1x128x16xbf16>
    %55 = vector.shape_cast %54 : vector<1x128x16xbf16> to vector<128x16xbf16>
    %cst_44 = arith.constant dense<0.000000e+00> : vector<8x16xf32>
    %56 = tpu.matmul %53, %55, %cst_44 {dimension_numbers = #tpu.dot_dimension_numbers<[1], [0], [0], [1], [0, 0, 1, 1], [], []>} : vector<8x128xbf16>, vector<128x16xbf16>, vector<8x16xf32> -> vector<8x16xf32>
    %c0_45 = arith.constant 0 : index
    %c0_46 = arith.constant 0 : index
    %57 = vector.load %arg4[%c0_45, %c0_46] : memref<1x16xf32, #tpu.memory_space<vmem>>, vector<1x16xf32>
    %58 = vector.broadcast %57 : vector<1x16xf32> to vector<8x16xf32>
    %59 = arith.addf %56, %58 : vector<8x16xf32>
    %cst_47 = arith.constant 0.000000e+00 : f32
    %60 = vector.broadcast %cst_47 : f32 to vector<8x16xf32>
    %61 = arith.maximumf %59, %60 : vector<8x16xf32>
    %62 = vector.shape_cast %61 : vector<8x16xf32> to vector<2x4x16xf32>
    %63 = tpu.concatenate %31, %62 in 2 : vector<2x4x16xf32>, vector<2x4x16xf32> -> vector<2x4x32xf32>
    %c1_i32_48 = arith.constant 1 : i32
    %64 = arith.addi %0, %c1_i32_48 : i32
    %c0_i32_49 = arith.constant 0 : i32
    %65 = arith.addi %64, %c0_i32_49 : i32
    %c0_50 = arith.constant 0 : index
    %66 = arith.index_cast %65 : i32 to index
    %c0_51 = arith.constant 0 : index
    %c0_52 = arith.constant 0 : index
    %67 = vector.load %arg2[%c0_50, %66, %c0_51, %c0_52] : memref<1x6x6x32xbf16, #tpu.memory_space<vmem>>, vector<1x2x4x32xbf16>
    %68 = vector.shape_cast %67 : vector<1x2x4x32xbf16> to vector<2x4x32xbf16>
    %c1_i32_53 = arith.constant 1 : i32
    %69 = arith.addi %0, %c1_i32_53 : i32
    %c0_i32_54 = arith.constant 0 : i32
    %70 = arith.addi %69, %c0_i32_54 : i32
    %c0_55 = arith.constant 0 : index
    %71 = arith.index_cast %70 : i32 to index
    %c1_56 = arith.constant 1 : index
    %c0_57 = arith.constant 0 : index
    %72 = vector.load %arg2[%c0_55, %71, %c1_56, %c0_57] : memref<1x6x6x32xbf16, #tpu.memory_space<vmem>>, vector<1x2x4x32xbf16>
    %73 = vector.shape_cast %72 : vector<1x2x4x32xbf16> to vector<2x4x32xbf16>
    %c1_i32_58 = arith.constant 1 : i32
    %74 = arith.addi %0, %c1_i32_58 : i32
    %c1_i32_59 = arith.constant 1 : i32
    %75 = arith.addi %74, %c1_i32_59 : i32
    %c0_60 = arith.constant 0 : index
    %76 = arith.index_cast %75 : i32 to index
    %c0_61 = arith.constant 0 : index
    %c0_62 = arith.constant 0 : index
    %77 = vector.load %arg2[%c0_60, %76, %c0_61, %c0_62] : memref<1x6x6x32xbf16, #tpu.memory_space<vmem>>, vector<1x2x4x32xbf16>
    %78 = vector.shape_cast %77 : vector<1x2x4x32xbf16> to vector<2x4x32xbf16>
    %c1_i32_63 = arith.constant 1 : i32
    %79 = arith.addi %0, %c1_i32_63 : i32
    %c1_i32_64 = arith.constant 1 : i32
    %80 = arith.addi %79, %c1_i32_64 : i32
    %c0_65 = arith.constant 0 : index
    %81 = arith.index_cast %80 : i32 to index
    %c1_66 = arith.constant 1 : index
    %c0_67 = arith.constant 0 : index
    %82 = vector.load %arg2[%c0_65, %81, %c1_66, %c0_67] : memref<1x6x6x32xbf16, #tpu.memory_space<vmem>>, vector<1x2x4x32xbf16>
    %83 = vector.shape_cast %82 : vector<1x2x4x32xbf16> to vector<2x4x32xbf16>
    %84 = tpu.concatenate %68, %73, %78, %83 in 2 : vector<2x4x32xbf16>, vector<2x4x32xbf16>, vector<2x4x32xbf16>, vector<2x4x32xbf16> -> vector<2x4x128xbf16>
    %85 = vector.shape_cast %84 : vector<2x4x128xbf16> to vector<8x128xbf16>
    %c2_68 = arith.constant 2 : index
    %c0_69 = arith.constant 0 : index
    %c0_70 = arith.constant 0 : index
    %86 = vector.load %arg3[%c2_68, %c0_69, %c0_70] : memref<4x128x16xbf16, #tpu.memory_space<vmem>>, vector<1x128x16xbf16>
    %87 = vector.shape_cast %86 : vector<1x128x16xbf16> to vector<128x16xbf16>
    %cst_71 = arith.constant dense<0.000000e+00> : vector<8x16xf32>
    %88 = tpu.matmul %85, %87, %cst_71 {dimension_numbers = #tpu.dot_dimension_numbers<[1], [0], [0], [1], [0, 0, 1, 1], [], []>} : vector<8x128xbf16>, vector<128x16xbf16>, vector<8x16xf32> -> vector<8x16xf32>
    %c0_72 = arith.constant 0 : index
    %c0_73 = arith.constant 0 : index
    %89 = vector.load %arg4[%c0_72, %c0_73] : memref<1x16xf32, #tpu.memory_space<vmem>>, vector<1x16xf32>
    %90 = vector.broadcast %89 : vector<1x16xf32> to vector<8x16xf32>
    %91 = arith.addf %88, %90 : vector<8x16xf32>
    %cst_74 = arith.constant 0.000000e+00 : f32
    %92 = vector.broadcast %cst_74 : f32 to vector<8x16xf32>
    %93 = arith.maximumf %91, %92 : vector<8x16xf32>
    %94 = vector.shape_cast %93 : vector<8x16xf32> to vector<2x4x16xf32>
    %c1_i32_75 = arith.constant 1 : i32
    %95 = arith.addi %0, %c1_i32_75 : i32
    %c0_i32_76 = arith.constant 0 : i32
    %96 = arith.addi %95, %c0_i32_76 : i32
    %c0_77 = arith.constant 0 : index
    %97 = arith.index_cast %96 : i32 to index
    %c1_78 = arith.constant 1 : index
    %c0_79 = arith.constant 0 : index
    %98 = vector.load %arg2[%c0_77, %97, %c1_78, %c0_79] : memref<1x6x6x32xbf16, #tpu.memory_space<vmem>>, vector<1x2x4x32xbf16>
    %99 = vector.shape_cast %98 : vector<1x2x4x32xbf16> to vector<2x4x32xbf16>
    %c1_i32_80 = arith.constant 1 : i32
    %100 = arith.addi %0, %c1_i32_80 : i32
    %c0_i32_81 = arith.constant 0 : i32
    %101 = arith.addi %100, %c0_i32_81 : i32
    %c0_82 = arith.constant 0 : index
    %102 = arith.index_cast %101 : i32 to index
    %c2_83 = arith.constant 2 : index
    %c0_84 = arith.constant 0 : index
    %103 = vector.load %arg2[%c0_82, %102, %c2_83, %c0_84] : memref<1x6x6x32xbf16, #tpu.memory_space<vmem>>, vector<1x2x4x32xbf16>
    %104 = vector.shape_cast %103 : vector<1x2x4x32xbf16> to vector<2x4x32xbf16>
    %c1_i32_85 = arith.constant 1 : i32
    %105 = arith.addi %0, %c1_i32_85 : i32
    %c1_i32_86 = arith.constant 1 : i32
    %106 = arith.addi %105, %c1_i32_86 : i32
    %c0_87 = arith.constant 0 : index
    %107 = arith.index_cast %106 : i32 to index
    %c1_88 = arith.constant 1 : index
    %c0_89 = arith.constant 0 : index
    %108 = vector.load %arg2[%c0_87, %107, %c1_88, %c0_89] : memref<1x6x6x32xbf16, #tpu.memory_space<vmem>>, vector<1x2x4x32xbf16>
    %109 = vector.shape_cast %108 : vector<1x2x4x32xbf16> to vector<2x4x32xbf16>
    %c1_i32_90 = arith.constant 1 : i32
    %110 = arith.addi %0, %c1_i32_90 : i32
    %c1_i32_91 = arith.constant 1 : i32
    %111 = arith.addi %110, %c1_i32_91 : i32
    %c0_92 = arith.constant 0 : index
    %112 = arith.index_cast %111 : i32 to index
    %c2_93 = arith.constant 2 : index
    %c0_94 = arith.constant 0 : index
    %113 = vector.load %arg2[%c0_92, %112, %c2_93, %c0_94] : memref<1x6x6x32xbf16, #tpu.memory_space<vmem>>, vector<1x2x4x32xbf16>
    %114 = vector.shape_cast %113 : vector<1x2x4x32xbf16> to vector<2x4x32xbf16>
    %115 = tpu.concatenate %99, %104, %109, %114 in 2 : vector<2x4x32xbf16>, vector<2x4x32xbf16>, vector<2x4x32xbf16>, vector<2x4x32xbf16> -> vector<2x4x128xbf16>
    %116 = vector.shape_cast %115 : vector<2x4x128xbf16> to vector<8x128xbf16>
    %c3 = arith.constant 3 : index
    %c0_95 = arith.constant 0 : index
    %c0_96 = arith.constant 0 : index
    %117 = vector.load %arg3[%c3, %c0_95, %c0_96] : memref<4x128x16xbf16, #tpu.memory_space<vmem>>, vector<1x128x16xbf16>
    %118 = vector.shape_cast %117 : vector<1x128x16xbf16> to vector<128x16xbf16>
    %cst_97 = arith.constant dense<0.000000e+00> : vector<8x16xf32>
    %119 = tpu.matmul %116, %118, %cst_97 {dimension_numbers = #tpu.dot_dimension_numbers<[1], [0], [0], [1], [0, 0, 1, 1], [], []>} : vector<8x128xbf16>, vector<128x16xbf16>, vector<8x16xf32> -> vector<8x16xf32>
    %c0_98 = arith.constant 0 : index
    %c0_99 = arith.constant 0 : index
    %120 = vector.load %arg4[%c0_98, %c0_99] : memref<1x16xf32, #tpu.memory_space<vmem>>, vector<1x16xf32>
    %121 = vector.broadcast %120 : vector<1x16xf32> to vector<8x16xf32>
    %122 = arith.addf %119, %121 : vector<8x16xf32>
    %cst_100 = arith.constant 0.000000e+00 : f32
    %123 = vector.broadcast %cst_100 : f32 to vector<8x16xf32>
    %124 = arith.maximumf %122, %123 : vector<8x16xf32>
    %125 = vector.shape_cast %124 : vector<8x16xf32> to vector<2x4x16xf32>
    %126 = tpu.concatenate %94, %125 in 2 : vector<2x4x16xf32>, vector<2x4x16xf32> -> vector<2x4x32xf32>
    %127 = vector.shape_cast %63 : vector<2x4x32xf32> to vector<2x1x4x32xf32>
    %128 = vector.shape_cast %126 : vector<2x4x32xf32> to vector<2x1x4x32xf32>
    %129 = tpu.concatenate %127, %128 in 1 : vector<2x1x4x32xf32>, vector<2x1x4x32xf32> -> vector<2x2x4x32xf32>
    %130 = arith.truncf %129 : vector<2x2x4x32xf32> to vector<2x2x4x32xbf16>
    %c0_101 = arith.constant 0 : index
    %c0_102 = arith.constant 0 : index
    %c0_103 = arith.constant 0 : index
    %c0_104 = arith.constant 0 : index
    %c0_105 = arith.constant 0 : index
    %131 = vector.load %arg5[%c0_101, %c0_102, %c0_103, %c0_104, %c0_105] : memref<1x2x2x4x32xbf16, #tpu.memory_space<vmem>>, vector<1x2x2x4x32xbf16>
    %132 = vector.shape_cast %131 : vector<1x2x2x4x32xbf16> to vector<2x2x4x32xbf16>
    %133 = vector.shape_cast %130 : vector<2x2x4x32xbf16> to vector<1x2x2x4x32xbf16>
    tpu.vector_store %arg5[%c0_101, %c0_102, %c0_103, %c0_104, %c0_105], %133 {strides = array<i32>} : memref<1x2x2x4x32xbf16, #tpu.memory_space<vmem>>, vector<1x2x2x4x32xbf16>,
    return
  }
  func.func @transform_0(%arg0: i32, %arg1: i32) -> (i32, i32, i32, i32) {
    %c0_i32 = arith.constant 0 : i32
    %c0_i32_0 = arith.constant 0 : i32
    %c0_i32_1 = arith.constant 0 : i32
    %c0_i32_2 = arith.constant 0 : i32
    return %arg0, %c0_i32, %c0_i32_0, %c0_i32_1 : i32, i32, i32, i32
  }
  func.func @transform_1(%arg0: i32, %arg1: i32) -> (i32, i32, i32) {
    %c0_i32 = arith.constant 0 : i32
    %c0_i32_0 = arith.constant 0 : i32
    %c0_i32_1 = arith.constant 0 : i32
    %c0_i32_2 = arith.constant 0 : i32
    return %c0_i32, %c0_i32_0, %c0_i32_1 : i32, i32, i32
  }
  func.func @transform_2(%arg0: i32, %arg1: i32) -> (i32, i32) {
    %c0_i32 = arith.constant 0 : i32
    %c0_i32_0 = arith.constant 0 : i32
    %c0_i32_1 = arith.constant 0 : i32
    return %c0_i32, %c0_i32_0 : i32, i32
  }
  func.func @transform_3(%arg0: i32, %arg1: i32) -> (i32, i32, i32, i32, i32) {
    %c0_i32 = arith.constant 0 : i32
    %c0_i32_0 = arith.constant 0 : i32
    %c0_i32_1 = arith.constant 0 : i32
    %c0_i32_2 = arith.constant 0 : i32
    return %arg0, %arg1, %c0_i32, %c0_i32_0, %c0_i32_1 : i32, i32, i32, i32, i32
  }
}

module attributes {stable_mosaic.version = 11 : i64} {
  func.func @_deconv2x2_kernel(%arg0: i32, %arg1: i32, %arg2: memref<1x10x10x16xbf16, #tpu.memory_space<vmem>>, %arg3: memref<4x64x4xbf16, #tpu.memory_space<vmem>>, %arg4: memref<1x4xf32, #tpu.memory_space<vmem>>, %arg5: memref<1x4x2x8x8xf32, #tpu.memory_space<vmem>>) attributes {dimension_semantics = [#tpu.dimension_semantics<parallel>, #tpu.dimension_semantics<parallel>], iteration_bounds = array<i64: 2, 2>, scalar_prefetch = 0 : i64, scratch_operands = 0 : i64, tpu.core_type = #tpu.core_type<tc>, window_params = [{transform_indices = @transform_0, window_bounds = array<i64: 1, 10, 10, 16>}, {pipeline_mode = #tpu.pipeline_mode<synchronous>, transform_indices = @transform_1, window_bounds = array<i64: 4, 64, 4>}, {pipeline_mode = #tpu.pipeline_mode<synchronous>, transform_indices = @transform_2, window_bounds = array<i64: 1, 4>}, {transform_indices = @transform_3, window_bounds = array<i64: 1, 4, 2, 8, 8>}]} {
    %c4_i32 = arith.constant 4 : i32
    %0 = arith.muli %arg1, %c4_i32 : i32
    %c0_i32 = arith.constant 0 : i32
    %1 = arith.addi %0, %c0_i32 : i32
    %c0_i32_0 = arith.constant 0 : i32
    %2 = arith.addi %1, %c0_i32_0 : i32
    %c0 = arith.constant 0 : index
    %3 = arith.index_cast %2 : i32 to index
    %c0_1 = arith.constant 0 : index
    %c0_2 = arith.constant 0 : index
    %4 = vector.load %arg2[%c0, %3, %c0_1, %c0_2] : memref<1x10x10x16xbf16, #tpu.memory_space<vmem>>, vector<1x4x8x16xbf16>
    %5 = vector.shape_cast %4 : vector<1x4x8x16xbf16> to vector<4x8x16xbf16>
    %c0_i32_3 = arith.constant 0 : i32
    %6 = arith.addi %0, %c0_i32_3 : i32
    %c0_i32_4 = arith.constant 0 : i32
    %7 = arith.addi %6, %c0_i32_4 : i32
    %c0_5 = arith.constant 0 : index
    %8 = arith.index_cast %7 : i32 to index
    %c1 = arith.constant 1 : index
    %c0_6 = arith.constant 0 : index
    %9 = vector.load %arg2[%c0_5, %8, %c1, %c0_6] : memref<1x10x10x16xbf16, #tpu.memory_space<vmem>>, vector<1x4x8x16xbf16>
    %10 = vector.shape_cast %9 : vector<1x4x8x16xbf16> to vector<4x8x16xbf16>
    %c0_i32_7 = arith.constant 0 : i32
    %11 = arith.addi %0, %c0_i32_7 : i32
    %c1_i32 = arith.constant 1 : i32
    %12 = arith.addi %11, %c1_i32 : i32
    %c0_8 = arith.constant 0 : index
    %13 = arith.index_cast %12 : i32 to index
    %c0_9 = arith.constant 0 : index
    %c0_10 = arith.constant 0 : index
    %14 = vector.load %arg2[%c0_8, %13, %c0_9, %c0_10] : memref<1x10x10x16xbf16, #tpu.memory_space<vmem>>, vector<1x4x8x16xbf16>
    %15 = vector.shape_cast %14 : vector<1x4x8x16xbf16> to vector<4x8x16xbf16>
    %c0_i32_11 = arith.constant 0 : i32
    %16 = arith.addi %0, %c0_i32_11 : i32
    %c1_i32_12 = arith.constant 1 : i32
    %17 = arith.addi %16, %c1_i32_12 : i32
    %c0_13 = arith.constant 0 : index
    %18 = arith.index_cast %17 : i32 to index
    %c1_14 = arith.constant 1 : index
    %c0_15 = arith.constant 0 : index
    %19 = vector.load %arg2[%c0_13, %18, %c1_14, %c0_15] : memref<1x10x10x16xbf16, #tpu.memory_space<vmem>>, vector<1x4x8x16xbf16>
    %20 = vector.shape_cast %19 : vector<1x4x8x16xbf16> to vector<4x8x16xbf16>
    %21 = tpu.concatenate %5, %10, %15, %20 in 2 : vector<4x8x16xbf16>, vector<4x8x16xbf16>, vector<4x8x16xbf16>, vector<4x8x16xbf16> -> vector<4x8x64xbf16>
    %22 = vector.shape_cast %21 : vector<4x8x64xbf16> to vector<32x64xbf16>
    %c0_16 = arith.constant 0 : index
    %c0_17 = arith.constant 0 : index
    %c0_18 = arith.constant 0 : index
    %23 = vector.load %arg3[%c0_16, %c0_17, %c0_18] : memref<4x64x4xbf16, #tpu.memory_space<vmem>>, vector<1x64x4xbf16>
    %24 = vector.shape_cast %23 : vector<1x64x4xbf16> to vector<64x4xbf16>
    %cst = arith.constant dense<0.000000e+00> : vector<32x4xf32>
    %25 = tpu.matmul %22, %24, %cst {dimension_numbers = #tpu.dot_dimension_numbers<[1], [0], [0], [1], [0, 0, 1, 1], [], []>} : vector<32x64xbf16>, vector<64x4xbf16>, vector<32x4xf32> -> vector<32x4xf32>
    %c0_19 = arith.constant 0 : index
    %c0_20 = arith.constant 0 : index
    %26 = vector.load %arg4[%c0_19, %c0_20] : memref<1x4xf32, #tpu.memory_space<vmem>>, vector<1x4xf32>
    %27 = vector.broadcast %26 : vector<1x4xf32> to vector<32x4xf32>
    %28 = arith.addf %25, %27 : vector<32x4xf32>
    %29 = arith.negf %28 : vector<32x4xf32>
    %30 = math.exp %29 : vector<32x4xf32>
    %cst_21 = arith.constant 1.000000e+00 : f32
    %31 = vector.broadcast %cst_21 : f32 to vector<32x4xf32>
    %32 = arith.addf %31, %30 : vector<32x4xf32>
    %33 = arith.divf %31, %32 : vector<32x4xf32>
    %34 = vector.shape_cast %33 : vector<32x4xf32> to vector<4x8x4xf32>
    %c0_i32_22 = arith.constant 0 : i32
    %35 = arith.addi %0, %c0_i32_22 : i32
    %c0_i32_23 = arith.constant 0 : i32
    %36 = arith.addi %35, %c0_i32_23 : i32
    %c0_24 = arith.constant 0 : index
    %37 = arith.index_cast %36 : i32 to index
    %c1_25 = arith.constant 1 : index
    %c0_26 = arith.constant 0 : index
    %38 = vector.load %arg2[%c0_24, %37, %c1_25, %c0_26] : memref<1x10x10x16xbf16, #tpu.memory_space<vmem>>, vector<1x4x8x16xbf16>
    %39 = vector.shape_cast %38 : vector<1x4x8x16xbf16> to vector<4x8x16xbf16>
    %c0_i32_27 = arith.constant 0 : i32
    %40 = arith.addi %0, %c0_i32_27 : i32
    %c0_i32_28 = arith.constant 0 : i32
    %41 = arith.addi %40, %c0_i32_28 : i32
    %c0_29 = arith.constant 0 : index
    %42 = arith.index_cast %41 : i32 to index
    %c2 = arith.constant 2 : index
    %c0_30 = arith.constant 0 : index
    %43 = vector.load %arg2[%c0_29, %42, %c2, %c0_30] : memref<1x10x10x16xbf16, #tpu.memory_space<vmem>>, vector<1x4x8x16xbf16>
    %44 = vector.shape_cast %43 : vector<1x4x8x16xbf16> to vector<4x8x16xbf16>
    %c0_i32_31 = arith.constant 0 : i32
    %45 = arith.addi %0, %c0_i32_31 : i32
    %c1_i32_32 = arith.constant 1 : i32
    %46 = arith.addi %45, %c1_i32_32 : i32
    %c0_33 = arith.constant 0 : index
    %47 = arith.index_cast %46 : i32 to index
    %c1_34 = arith.constant 1 : index
    %c0_35 = arith.constant 0 : index
    %48 = vector.load %arg2[%c0_33, %47, %c1_34, %c0_35] : memref<1x10x10x16xbf16, #tpu.memory_space<vmem>>, vector<1x4x8x16xbf16>
    %49 = vector.shape_cast %48 : vector<1x4x8x16xbf16> to vector<4x8x16xbf16>
    %c0_i32_36 = arith.constant 0 : i32
    %50 = arith.addi %0, %c0_i32_36 : i32
    %c1_i32_37 = arith.constant 1 : i32
    %51 = arith.addi %50, %c1_i32_37 : i32
    %c0_38 = arith.constant 0 : index
    %52 = arith.index_cast %51 : i32 to index
    %c2_39 = arith.constant 2 : index
    %c0_40 = arith.constant 0 : index
    %53 = vector.load %arg2[%c0_38, %52, %c2_39, %c0_40] : memref<1x10x10x16xbf16, #tpu.memory_space<vmem>>, vector<1x4x8x16xbf16>
    %54 = vector.shape_cast %53 : vector<1x4x8x16xbf16> to vector<4x8x16xbf16>
    %55 = tpu.concatenate %39, %44, %49, %54 in 2 : vector<4x8x16xbf16>, vector<4x8x16xbf16>, vector<4x8x16xbf16>, vector<4x8x16xbf16> -> vector<4x8x64xbf16>
    %56 = vector.shape_cast %55 : vector<4x8x64xbf16> to vector<32x64xbf16>
    %c1_41 = arith.constant 1 : index
    %c0_42 = arith.constant 0 : index
    %c0_43 = arith.constant 0 : index
    %57 = vector.load %arg3[%c1_41, %c0_42, %c0_43] : memref<4x64x4xbf16, #tpu.memory_space<vmem>>, vector<1x64x4xbf16>
    %58 = vector.shape_cast %57 : vector<1x64x4xbf16> to vector<64x4xbf16>
    %cst_44 = arith.constant dense<0.000000e+00> : vector<32x4xf32>
    %59 = tpu.matmul %56, %58, %cst_44 {dimension_numbers = #tpu.dot_dimension_numbers<[1], [0], [0], [1], [0, 0, 1, 1], [], []>} : vector<32x64xbf16>, vector<64x4xbf16>, vector<32x4xf32> -> vector<32x4xf32>
    %c0_45 = arith.constant 0 : index
    %c0_46 = arith.constant 0 : index
    %60 = vector.load %arg4[%c0_45, %c0_46] : memref<1x4xf32, #tpu.memory_space<vmem>>, vector<1x4xf32>
    %61 = vector.broadcast %60 : vector<1x4xf32> to vector<32x4xf32>
    %62 = arith.addf %59, %61 : vector<32x4xf32>
    %63 = arith.negf %62 : vector<32x4xf32>
    %64 = math.exp %63 : vector<32x4xf32>
    %cst_47 = arith.constant 1.000000e+00 : f32
    %65 = vector.broadcast %cst_47 : f32 to vector<32x4xf32>
    %66 = arith.addf %65, %64 : vector<32x4xf32>
    %67 = arith.divf %65, %66 : vector<32x4xf32>
    %68 = vector.shape_cast %67 : vector<32x4xf32> to vector<4x8x4xf32>
    %69 = tpu.concatenate %34, %68 in 2 : vector<4x8x4xf32>, vector<4x8x4xf32> -> vector<4x8x8xf32>
    %c1_i32_48 = arith.constant 1 : i32
    %70 = arith.addi %0, %c1_i32_48 : i32
    %c0_i32_49 = arith.constant 0 : i32
    %71 = arith.addi %70, %c0_i32_49 : i32
    %c0_50 = arith.constant 0 : index
    %72 = arith.index_cast %71 : i32 to index
    %c0_51 = arith.constant 0 : index
    %c0_52 = arith.constant 0 : index
    %73 = vector.load %arg2[%c0_50, %72, %c0_51, %c0_52] : memref<1x10x10x16xbf16, #tpu.memory_space<vmem>>, vector<1x4x8x16xbf16>
    %74 = vector.shape_cast %73 : vector<1x4x8x16xbf16> to vector<4x8x16xbf16>
    %c1_i32_53 = arith.constant 1 : i32
    %75 = arith.addi %0, %c1_i32_53 : i32
    %c0_i32_54 = arith.constant 0 : i32
    %76 = arith.addi %75, %c0_i32_54 : i32
    %c0_55 = arith.constant 0 : index
    %77 = arith.index_cast %76 : i32 to index
    %c1_56 = arith.constant 1 : index
    %c0_57 = arith.constant 0 : index
    %78 = vector.load %arg2[%c0_55, %77, %c1_56, %c0_57] : memref<1x10x10x16xbf16, #tpu.memory_space<vmem>>, vector<1x4x8x16xbf16>
    %79 = vector.shape_cast %78 : vector<1x4x8x16xbf16> to vector<4x8x16xbf16>
    %c1_i32_58 = arith.constant 1 : i32
    %80 = arith.addi %0, %c1_i32_58 : i32
    %c1_i32_59 = arith.constant 1 : i32
    %81 = arith.addi %80, %c1_i32_59 : i32
    %c0_60 = arith.constant 0 : index
    %82 = arith.index_cast %81 : i32 to index
    %c0_61 = arith.constant 0 : index
    %c0_62 = arith.constant 0 : index
    %83 = vector.load %arg2[%c0_60, %82, %c0_61, %c0_62] : memref<1x10x10x16xbf16, #tpu.memory_space<vmem>>, vector<1x4x8x16xbf16>
    %84 = vector.shape_cast %83 : vector<1x4x8x16xbf16> to vector<4x8x16xbf16>
    %c1_i32_63 = arith.constant 1 : i32
    %85 = arith.addi %0, %c1_i32_63 : i32
    %c1_i32_64 = arith.constant 1 : i32
    %86 = arith.addi %85, %c1_i32_64 : i32
    %c0_65 = arith.constant 0 : index
    %87 = arith.index_cast %86 : i32 to index
    %c1_66 = arith.constant 1 : index
    %c0_67 = arith.constant 0 : index
    %88 = vector.load %arg2[%c0_65, %87, %c1_66, %c0_67] : memref<1x10x10x16xbf16, #tpu.memory_space<vmem>>, vector<1x4x8x16xbf16>
    %89 = vector.shape_cast %88 : vector<1x4x8x16xbf16> to vector<4x8x16xbf16>
    %90 = tpu.concatenate %74, %79, %84, %89 in 2 : vector<4x8x16xbf16>, vector<4x8x16xbf16>, vector<4x8x16xbf16>, vector<4x8x16xbf16> -> vector<4x8x64xbf16>
    %91 = vector.shape_cast %90 : vector<4x8x64xbf16> to vector<32x64xbf16>
    %c2_68 = arith.constant 2 : index
    %c0_69 = arith.constant 0 : index
    %c0_70 = arith.constant 0 : index
    %92 = vector.load %arg3[%c2_68, %c0_69, %c0_70] : memref<4x64x4xbf16, #tpu.memory_space<vmem>>, vector<1x64x4xbf16>
    %93 = vector.shape_cast %92 : vector<1x64x4xbf16> to vector<64x4xbf16>
    %cst_71 = arith.constant dense<0.000000e+00> : vector<32x4xf32>
    %94 = tpu.matmul %91, %93, %cst_71 {dimension_numbers = #tpu.dot_dimension_numbers<[1], [0], [0], [1], [0, 0, 1, 1], [], []>} : vector<32x64xbf16>, vector<64x4xbf16>, vector<32x4xf32> -> vector<32x4xf32>
    %c0_72 = arith.constant 0 : index
    %c0_73 = arith.constant 0 : index
    %95 = vector.load %arg4[%c0_72, %c0_73] : memref<1x4xf32, #tpu.memory_space<vmem>>, vector<1x4xf32>
    %96 = vector.broadcast %95 : vector<1x4xf32> to vector<32x4xf32>
    %97 = arith.addf %94, %96 : vector<32x4xf32>
    %98 = arith.negf %97 : vector<32x4xf32>
    %99 = math.exp %98 : vector<32x4xf32>
    %cst_74 = arith.constant 1.000000e+00 : f32
    %100 = vector.broadcast %cst_74 : f32 to vector<32x4xf32>
    %101 = arith.addf %100, %99 : vector<32x4xf32>
    %102 = arith.divf %100, %101 : vector<32x4xf32>
    %103 = vector.shape_cast %102 : vector<32x4xf32> to vector<4x8x4xf32>
    %c1_i32_75 = arith.constant 1 : i32
    %104 = arith.addi %0, %c1_i32_75 : i32
    %c0_i32_76 = arith.constant 0 : i32
    %105 = arith.addi %104, %c0_i32_76 : i32
    %c0_77 = arith.constant 0 : index
    %106 = arith.index_cast %105 : i32 to index
    %c1_78 = arith.constant 1 : index
    %c0_79 = arith.constant 0 : index
    %107 = vector.load %arg2[%c0_77, %106, %c1_78, %c0_79] : memref<1x10x10x16xbf16, #tpu.memory_space<vmem>>, vector<1x4x8x16xbf16>
    %108 = vector.shape_cast %107 : vector<1x4x8x16xbf16> to vector<4x8x16xbf16>
    %c1_i32_80 = arith.constant 1 : i32
    %109 = arith.addi %0, %c1_i32_80 : i32
    %c0_i32_81 = arith.constant 0 : i32
    %110 = arith.addi %109, %c0_i32_81 : i32
    %c0_82 = arith.constant 0 : index
    %111 = arith.index_cast %110 : i32 to index
    %c2_83 = arith.constant 2 : index
    %c0_84 = arith.constant 0 : index
    %112 = vector.load %arg2[%c0_82, %111, %c2_83, %c0_84] : memref<1x10x10x16xbf16, #tpu.memory_space<vmem>>, vector<1x4x8x16xbf16>
    %113 = vector.shape_cast %112 : vector<1x4x8x16xbf16> to vector<4x8x16xbf16>
    %c1_i32_85 = arith.constant 1 : i32
    %114 = arith.addi %0, %c1_i32_85 : i32
    %c1_i32_86 = arith.constant 1 : i32
    %115 = arith.addi %114, %c1_i32_86 : i32
    %c0_87 = arith.constant 0 : index
    %116 = arith.index_cast %115 : i32 to index
    %c1_88 = arith.constant 1 : index
    %c0_89 = arith.constant 0 : index
    %117 = vector.load %arg2[%c0_87, %116, %c1_88, %c0_89] : memref<1x10x10x16xbf16, #tpu.memory_space<vmem>>, vector<1x4x8x16xbf16>
    %118 = vector.shape_cast %117 : vector<1x4x8x16xbf16> to vector<4x8x16xbf16>
    %c1_i32_90 = arith.constant 1 : i32
    %119 = arith.addi %0, %c1_i32_90 : i32
    %c1_i32_91 = arith.constant 1 : i32
    %120 = arith.addi %119, %c1_i32_91 : i32
    %c0_92 = arith.constant 0 : index
    %121 = arith.index_cast %120 : i32 to index
    %c2_93 = arith.constant 2 : index
    %c0_94 = arith.constant 0 : index
    %122 = vector.load %arg2[%c0_92, %121, %c2_93, %c0_94] : memref<1x10x10x16xbf16, #tpu.memory_space<vmem>>, vector<1x4x8x16xbf16>
    %123 = vector.shape_cast %122 : vector<1x4x8x16xbf16> to vector<4x8x16xbf16>
    %124 = tpu.concatenate %108, %113, %118, %123 in 2 : vector<4x8x16xbf16>, vector<4x8x16xbf16>, vector<4x8x16xbf16>, vector<4x8x16xbf16> -> vector<4x8x64xbf16>
    %125 = vector.shape_cast %124 : vector<4x8x64xbf16> to vector<32x64xbf16>
    %c3 = arith.constant 3 : index
    %c0_95 = arith.constant 0 : index
    %c0_96 = arith.constant 0 : index
    %126 = vector.load %arg3[%c3, %c0_95, %c0_96] : memref<4x64x4xbf16, #tpu.memory_space<vmem>>, vector<1x64x4xbf16>
    %127 = vector.shape_cast %126 : vector<1x64x4xbf16> to vector<64x4xbf16>
    %cst_97 = arith.constant dense<0.000000e+00> : vector<32x4xf32>
    %128 = tpu.matmul %125, %127, %cst_97 {dimension_numbers = #tpu.dot_dimension_numbers<[1], [0], [0], [1], [0, 0, 1, 1], [], []>} : vector<32x64xbf16>, vector<64x4xbf16>, vector<32x4xf32> -> vector<32x4xf32>
    %c0_98 = arith.constant 0 : index
    %c0_99 = arith.constant 0 : index
    %129 = vector.load %arg4[%c0_98, %c0_99] : memref<1x4xf32, #tpu.memory_space<vmem>>, vector<1x4xf32>
    %130 = vector.broadcast %129 : vector<1x4xf32> to vector<32x4xf32>
    %131 = arith.addf %128, %130 : vector<32x4xf32>
    %132 = arith.negf %131 : vector<32x4xf32>
    %133 = math.exp %132 : vector<32x4xf32>
    %cst_100 = arith.constant 1.000000e+00 : f32
    %134 = vector.broadcast %cst_100 : f32 to vector<32x4xf32>
    %135 = arith.addf %134, %133 : vector<32x4xf32>
    %136 = arith.divf %134, %135 : vector<32x4xf32>
    %137 = vector.shape_cast %136 : vector<32x4xf32> to vector<4x8x4xf32>
    %138 = tpu.concatenate %103, %137 in 2 : vector<4x8x4xf32>, vector<4x8x4xf32> -> vector<4x8x8xf32>
    %139 = vector.shape_cast %69 : vector<4x8x8xf32> to vector<4x1x8x8xf32>
    %140 = vector.shape_cast %138 : vector<4x8x8xf32> to vector<4x1x8x8xf32>
    %141 = tpu.concatenate %139, %140 in 1 : vector<4x1x8x8xf32>, vector<4x1x8x8xf32> -> vector<4x2x8x8xf32>
    %c0_101 = arith.constant 0 : index
    %c0_102 = arith.constant 0 : index
    %c0_103 = arith.constant 0 : index
    %c0_104 = arith.constant 0 : index
    %c0_105 = arith.constant 0 : index
    %142 = vector.load %arg5[%c0_101, %c0_102, %c0_103, %c0_104, %c0_105] : memref<1x4x2x8x8xf32, #tpu.memory_space<vmem>>, vector<1x4x2x8x8xf32>
    %143 = vector.shape_cast %142 : vector<1x4x2x8x8xf32> to vector<4x2x8x8xf32>
    %144 = vector.shape_cast %141 : vector<4x2x8x8xf32> to vector<1x4x2x8x8xf32>
    tpu.vector_store %arg5[%c0_101, %c0_102, %c0_103, %c0_104, %c0_105], %144 {strides = array<i32>} : memref<1x4x2x8x8xf32, #tpu.memory_space<vmem>>, vector<1x4x2x8x8xf32>,
    return
  }
  func.func @transform_0(%arg0: i32, %arg1: i32) -> (i32, i32, i32, i32) {
    %c0_i32 = arith.constant 0 : i32
    %c0_i32_0 = arith.constant 0 : i32
    %c0_i32_1 = arith.constant 0 : i32
    %c0_i32_2 = arith.constant 0 : i32
    return %arg0, %c0_i32, %c0_i32_0, %c0_i32_1 : i32, i32, i32, i32
  }
  func.func @transform_1(%arg0: i32, %arg1: i32) -> (i32, i32, i32) {
    %c0_i32 = arith.constant 0 : i32
    %c0_i32_0 = arith.constant 0 : i32
    %c0_i32_1 = arith.constant 0 : i32
    %c0_i32_2 = arith.constant 0 : i32
    return %c0_i32, %c0_i32_0, %c0_i32_1 : i32, i32, i32
  }
  func.func @transform_2(%arg0: i32, %arg1: i32) -> (i32, i32) {
    %c0_i32 = arith.constant 0 : i32
    %c0_i32_0 = arith.constant 0 : i32
    %c0_i32_1 = arith.constant 0 : i32
    return %c0_i32, %c0_i32_0 : i32, i32
  }
  func.func @transform_3(%arg0: i32, %arg1: i32) -> (i32, i32, i32, i32, i32) {
    %c0_i32 = arith.constant 0 : i32
    %c0_i32_0 = arith.constant 0 : i32
    %c0_i32_1 = arith.constant 0 : i32
    %c0_i32_2 = arith.constant 0 : i32
    return %arg0, %arg1, %c0_i32, %c0_i32_0, %c0_i32_1 : i32, i32, i32, i32, i32
  }
}

</mosaic_0001>

<bundles_post_ra>
// kernel: fc_discriminator_forward.8
= control target key start
LH: loop header
LB: loop body
LE: loop exit
PB: predicated region body
PF: predicated region fallthrough
CT: control target
= control target key end

     0   :  { %s771_s12 = smov 0   ;;  %s773_s13 = smov 0   ;;  %s869_s0 = inlined_call_operand.vmem [shape: bf16[2,9,9,16], index: 0, kind: input, shape index: {}]   ;;  %s870_s1 = inlined_call_operand.vmem [shape: bf16[64,16], index: 1, kind: input, shape index: {}]   ;;  %s871_s2 = inlined_call_operand.vmem [shape: f32[1,16], index: 2, kind: input, shape index: {}]   ;;  %s872_s3 = inlined_call_operand.vmem [shape: bf16[2,8,8,16], index: 3, kind: output, shape index: {}]  }
   0x1   :  { %s775_s14 = smov 0   ;;  %s777_s15 = smov 0  }
   0x2   :  { %s779_s16 = smov 0  }
   0x3 LB: > { %s22_s17 = sadd.s32 1, %s738_s14  ;;  %s25_s18 = sadd.s32 1, %s742_s15  ;;  %s746_s16 = sphi %s779_s16, %s13_s16   ;;  %s742_s15 = sphi %s777_s15, %s876_s15   ;;  %s738_s14 = sphi %s775_s14, %s875_s14   ;;  %s734_s13 = sphi %s773_s13, %s874_s13   ;;  %s730_s12 = sphi %s771_s12, %s873_s12  }
   0x4   : > { %p23_p0 = scmp.ge.s32.totalorder %s22_s17, 2  ;;  %p586_p1 = scmp.ge.s32.totalorder %s746_s16, 1 }
   0x5   : > { %p151_p2 = scmp.lt.s32.totalorder %s746_s16, 5 }
   0x6   : > { %s878_s17 = smov (%p23_p0, %s22_s17), 0  ;;  %s880_s18 = smov (!%p23_p0, %s25_s18), %s742_s15 }
   0x7   : > { %p152_p3 = pnand %p586_p1, %p151_p2  ;;  %p27_p4 = scmp.ge.s32.totalorder %s880_s18, 2 }
   0x8   : > { %p179_p5 = scmp.lt.s32.totalorder (!%p152_p3), %s734_s13, 1  ;;  %s628_s22 = sshll.u32 (!%p152_p3), %s730_s12, 5 }
   0x9   : > { %s882_s18 = smov (%p27_p4, %s880_s18), 0  ;;  %155 = sbr.rel (%p152_p3) target bundleno = 368 (0x170), region = 32 }
   0xa   : > { %s748_s27 = smov (!%p152_p3), 32   ;;  %s749_s7 = smov (!%p152_p3), 16  }
   0xb   : > { %s750_s8 = smov (!%p152_p3), 48   ;;  %s588_s9 = sshll.u32 (!%p152_p3), %s730_s12, 2 }
   0xc   : > { %p187_p6 = scmp.lt.s32.totalorder (!%p152_p3), %s588_s9, 7 }
   0xe   : > { %v704_v0 = vld [vmem:[%s870_s1 + $0x18] sm:$0xff]   ;;  %s884_s13 = smov (!%p179_p5, %s734_s13), 1  ;;  %v705_v29 = vld [vmem:[%s870_s1 + $0x10] sm:$0xff]   ;;  %v706_v30 = vld [vmem:[%s870_s1 + $0x8] sm:$0xff]   ;;  %vm343_vm0 = vcmask 130048   ;;  %vm356_vm1 = vcmask 261120  }
   0xf   : > { %636 = vmatprep.subr.bf16.mxu0 %v704_v0  ;;  %s648_s21 = smul.u32 72, %s884_s13  ;;  %v707_v45 = vld [vmem:[%s870_s1] sm:$0xff]   ;;  %vm365_vm2 = vcmask 392192   ;;  %vm423_vm3 = vcmask 523264   ;;  %s886_s9 = smov (!%p187_p6, %s588_s9), 7  ;;  %vm487_vm4 = vcmask 125952  }
  0x10   : > { %637 = vmatpush3.bf16.msra.mxu0 %v704_v0  ;;  %s589_s10 = sshll.u32 %s884_s13, 3 }
  0x11   : > { %s183_s25 = scalar_lea.vmem %s869_s0, %s648_s21  ;;  %638 = vmatprep.subr.bf16.mxu0 %v705_v29  ;;  %s190_s11 = sadd.s32 %s589_s10, %s886_s9 }
  0x12   : > { %s198_s26 = scalar_lea.vmem %s183_s25, %s628_s22  ;;  %s590_s21 = sshll.u32 %s190_s11, 2 }
  0x13   : > { %v597_v1 = vld [vmem:[%s198_s26 + $0x10] sm:$0xf]  ;;  %v601_v2 = vld [vmem:[%s198_s26 + $0x14] sm:$0x1]  ;;  %v596_v3 = vld [vmem:[%s198_s26 + $0x8] sm:$0xf]  ;;  %s192_s24 = scalar_lea.vmem %s872_s3, %s590_s21 }
  0x14   : > { %v609_v4 = vcombine.low %v597_v1, %v597_v1  ;;  %v600_v5 = vld [vmem:[%s198_s26 + $0xc] sm:$0x1]  ;;  %v608_v6 = vcombine.low %v596_v3, %v596_v3  ;;  %v599_v7 = vld [vmem:[%s198_s26 + $0x20] sm:$0xf]  ;;  %v603_v8 = vld [vmem:[%s198_s26 + $0x24] sm:$0x1]  ;;  %v613_v11 = vcombine.low %v597_v1, %v601_v2  ;;  %639 = vmatpush3.bf16.msra.mxu0 %v705_v29 }
  0x15   : > { %v598_v9 = vld [vmem:[%s198_s26 + $0x18] sm:$0xf]  ;;  %v813_v10 = vld [vmem:[%s198_s26 + $0x10] sm:$0xf]  ;;  %v611_v12 = vcombine.low %v599_v7, %v599_v7  ;;  %v205_v14 = vld [vmem:[%s198_s26 + $0x14] sm:$0x1]  ;;  %v612_v20 = vcombine.low %v596_v3, %v600_v5  ;;  %v615_v32 = vcombine.low %v599_v7, %v603_v8  ;;  %640 = vmatprep.subr.bf16.mxu0 %v706_v30 }
  0x16   : > { %289 = vrot.lane.b32.xlu1 %v609_v4, %s748_s27  ;;  %287 = vrot.lane.b32.xlu0 %v608_v6, %s748_s27  ;;  %v610_v13 = vcombine.low %v598_v9, %v598_v9  ;;  %v815_v15 = vld [vmem:[%s198_s26] sm:$0xf]  ;;  %v602_v16 = vld [vmem:[%s198_s26 + $0x1c] sm:$0x1]  ;;  %v606_v17 = vcombine.low %v813_v10, %v205_v14  ;;  %v317_v31 = vshll.u32 %v613_v11, 16  ;;  %v315_v48 = vshrl.u32 %v613_v11, 16 }
  0x17   : > { %v203_v18 = vld [vmem:[%s198_s26 + $0x4] sm:$0x1]  ;;  %v818_v19 = vld [vmem:[%s198_s26 + $0x18] sm:$0xf]  ;;  %v206_v22 = vld [vmem:[%s198_s26 + $0x1c] sm:$0x1]  ;;  %v614_v35 = vcombine.low %v598_v9, %v602_v16 }
  0x18   : > { %v604_v21 = vcombine.low %v815_v15, %v203_v18  ;;  %v821_v23 = vld [vmem:[%s198_s26 + $0x8] sm:$0xf]  ;;  %v204_v24 = vld [vmem:[%s198_s26 + $0xc] sm:$0x1]  ;;  %v254_v25 = vshrl.u32 %v606_v17, 16  ;;  %v256_v26 = vshll.u32 %v606_v17, 16  ;;  %v607_v27 = vcombine.low %v818_v19, %v206_v22  ;;  %641 = vmatpush3.bf16.msra.mxu0 %v706_v30 }
  0x19   : > { %v605_v28 = vcombine.low %v821_v23, %v204_v24  ;;  %v310_v39 = vshll.u32 %v612_v20, 16  ;;  %v319_v50 = vrot.slane %v317_v31, 1  ;;  %v331_v51 = vshll.u32 %v615_v32, 16  ;;  %642 = vmatprep.subr.bf16.mxu0 %v707_v45 }
  0x1a   : > { %293 = vrot.lane.b32.xlu1 %v611_v12, %s748_s27  ;;  %291 = vrot.lane.b32.xlu0 %v610_v13, %s748_s27  ;;  %v240_v33 = vshrl.u32 %v604_v21, 16  ;;  %v242_v34 = vshll.u32 %v604_v21, 16  ;;  %v258_v36 = vrot.slane %v256_v26, 1  ;;  %v261_v37 = vshrl.u32 %v607_v27, 16 }
  0x1b   : > { %v263_v38 = vshll.u32 %v607_v27, 16  ;;  %v247_v41 = vshrl.u32 %v605_v28, 16  ;;  %v249_v42 = vshll.u32 %v605_v28, 16  ;;  %v308_v52 = vshrl.u32 %v612_v20, 16 }
  0x1c   : > { %v244_v40 = vrot.slane %v242_v34, 1  ;;  %v259_v43 = vor.u32 %v258_v36, %v254_v25  ;;  %v312_v54 = vrot.slane %v310_v39, 1  ;;  %v324_v55 = vshll.u32 %v614_v35, 16  ;;  %643 = vmatpush3.bf16.msra.mxu0 %v707_v45 }
  0x1d   : > { %v265_v44 = vrot.slane %v263_v38, 1  ;;  %v251_v47 = vrot.slane %v249_v42, 1  ;;  %v320_v56 = vor.u32 %v319_v50, %v315_v48  ;;  %v329_v57 = vshrl.u32 %v615_v32, 16 }
  0x1e   : > { %v245_v46 = vor.u32 %v244_v40, %v240_v33  ;;  %271 = vrot.lane.b32.xlu1 %v259_v43, %s749_s7  ;;  %v333_v58 = vrot.slane %v331_v51, 1  ;;  %v313_v59 = vor.u32 %v312_v54, %v308_v52  ;;  %v322_v60 = vshrl.u32 %v614_v35, 16 }
  0x1f   : > { %v266_v49 = vor.u32 %v265_v44, %v261_v37  ;;  %v252_v53 = vor.u32 %v251_v47, %v247_v41  ;;  %v326_v61 = vrot.slane %v324_v55, 1 }
  0x20   : > { %267 = vrot.lane.b32.xlu0 %v245_v46, %s749_s7  ;;  %v334_v62 = vor.u32 %v333_v58, %v329_v57 }
  0x21   : > { %v327_v63 = vor.u32 %v326_v61, %v322_v60 }
  0x22   : > { %273 = vrot.lane.b32.xlu1 %v266_v49, %s749_s7 }
  0x24   : > { %269 = vrot.lane.b32.xlu0 %v252_v53, %s749_s7 }
  0x26   : > { %337 = vrot.lane.b32.xlu1 %v320_v56, %s750_s8 }
  0x28   : > { %335 = vrot.lane.b32.xlu0 %v313_v59, %s750_s8 }
  0x2a   : > { %341 = vrot.lane.b32.xlu1 %v334_v62, %s750_s8 }
  0x2c   : > { %339 = vrot.lane.b32.xlu0 %v327_v63, %s750_s8 }
  0x88   : > { %v290_v0 = vpop.permute.xlu1 %289  ;;  %v288_v1 = vpop.permute.xlu0 %287 }
  0x8c   : > { %v294_v2 = vpop.permute.xlu1 %293  ;;  %v292_v3 = vpop.permute.xlu0 %291 }
  0x90   : > { %v272_v4 = vpop.permute.xlu1 %271 }
  0x91   : > { %v352_v18 = vsel %vm343_vm0, %v813_v10, %v272_v4  ;;  %v616_v10 = vld [vmem:[%s871_s2] ss:$0 sm:$0xff] }
  0x92   : > { %v268_v5 = vpop.permute.xlu0 %267 }
  0x93   : > { %v346_v8 = vsel %vm343_vm0, %v815_v15, %v268_v5 }
  0x94   : > { %v274_v6 = vpop.permute.xlu1 %273  ;;  %v358_v16 = vsel %vm356_vm1, %v346_v8, %v288_v1 }
  0x95   : > { %v355_v13 = vsel %vm343_vm0, %v818_v19, %v274_v6  ;;  %v362_v19 = vsel %vm356_vm1, %v352_v18, %v292_v3 }
  0x96   : > { %v270_v7 = vpop.permute.xlu0 %269  ;;  %v364_v21 = vsel %vm356_vm1, %v355_v13, %v294_v2 }
  0x97   : > { %v349_v9 = vsel %vm343_vm0, %v821_v23, %v270_v7 }
  0x98   : > { %v338_v11 = vpop.permute.xlu1 %337  ;;  %v360_v12 = vsel %vm356_vm1, %v349_v9, %v290_v0 }
  0x99   : > { %v369_v14 = vsel %vm365_vm2, %v360_v12, %v338_v11 }
  0x9a   : > { %v336_v17 = vpop.permute.xlu0 %335 }
  0x9b   : > { %v367_v15 = vsel %vm365_vm2, %v358_v16, %v336_v17 }
  0x9c   : > { %v617_v20 = vcombine.low %v367_v15, %v369_v14  ;;  %v342_v22 = vpop.permute.xlu1 %341 }
  0x9d   : > { %v373_v23 = vsel %vm365_vm2, %v364_v21, %v342_v22 }
  0x9e   : > { %644 = vmatprep.mubr.msk.bf16.mxu0 %vm423_vm3, %v617_v20  ;;  %v340_v24 = vpop.permute.xlu0 %339 }
  0x9f   : > { %v371_v25 = vsel %vm365_vm2, %v362_v19, %v340_v24 }
  0xa0   : > { %v618_v26 = vcombine.low %v371_v25, %v373_v23 }
  0xa2   : > { %645 = vmatmul.mubr.msk.bf16.vlgmr.msra.gmra.mxu0 %vm423_vm3, %v618_v26 }
 0x162   : > { %v646_v27 = vpop.f32.mrf.mxu0 }
 0x163   : > { %v473_v28 = vadd.f32 %v646_v27, %v616_v10 }
 0x164   : > { %v464_v29 = vpop.f32.mrf.mxu0 }
 0x165   : > { %v481_v30 = vmax.f32 %v473_v28, 0.0  ;;  %v465_v31 = vadd.f32 %v616_v10, %v464_v29 }
 0x166   : > { %v647_v32 = vpop.f32.mrf.mxu0 }
 0x167   : > { %v485_v33 = vpack.c.bf16 %v481_v30, %v481_v30  ;;  %v479_v34 = vmax.f32 %v465_v31, 0.0  ;;  %v476_v35 = vadd.f32 %v647_v32, %v616_v10 }
 0x168   : > { %v467_v36 = vpop.f32.mrf.mxu0 }
 0x169   : > { %490 = vst.msk [vmem:[%s192_s24 + $0x8] sm:$0xf] %vm487_vm4, %v485_v33  ;;  %v483_v37 = vpack.c.bf16 %v479_v34, %v479_v34  ;;  %v482_v38 = vmax.f32 %v476_v35, 0.0  ;;  %v468_v39 = vadd.f32 %v616_v10, %v467_v36 }
 0x16b   : > { %488 = vst.msk [vmem:[%s192_s24] sm:$0xf] %vm487_vm4, %v483_v37  ;;  %v486_v40 = vpack.c.bf16 %v482_v38, %v482_v38  ;;  %v480_v41 = vmax.f32 %v468_v39, 0.0 }
 0x16d   : > { %491 = vst.msk [vmem:[%s192_s24 + $0xc] sm:$0xf] %vm487_vm4, %v486_v40  ;;  %v484_v42 = vpack.c.bf16 %v480_v41, %v480_v41 }
 0x16f   : > { %489 = vst.msk [vmem:[%s192_s24 + $0x4] sm:$0xf] %vm487_vm4, %v484_v42 }
 0x170 PF: > { %s13_s16 = sadd.s32 1, %s746_s16   ;;  %s873_s12 = smov %s738_s14 }
 0x171   : > { %p10_p7 = scmp.ge.s32.totalorder %s13_s16, 6   ;;  %s874_s13 = smov %s742_s15 }
 0x172   : > { %s875_s14 = smov %s878_s17  ;;  %s876_s15 = smov %s882_s18 }
 0x173   :  { %12 = sbr.rel (!%p10_p7) target bundleno = 3 (0x3), region = 64 }

// kernel: fc_discriminator_forward.9
= control target key start
LH: loop header
LB: loop body
LE: loop exit
PB: predicated region body
PF: predicated region fallthrough
CT: control target
= control target key end

     0   :  { %s764_s12 = smov 0   ;;  %s766_s13 = smov 0   ;;  %s888_s0 = inlined_call_operand.vmem [shape: bf16[2,5,5,64], index: 0, kind: input, shape index: {}]   ;;  %s889_s1 = inlined_call_operand.vmem [shape: bf16[256,32], index: 1, kind: input, shape index: {}]   ;;  %s890_s2 = inlined_call_operand.vmem [shape: f32[1,32], index: 2, kind: input, shape index: {}]   ;;  %s891_s3 = inlined_call_operand.vmem [shape: bf16[2,4,4,32], index: 3, kind: output, shape index: {}]  }
   0x1   :  { %s768_s14 = smov 0   ;;  %s770_s15 = smov 0  }
   0x2   :  { %s772_s16 = smov 0  }
   0x3 LB: > { %s22_s17 = sadd.s32 1, %s732_s14  ;;  %s25_s18 = sadd.s32 1, %s736_s15  ;;  %s740_s16 = sphi %s772_s16, %s13_s16   ;;  %s736_s15 = sphi %s770_s15, %s895_s15   ;;  %s732_s14 = sphi %s768_s14, %s894_s14   ;;  %s728_s13 = sphi %s766_s13, %s893_s13   ;;  %s724_s12 = sphi %s764_s12, %s892_s12  }
   0x4   : > { %p23_p0 = scmp.ge.s32.totalorder %s22_s17, 2  ;;  %p579_p1 = scmp.ge.s32.totalorder %s740_s16, 1 }
   0x5   : > { %p151_p2 = scmp.lt.s32.totalorder %s740_s16, 5 }
   0x6   : > { %s897_s17 = smov (%p23_p0, %s22_s17), 0  ;;  %s899_s18 = smov (!%p23_p0, %s25_s18), %s736_s15 }
   0x7   : > { %p152_p3 = pnand %p579_p1, %p151_p2  ;;  %p27_p4 = scmp.ge.s32.totalorder %s899_s18, 2 }
   0x8   : > { %p179_p5 = scmp.lt.s32.totalorder (!%p152_p3), %s728_s13, 1  ;;  %s615_s23 = sshll.u32 (!%p152_p3), %s724_s12, 3 }
   0x9   : > { %s901_s18 = smov (%p27_p4, %s899_s18), 0  ;;  %155 = sbr.rel (%p152_p3) target bundleno = 363 (0x16b), region = 32 }
   0xa   : > { %s581_s19 = sshll.u32 (!%p152_p3), %s724_s12, 1 }
   0xb   : > { %p187_p6 = scmp.lt.s32.totalorder (!%p152_p3), %s581_s19, 3 }
   0xe   : > { %v686_v0 = vld [vmem:[%s889_s1 + $0x78] sm:$0xff]   ;;  %s903_s13 = smov (!%p179_p5, %s728_s13), 1  ;;  %v688_v2 = vld [vmem:[%s889_s1 + $0x70] sm:$0xff]   ;;  %v690_v4 = vld [vmem:[%s889_s1 + $0x68] sm:$0xff]   ;;  %v743_v36 = vmov 1983009808   ;;  %v278_v38 = vlaneseq }
   0xf   : > { %v687_v1 = vld [vmem:[%s889_s1 + $0x38] sm:$0xff]   ;;  %617 = vmatprep.subr.bf16.mxu0 %v686_v0  ;;  %s639_s26 = smul.u32 20, %s903_s13  ;;  %v689_v3 = vld [vmem:[%s889_s1 + $0x30] sm:$0xff]   ;;  %v691_v6 = vld [vmem:[%s889_s1 + $0x28] sm:$0xff]   ;;  %v276_v37 = vunpack.c.l.s4 %v743_v36  ;;  %vm257_vm0 = vcmask 523264   ;;  %s905_s19 = smov (!%p187_p6, %s581_s19), 3 }
  0x10   : > { %618 = vmatpush3.bf16.msra.mxu0 %v687_v1  ;;  %v692_v8 = vld [vmem:[%s889_s1 + $0x60] sm:$0xff]   ;;  %v694_v20 = vld [vmem:[%s889_s1 + $0x58] sm:$0xff]   ;;  %v696_v29 = vld [vmem:[%s889_s1 + $0x50] sm:$0xff]   ;;  %v279_v43 = vshrl.u32 %v278_v38, 7  ;;  %vm482_vm1 = vcmask 254976  }
  0x11   : > { %619 = vmatprep.subr.bf16.mxu0 %v688_v2  ;;  %s183_s6 = scalar_lea.vmem %s888_s0, %s639_s26  ;;  %v693_v16 = vld [vmem:[%s889_s1 + $0x20] sm:$0xff]   ;;  %v695_v27 = vld [vmem:[%s889_s1 + $0x18] sm:$0xff]   ;;  %v697_v31 = vld [vmem:[%s889_s1 + $0x10] sm:$0xff]   ;;  %v277_v42 = vunpack.c.0.s8 %v276_v37 }
  0x12   : > { %s818_s7 = scalar_lea.vmem %s183_s6, %s615_s23  ;;  %s742_s23 = smov 64   ;;  %v698_v32 = vld [vmem:[%s889_s1 + $0x48] sm:$0xff]   ;;  %v700_v34 = vld [vmem:[%s889_s1 + $0x40] sm:$0xff]  }
  0x13   : > { %v682_v5 = vld [vmem:[%s818_s7 + $0x4] ss:$0 sps:$4 sm:$0x77]   ;;  %v683_v7 = vld [vmem:[%s818_s7] ss:$0 sps:$4 sm:$0x77]   ;;  %v280_v50 = vsub.s32 %v277_v42, %v279_v43 }
  0x14   : > { %620 = vmatpush3.bf16.msra.mxu0 %v689_v3  ;;  %v240_v9 = vshrl.u32 %v682_v5, 16  ;;  %v242_v10 = vshll.u32 %v682_v5, 16  ;;  %v216_v11 = vshrl.u32 %v683_v7, 16  ;;  %v218_v12 = vshll.u32 %v683_v7, 16  ;;  %v699_v33 = vld [vmem:[%s889_s1 + $0x8] sm:$0xff]   ;;  %v701_v35 = vld [vmem:[%s889_s1] sm:$0xff]  }
  0x15   : > { %621 = vmatprep.subr.bf16.mxu0 %v690_v4  ;;  %v684_v13 = vld [vmem:[%s818_s7 + $0x8] ss:$0 sps:$4 sm:$0x77]   ;;  %v685_v15 = vld [vmem:[%s818_s7 + $0x4] ss:$0 sps:$4 sm:$0x77]  }
  0x16   : > { %v244_v14 = vrot.slane %v242_v10, 1  ;;  %v220_v17 = vrot.slane %v218_v12, 1  ;;  %v247_v18 = vshrl.u32 %v684_v13, 16  ;;  %v249_v19 = vshll.u32 %v684_v13, 16  ;;  %v588_v39 = vld [vmem:[%s818_s7 + $0x4] sm:$0x3] }
  0x17   : > { %v223_v22 = vshrl.u32 %v685_v15, 16  ;;  %v225_v23 = vshll.u32 %v685_v15, 16  ;;  %v198_v40 = vld [vmem:[%s818_s7] sm:$0x3]  ;;  %v589_v47 = vld [vmem:[%s818_s7 + $0x8] sm:$0x3] }
  0x18   : > { %622 = vmatpush3.bf16.msra.mxu0 %v691_v6  ;;  %v245_v21 = vor.u32 %v244_v14, %v240_v9  ;;  %v221_v24 = vor.u32 %v220_v17, %v216_v11  ;;  %v251_v25 = vrot.slane %v249_v19, 1  ;;  %v199_v48 = vld [vmem:[%s818_s7 + $0x4] sm:$0x3]  ;;  %s582_s7 = sshll.u32 %s903_s13, 2  ;;  %v596_v62 = vld [vmem:[%s890_s2] ss:$0 sm:$0xff] }
  0x19   : > { %623 = vmatprep.subr.bf16.mxu0 %v692_v8  ;;  %v227_v26 = vrot.slane %v225_v23, 1  ;;  %s190_s20 = sadd.s32 %s582_s7, %s905_s19 }
  0x1a   : > { %253 = vrot.lane.b32.xlu1 %v245_v21, %s742_s23  ;;  %229 = vrot.lane.b32.xlu0 %v221_v24, %s742_s23  ;;  %v252_v28 = vor.u32 %v251_v25, %v247_v18 }
  0x1b   : > { %v228_v30 = vor.u32 %v227_v26, %v223_v22 }
  0x1c   : > { %624 = vmatpush3.bf16.msra.mxu0 %v693_v16 }
  0x1d   : > { %625 = vmatprep.subr.bf16.mxu0 %v694_v20 }
  0x1e   : > { %255 = vrot.lane.b32.xlu1 %v252_v28, %s742_s23  ;;  %231 = vrot.lane.b32.xlu0 %v228_v30, %s742_s23  ;;  %s583_s23 = sshll.u32 %s190_s20, 1 }
  0x1f   : > { %s192_s12 = scalar_lea.vmem %s891_s3, %s583_s23 }
  0x20   : > { %626 = vmatpush3.bf16.msra.mxu0 %v695_v27 }
  0x21   : > { %627 = vmatprep.subr.bf16.mxu0 %v696_v29 }
  0x24   : > { %628 = vmatpush3.bf16.msra.mxu0 %v697_v31 }
  0x25   : > { %629 = vmatprep.subr.bf16.mxu0 %v698_v32 }
  0x28   : > { %630 = vmatpush3.bf16.msra.mxu0 %v699_v33 }
  0x29   : > { %631 = vmatprep.subr.bf16.mxu0 %v700_v34 }
  0x2c   : > { %632 = vmatpush3.bf16.msra.mxu0 %v701_v35 }
  0x8c   : > { %v254_v41 = vpop.permute.xlu1 %253  ;;  %v230_v44 = vpop.permute.xlu0 %229 }
  0x8d   : > { %v266_v45 = vsel %vm257_vm0, %v588_v39, %v254_v41  ;;  %v260_v46 = vsel %vm257_vm0, %v198_v40, %v230_v44 }
  0x8e   : > { %v274_v51 = vcombine.low %v260_v46, %v266_v45 }
  0x90   : > { %v256_v49 = vpop.permute.xlu1 %255  ;;  %v232_v53 = vpop.permute.xlu0 %231  ;;  %v281_v56 = vrot.slane %v274_v51, %v280_v50 }
  0x91   : > { %v269_v52 = vsel %vm257_vm0, %v589_v47, %v256_v49  ;;  %v263_v54 = vsel %vm257_vm0, %v199_v48, %v232_v53 }
  0x92   : > { %v282_v55 = vcombine.low %v263_v54, %v269_v52 }
  0x94   : > { %v289_v57 = vrot.slane %v282_v55, %v280_v50 }
  0x96   : > { %v329_v58 = vcombine.low %v281_v56, %v289_v57 }
  0x98   : > { %v336_v59 = vrot.slane %v329_v58, %v280_v50 }
  0x9a   : > { %v337_v60 = vcombine.high %v336_v59, %v336_v59 }
  0x9c   : > { %468 = vmatprep.mubr.bf16.mxu0 %v337_v60 }
  0x9d   : > { %469 = vmatmul.mubr.bf16.vlgmr.msra.gmra.mxu0 %v336_v59 }
 0x15d   : > { %v633_v61 = vpop.f32.mrf.mxu0 }
 0x15f   : > { %v634_v63 = vpop.f32.mrf.mxu0 }
 0x160   : > { %v635_v0 = vadd.f32 %v634_v63, %v633_v61 }
 0x161   : > { %v636_v1 = vpop.f32.mrf.mxu0 }
 0x162   : > { %v471_v2 = vadd.f32 %v635_v0, %v596_v62 }
 0x163   : > { %v637_v3 = vpop.f32.mrf.mxu0 }
 0x164   : > { %v476_v4 = vmax.f32 %v471_v2, 0.0 }
 0x166   : > { %v478_v5 = vcombine.high %v476_v4, %v476_v4  ;;  %v480_v6 = vpack.c.bf16 %v476_v4, %v476_v4 }
 0x168   : > { %v481_v7 = vpack.c.bf16 %v478_v5, %v478_v5  ;;  %483 = vst.msk [vmem:[%s192_s12] sm:$0x3] %vm482_vm1, %v480_v6 }
 0x16a   : > { %484 = vst.msk [vmem:[%s192_s12 + $0x2] sm:$0x3] %vm482_vm1, %v481_v7 }
 0x16b PF: > { %s13_s16 = sadd.s32 1, %s740_s16   ;;  %s892_s12 = smov %s732_s14 }
 0x16c   : > { %p10_p7 = scmp.ge.s32.totalorder %s13_s16, 6   ;;  %s893_s13 = smov %s736_s15 }
 0x16d   : > { %s894_s14 = smov %s897_s17  ;;  %s895_s15 = smov %s901_s18 }
 0x16e   :  { %12 = sbr.rel (!%p10_p7) target bundleno = 3 (0x3), region = 64 }

// kernel: fc_discriminator_forward.10
= control target key start
LH: loop header
LB: loop body
LE: loop exit
PB: predicated region body
PF: predicated region fallthrough
CT: control target
= control target key end

     0   :  { %s882_s12 = smov 0   ;;  %s884_s13 = smov 0   ;;  %s1045_s0 = inlined_call_operand.vmem [shape: bf16[2,3,3,128], index: 0, kind: input, shape index: {}]   ;;  %s1046_s1 = inlined_call_operand.vmem [shape: bf16[512,64], index: 1, kind: input, shape index: {}]   ;;  %s1047_s2 = inlined_call_operand.vmem [shape: f32[1,64], index: 2, kind: input, shape index: {}]   ;;  %s1048_s3 = inlined_call_operand.vmem [shape: bf16[2,2,2,64], index: 3, kind: output, shape index: {}]  }
   0x1   :  { %s886_s14 = smov 0   ;;  %s888_s15 = smov 0  }
   0x2   :  { %s890_s16 = smov 0  }
   0x3 LB: > { %s22_s17 = sadd.s32 1, %s852_s14  ;;  %s25_s18 = sadd.s32 1, %s856_s15  ;;  %s860_s16 = sphi %s890_s16, %s13_s16   ;;  %s856_s15 = sphi %s888_s15, %s1052_s15   ;;  %s852_s14 = sphi %s886_s14, %s1051_s14   ;;  %s848_s13 = sphi %s884_s13, %s1050_s13   ;;  %s844_s12 = sphi %s882_s12, %s1049_s12  }
   0x4   : > { %p23_p0 = scmp.ge.s32.totalorder %s22_s17, 2  ;;  %p661_p1 = scmp.ge.s32.totalorder %s860_s16, 1 }
   0x5   : > { %p151_p2 = scmp.lt.s32.totalorder %s860_s16, 5 }
   0x6   : > { %s1054_s17 = smov (%p23_p0, %s22_s17), 0  ;;  %s1056_s18 = smov (!%p23_p0, %s25_s18), %s856_s15 }
   0x7   : > { %p152_p3 = pnand %p661_p1, %p151_p2  ;;  %p27_p4 = scmp.ge.s32.totalorder %s1056_s18, 2 }
   0x8   : > { %p177_p5 = scmp.lt.s32.totalorder (!%p152_p3), %s848_s13, 1  ;;  %s664_s10 = sshll.u32 (!%p152_p3), %s844_s12, 1 }
   0x9   : > { %s1058_s18 = smov (%p27_p4, %s1056_s18), 0  ;;  %155 = sbr.rel (%p152_p3) target bundleno = 254 (0xfe), region = 32 }
   0xa   : > { %p184_p6 = scmp.lt.s32.totalorder (!%p152_p3), %s844_s12, 1 }
   0xe   : > { %v790_v0 = vld [vmem:[%s1046_s1 + $0x78] sm:$0xff]   ;;  %v794_v4 = vld [vmem:[%s1046_s1 + $0x70] sm:$0xff]   ;;  %v798_v8 = vld [vmem:[%s1046_s1 + $0x68] sm:$0xff]   ;;  %s1060_s13 = smov (!%p177_p5, %s848_s13), 1  ;;  %s1062_s12 = smov (!%p184_p6, %s844_s12), 1  ;;  %vm576_vm0 = vcmask 516096  }
   0xf   : > { %v791_v1 = vld [vmem:[%s1046_s1 + $0xf8] sm:$0xff]   ;;  %705 = vmatprep.subr.bf16.mxu0 %v790_v0  ;;  %v795_v5 = vld [vmem:[%s1046_s1 + $0xf0] sm:$0xff]   ;;  %v799_v9 = vld [vmem:[%s1046_s1 + $0xe8] sm:$0xff]   ;;  %s749_s25 = smul.u32 6, %s1060_s13  ;;  %s663_s4 = sshll.u32 %s1060_s13, 1 }
  0x10   : > { %v792_v2 = vld [vmem:[%s1046_s1 + $0x38] sm:$0xff]   ;;  %727 = vmatprep.subr.bf16.mxu1 %v791_v1  ;;  %v796_v6 = vld [vmem:[%s1046_s1 + $0x30] sm:$0xff]   ;;  %v800_v10 = vld [vmem:[%s1046_s1 + $0x28] sm:$0xff]   ;;  %s187_s5 = sadd.s32 %s663_s4, %s1062_s12 }
  0x11   : > { %v793_v3 = vld [vmem:[%s1046_s1 + $0xb8] sm:$0xff]   ;;  %706 = vmatpush3.bf16.msra.mxu0 %v792_v2  ;;  %v797_v7 = vld [vmem:[%s1046_s1 + $0xb0] sm:$0xff]   ;;  %v801_v11 = vld [vmem:[%s1046_s1 + $0xa8] sm:$0xff]   ;;  %s181_s9 = scalar_lea.vmem %s1045_s0, %s749_s25  ;;  %s188_s8 = scalar_lea.vmem %s1048_s3, %s187_s5 }
  0x12   : > { %728 = vmatpush3.bf16.msra.mxu1 %v793_v3  ;;  %707 = vmatprep.subr.bf16.mxu0 %v794_v4  ;;  %v802_v12 = vld [vmem:[%s1046_s1 + $0x60] sm:$0xff]   ;;  %v806_v16 = vld [vmem:[%s1046_s1 + $0x58] sm:$0xff]   ;;  %v810_v20 = vld [vmem:[%s1046_s1 + $0x50] sm:$0xff]   ;;  %s191_s24 = scalar_lea.vmem %s181_s9, %s664_s10 }
  0x13   : > { %729 = vmatprep.subr.bf16.mxu1 %v795_v5  ;;  %v803_v13 = vld [vmem:[%s1046_s1 + $0xe0] sm:$0xff]   ;;  %v807_v17 = vld [vmem:[%s1046_s1 + $0xd8] sm:$0xff]   ;;  %v811_v21 = vld [vmem:[%s1046_s1 + $0xd0] sm:$0xff]  }
  0x14   : > { %v804_v14 = vld [vmem:[%s1046_s1 + $0x20] sm:$0xff]   ;;  %v808_v18 = vld [vmem:[%s1046_s1 + $0x18] sm:$0xff]   ;;  %v812_v22 = vld [vmem:[%s1046_s1 + $0x10] sm:$0xff]  }
  0x15   : > { %708 = vmatpush3.bf16.msra.mxu0 %v796_v6  ;;  %v805_v15 = vld [vmem:[%s1046_s1 + $0xa0] sm:$0xff]   ;;  %v809_v19 = vld [vmem:[%s1046_s1 + $0x98] sm:$0xff]   ;;  %v813_v23 = vld [vmem:[%s1046_s1 + $0x90] sm:$0xff]  }
  0x16   : > { %730 = vmatpush3.bf16.msra.mxu1 %v797_v7  ;;  %709 = vmatprep.subr.bf16.mxu0 %v798_v8  ;;  %v814_v24 = vld [vmem:[%s1046_s1 + $0x48] sm:$0xff]   ;;  %v818_v28 = vld [vmem:[%s1046_s1 + $0x40] sm:$0xff]  }
  0x17   : > { %731 = vmatprep.subr.bf16.mxu1 %v799_v9  ;;  %v815_v25 = vld [vmem:[%s1046_s1 + $0xc8] sm:$0xff]   ;;  %v819_v29 = vld [vmem:[%s1046_s1 + $0xc0] sm:$0xff]  }
  0x18   : > { %v816_v26 = vld [vmem:[%s1046_s1 + $0x8] sm:$0xff]   ;;  %v820_v30 = vld [vmem:[%s1046_s1] sm:$0xff]  }
  0x19   : > { %710 = vmatpush3.bf16.msra.mxu0 %v800_v10  ;;  %v817_v27 = vld [vmem:[%s1046_s1 + $0x88] sm:$0xff]   ;;  %v821_v31 = vld [vmem:[%s1046_s1 + $0x80] sm:$0xff]  }
  0x1a   : > { %732 = vmatpush3.bf16.msra.mxu1 %v801_v11  ;;  %711 = vmatprep.subr.bf16.mxu0 %v802_v12  ;;  %v668_v32 = vld.sshfl [vmem:[%s191_s24] sm:$0x3 pattern:$0x76325410]  ;;  %v666_v43 = vld [vmem:[%s191_s24 + $0x2] sm:$0x1] }
  0x1b   : > { %733 = vmatprep.subr.bf16.mxu1 %v803_v13  ;;  %v208_v33 = vshrl.u32 %v668_v32, 16  ;;  %v210_v34 = vshll.u32 %v668_v32, 16  ;;  %v669_v35 = vld.sshfl [vmem:[%s191_s24 + $0x2] sm:$0x3 pattern:$0x76325410] }
  0x1c   : > { %v224_v36 = vshrl.u32 %v669_v35, 16  ;;  %v226_v37 = vshll.u32 %v669_v35, 16  ;;  %v192_v41 = vld [vmem:[%s191_s24] sm:$0x1] }
  0x1d   : > { %712 = vmatpush3.bf16.msra.mxu0 %v804_v14  ;;  %v212_v38 = vrot.slane %v210_v34, 1  ;;  %v670_v46 = vld [vmem:[%s1047_s2] ss:$0 sm:$0xff] }
  0x1e   : > { %734 = vmatpush3.bf16.msra.mxu1 %v805_v15  ;;  %713 = vmatprep.subr.bf16.mxu0 %v806_v16  ;;  %v228_v39 = vrot.slane %v226_v37, 1 }
  0x1f   : > { %735 = vmatprep.subr.bf16.mxu1 %v807_v17  ;;  %v213_v40 = vor.u32 %v212_v38, %v208_v33 }
  0x20   : > { %v229_v42 = vor.u32 %v228_v39, %v224_v36 }
  0x21   : > { %714 = vmatpush3.bf16.msra.mxu0 %v808_v18  ;;  %526 = vmatprep.mubr.bf16.mxu0 %v213_v40 }
  0x22   : > { %736 = vmatpush3.bf16.msra.mxu1 %v809_v19  ;;  %715 = vmatprep.subr.bf16.mxu0 %v810_v20 }
  0x23   : > { %737 = vmatprep.subr.bf16.mxu1 %v811_v21  ;;  %566 = vmatprep.mubr.bf16.mxu1 %v229_v42 }
  0x25   : > { %716 = vmatpush3.bf16.msra.mxu0 %v812_v22 }
  0x26   : > { %738 = vmatpush3.bf16.msra.mxu1 %v813_v23  ;;  %717 = vmatprep.subr.bf16.mxu0 %v814_v24 }
  0x27   : > { %739 = vmatprep.subr.bf16.mxu1 %v815_v25 }
  0x29   : > { %718 = vmatpush3.bf16.msra.mxu0 %v816_v26 }
  0x2a   : > { %740 = vmatpush3.bf16.msra.mxu1 %v817_v27  ;;  %719 = vmatprep.subr.bf16.mxu0 %v818_v28 }
  0x2b   : > { %741 = vmatprep.subr.bf16.mxu1 %v819_v29 }
  0x2d   : > { %720 = vmatpush3.bf16.msra.mxu0 %v820_v30 }
  0x2e   : > { %742 = vmatpush3.bf16.msra.mxu1 %v821_v31 }
  0x30   : > { %527 = vmatmul.mubr.bf16.vlgmr.msra.gmra.mxu0 %v192_v41 }
  0x31   : > { %567 = vmatmul.mubr.bf16.vlgmr.msra.gmra.mxu1 %v666_v43 }
  0xf0   : > { %v721_v44 = vpop.f32.mrf.mxu0 }
  0xf1   : > { %v743_v45 = vpop.f32.mrf.mxu1 }
  0xf2   : > { %v722_v47 = vpop.f32.mrf.mxu0 }
  0xf3   : > { %v723_v48 = vadd.f32 %v722_v47, %v721_v44  ;;  %v744_v49 = vpop.f32.mrf.mxu1 }
  0xf4   : > { %v724_v50 = vpop.f32.mrf.mxu0  ;;  %v745_v52 = vadd.f32 %v744_v49, %v743_v45 }
  0xf5   : > { %v529_v51 = vadd.f32 %v723_v48, %v670_v46  ;;  %v746_v53 = vpop.f32.mrf.mxu1 }
  0xf6   : > { %v725_v54 = vpop.f32.mrf.mxu0 }
  0xf7   : > { %v569_v55 = vadd.f32 %v745_v52, %v529_v51  ;;  %v747_v56 = vpop.f32.mrf.mxu1 }
  0xf9   : > { %v574_v57 = vmax.f32 %v569_v55, 0.0 }
  0xfb   : > { %v575_v58 = vpack.c.bf16 %v574_v57, %v574_v57 }
  0xfd   : > { %577 = vst.msk [vmem:[%s188_s8] sm:$0x1] %vm576_vm0, %v575_v58 }
  0xfe PF: > { %s13_s16 = sadd.s32 1, %s860_s16   ;;  %s1049_s12 = smov %s852_s14 }
  0xff   : > { %p10_p7 = scmp.ge.s32.totalorder %s13_s16, 6   ;;  %s1050_s13 = smov %s856_s15 }
 0x100   : > { %s1051_s14 = smov %s1054_s17  ;;  %s1052_s15 = smov %s1058_s18 }
 0x101   :  { %12 = sbr.rel (!%p10_p7) target bundleno = 3 (0x3), region = 64 }

// kernel: fc_discriminator_forward.11
= control target key start
LH: loop header
LB: loop body
LE: loop exit
PB: predicated region body
PF: predicated region fallthrough
CT: control target
= control target key end

     0   :  { %s1305_s12 = smov 0   ;;  %s1307_s13 = smov 0   ;;  %s1552_s0 = inlined_call_operand.vmem [shape: bf16[2,2,2,256], index: 0, kind: input, shape index: {}]   ;;  %s1553_s1 = inlined_call_operand.vmem [shape: bf16[1024,128], index: 1, kind: input, shape index: {}]   ;;  %s1554_s2 = inlined_call_operand.vmem [shape: f32[1,128], index: 2, kind: input, shape index: {}]   ;;  %s1555_s3 = inlined_call_operand.vmem [shape: bf16[2,1,1,128], index: 3, kind: output, shape index: {}]  }
   0x1   :  { %s1309_s14 = smov 0  }
   0x2 LB: > { %s25_s15 = sadd.s32 1, %s1278_s13  ;;  %p1012_p0 = scmp.ge.s32.totalorder %s1282_s14, 1  ;;  %s1282_s14 = sphi %s1309_s14, %s13_s14   ;;  %s1278_s13 = sphi %s1307_s13, %s1557_s13   ;;  %s1274_s12 = sphi %s1305_s12, %s1556_s12  }
   0x3   : > { %p27_p1 = scmp.ge.s32.totalorder %s25_s15, 2  ;;  %p150_p2 = scmp.lt.s32.totalorder %s1282_s14, 3 }
   0x5   : > { %s1559_s15 = smov (%p27_p1, %s25_s15), 0  ;;  %p151_p3 = pnand %p1012_p0, %p150_p2 }
   0x6   : > { %p174_p4 = scmp.lt.s32.totalorder (!%p151_p3), %s1274_s12, 1 }
   0x7   : > { %154 = sbr.rel (%p151_p3) target bundleno = 283 (0x11b), region = 32 }
   0xc   : > { %v1196_v0 = vld [vmem:[%s1553_s1 + $0x78] sm:$0xff]   ;;  %v1200_v4 = vld [vmem:[%s1553_s1 + $0x70] sm:$0xff]   ;;  %v1204_v8 = vld [vmem:[%s1553_s1 + $0x68] sm:$0xff]   ;;  %s1561_s12 = smov (!%p174_p4, %s1274_s12), 1  ;;  %v204_v28 = vlaneseq  ;;  %v1284_v36 = vmov 1966171168  }
   0xd   : > { %v1197_v1 = vld [vmem:[%s1553_s1 + $0xf8] sm:$0xff]   ;;  %1083 = vmatprep.subr.bf16.mxu0 %v1196_v0  ;;  %v1201_v5 = vld [vmem:[%s1553_s1 + $0xf0] sm:$0xff]   ;;  %v1205_v9 = vld [vmem:[%s1553_s1 + $0xe8] sm:$0xff]   ;;  %s1013_s24 = sshll.u32 %s1561_s12, 2  ;;  %v202_v37 = vunpack.c.l.s4 %v1284_v36  ;;  %s183_s10 = scalar_lea.vmem %s1555_s3, %s1561_s12  ;;  %vm932_vm0 = vcmask 1040384  }
   0xe   : > { %v1198_v2 = vld [vmem:[%s1553_s1 + $0x38] sm:$0xff]   ;;  %1105 = vmatprep.subr.bf16.mxu1 %v1197_v1  ;;  %v1202_v6 = vld [vmem:[%s1553_s1 + $0x30] sm:$0xff]   ;;  %v1206_v10 = vld [vmem:[%s1553_s1 + $0x28] sm:$0xff]   ;;  %s177_s6 = scalar_lea.vmem %s1552_s0, %s1013_s24  ;;  %v205_v33 = vshrl.u32 %v204_v28, 7  ;;  %vm933_vm1 = vsmask.f32 256 }
   0xf   : > { %v1199_v3 = vld [vmem:[%s1553_s1 + $0xb8] sm:$0xff]   ;;  %1084 = vmatpush3.bf16.msra.mxu0 %v1198_v2  ;;  %v1203_v7 = vld [vmem:[%s1553_s1 + $0xb0] sm:$0xff]   ;;  %v1207_v11 = vld [vmem:[%s1553_s1 + $0xa8] sm:$0xff]   ;;  %v203_v40 = vunpack.c.0.s8 %v202_v37 }
  0x10   : > { %1106 = vmatpush3.bf16.msra.mxu1 %v1199_v3  ;;  %1085 = vmatprep.subr.bf16.mxu0 %v1200_v4  ;;  %v1208_v12 = vld [vmem:[%s1553_s1 + $0x60] sm:$0xff]   ;;  %v1212_v16 = vld [vmem:[%s1553_s1 + $0x58] sm:$0xff]   ;;  %v1216_v20 = vld [vmem:[%s1553_s1 + $0x50] sm:$0xff]  }
  0x11   : > { %1107 = vmatprep.subr.bf16.mxu1 %v1201_v5  ;;  %v1209_v13 = vld [vmem:[%s1553_s1 + $0xe0] sm:$0xff]   ;;  %v1213_v17 = vld [vmem:[%s1553_s1 + $0xd8] sm:$0xff]   ;;  %v1217_v21 = vld [vmem:[%s1553_s1 + $0xd0] sm:$0xff]   ;;  %v1439_v43 = vsub.s32 %v203_v40, %v205_v33 }
  0x12   : > { %v1210_v14 = vld [vmem:[%s1553_s1 + $0x20] sm:$0xff]   ;;  %v1214_v18 = vld [vmem:[%s1553_s1 + $0x18] sm:$0xff]   ;;  %v1218_v22 = vld [vmem:[%s1553_s1 + $0x10] sm:$0xff]  }
  0x13   : > { %1086 = vmatpush3.bf16.msra.mxu0 %v1202_v6  ;;  %v1211_v15 = vld [vmem:[%s1553_s1 + $0xa0] sm:$0xff]   ;;  %v1215_v19 = vld [vmem:[%s1553_s1 + $0x98] sm:$0xff]   ;;  %v1219_v23 = vld [vmem:[%s1553_s1 + $0x90] sm:$0xff]  }
  0x14   : > { %1108 = vmatpush3.bf16.msra.mxu1 %v1203_v7  ;;  %1087 = vmatprep.subr.bf16.mxu0 %v1204_v8  ;;  %v1220_v24 = vld [vmem:[%s1553_s1 + $0x48] sm:$0xff]   ;;  %v1224_v29 = vld [vmem:[%s1553_s1 + $0x40] sm:$0xff]   ;;  %v1228_v38 = vld [vmem:[%s1553_s1 + $0x178] sm:$0xff]  }
  0x15   : > { %1109 = vmatprep.subr.bf16.mxu1 %v1205_v9  ;;  %v1221_v25 = vld [vmem:[%s1553_s1 + $0xc8] sm:$0xff]   ;;  %v1225_v30 = vld [vmem:[%s1553_s1 + $0xc0] sm:$0xff]   ;;  %v1229_v41 = vld [vmem:[%s1553_s1 + $0x1f8] sm:$0xff]  }
  0x16   : > { %v1222_v26 = vld [vmem:[%s1553_s1 + $0x8] sm:$0xff]   ;;  %v1226_v31 = vld [vmem:[%s1553_s1] sm:$0xff]   ;;  %v1230_v46 = vld [vmem:[%s1553_s1 + $0x138] sm:$0xff]  }
  0x17   : > { %1088 = vmatpush3.bf16.msra.mxu0 %v1206_v10  ;;  %v1223_v27 = vld [vmem:[%s1553_s1 + $0x88] sm:$0xff]   ;;  %v1227_v32 = vld [vmem:[%s1553_s1 + $0x80] sm:$0xff]   ;;  %v1232_v48 = vld [vmem:[%s1553_s1 + $0x170] sm:$0xff]  }
  0x18   : > { %1110 = vmatpush3.bf16.msra.mxu1 %v1207_v11  ;;  %1089 = vmatprep.subr.bf16.mxu0 %v1208_v12  ;;  %v1015_v34 = vld.sshfl [vmem:[%s177_s6] sm:$0x11 pattern:$0x75316420]  ;;  %v1231_v51 = vld [vmem:[%s1553_s1 + $0x1b8] sm:$0xff]   ;;  %v1233_v52 = vld [vmem:[%s1553_s1 + $0x1f0] sm:$0xff]  }
  0x19   : > { %1111 = vmatprep.subr.bf16.mxu1 %v1209_v13  ;;  %v1429_v35 = vld.sshfl [vmem:[%s177_s6 + $0x2] sm:$0x11 pattern:$0x75316420]  ;;  %v200_v39 = vcombine.high %v1015_v34, %v1015_v34  ;;  %v207_v45 = vrot.slane %v1015_v34, %v1439_v43  ;;  %v1234_v53 = vld [vmem:[%s1553_s1 + $0x130] sm:$0xff]   ;;  %v1236_v55 = vld [vmem:[%s1553_s1 + $0x168] sm:$0xff]  }
  0x1a   : > { %v233_v42 = vcombine.high %v1429_v35, %v1429_v35  ;;  %v1235_v56 = vld [vmem:[%s1553_s1 + $0x1b0] sm:$0xff]   ;;  %v1237_v57 = vld [vmem:[%s1553_s1 + $0x1e8] sm:$0xff]   ;;  %v1240_v59 = vld [vmem:[%s1553_s1 + $0x160] sm:$0xff]  }
  0x1b   : > { %1090 = vmatpush3.bf16.msra.mxu0 %v1210_v14  ;;  %v214_v44 = vrot.slane %v200_v39, %v1439_v43  ;;  %v218_v50 = vshrl.u32 %v207_v45, 16  ;;  %v1238_v58 = vld [vmem:[%s1553_s1 + $0x128] sm:$0xff]   ;;  %v1241_v61 = vld [vmem:[%s1553_s1 + $0x1e0] sm:$0xff]   ;;  %v1244_v63 = vld [vmem:[%s1553_s1 + $0x158] sm:$0xff]  }
  0x1c   : > { %1112 = vmatpush3.bf16.msra.mxu1 %v1211_v15  ;;  %1091 = vmatprep.subr.bf16.mxu0 %v1212_v16  ;;  %v247_v47 = vrot.slane %v233_v42, %v1439_v43  ;;  %v1239_v60 = vld [vmem:[%s1553_s1 + $0x1a8] sm:$0xff]   ;;  %v1242_v62 = vld [vmem:[%s1553_s1 + $0x120] sm:$0xff]   ;;  %v1245_v1 = vld [vmem:[%s1553_s1 + $0x1d8] sm:$0xff]   ;;  %v240_v15 = vrot.slane %v1429_v35, %v1439_v43 }
  0x1d   : > { %1113 = vmatprep.subr.bf16.mxu1 %v1213_v17  ;;  %803 = vmatprep.mubr.bf16.mxu0 %v214_v44  ;;  %v221_v49 = vshrl.u32 %v214_v44, 16  ;;  %v1243_v0 = vld [vmem:[%s1553_s1 + $0x1a0] sm:$0xff]   ;;  %v1246_v2 = vld [vmem:[%s1553_s1 + $0x118] sm:$0xff]   ;;  %v1248_v3 = vld [vmem:[%s1553_s1 + $0x150] sm:$0xff]  }
  0x1e   : > { %v254_v54 = vshrl.u32 %v247_v47, 16  ;;  %v1247_v4 = vld [vmem:[%s1553_s1 + $0x198] sm:$0xff]   ;;  %v1249_v5 = vld [vmem:[%s1553_s1 + $0x1d0] sm:$0xff]   ;;  %v1252_v7 = vld [vmem:[%s1553_s1 + $0x148] sm:$0xff]   ;;  %v251_v17 = vshrl.u32 %v240_v15, 16 }
  0x1f   : > { %1092 = vmatpush3.bf16.msra.mxu0 %v1214_v18  ;;  %843 = vmatprep.mubr.bf16.mxu1 %v221_v49  ;;  %v1250_v6 = vld [vmem:[%s1553_s1 + $0x110] sm:$0xff]   ;;  %v1253_v9 = vld [vmem:[%s1553_s1 + $0x1c8] sm:$0xff]   ;;  %v1256_v11 = vld [vmem:[%s1553_s1 + $0x140] sm:$0xff]  }
  0x20   : > { %1114 = vmatpush3.bf16.msra.mxu1 %v1215_v19  ;;  %1093 = vmatprep.subr.bf16.mxu0 %v1216_v20  ;;  %v1251_v8 = vld [vmem:[%s1553_s1 + $0x190] sm:$0xff]   ;;  %v1254_v10 = vld [vmem:[%s1553_s1 + $0x108] sm:$0xff]   ;;  %v1257_v13 = vld [vmem:[%s1553_s1 + $0x1c0] sm:$0xff]  }
  0x21   : > { %1115 = vmatprep.subr.bf16.mxu1 %v1217_v21  ;;  %v1255_v12 = vld [vmem:[%s1553_s1 + $0x188] sm:$0xff]   ;;  %v1258_v14 = vld [vmem:[%s1553_s1 + $0x100] sm:$0xff]   ;;  %vm934_vm2 = vmand %vm932_vm0, %vm933_vm1 }
  0x22   : > { %v1259_v16 = vld [vmem:[%s1553_s1 + $0x180] sm:$0xff]  }
  0x23   : > { %1094 = vmatpush3.bf16.msra.mxu0 %v1218_v22  ;;  %v935_v42 = vld [vmem:[%s183_s10] sm:$0x1] }
  0x24   : > { %1116 = vmatpush3.bf16.msra.mxu1 %v1219_v23  ;;  %1095 = vmatprep.subr.bf16.mxu0 %v1220_v24 }
  0x25   : > { %1117 = vmatprep.subr.bf16.mxu1 %v1221_v25 }
  0x27   : > { %1096 = vmatpush3.bf16.msra.mxu0 %v1222_v26 }
  0x28   : > { %1118 = vmatpush3.bf16.msra.mxu1 %v1223_v27  ;;  %1097 = vmatprep.subr.bf16.mxu0 %v1224_v29  ;;  %v386_v27 = vld [vmem:[%s1554_s2] sm:$0x1] }
  0x29   : > { %1119 = vmatprep.subr.bf16.mxu1 %v1225_v30 }
  0x2b   : > { %1098 = vmatpush3.bf16.msra.mxu0 %v1226_v31 }
  0x2c   : > { %1120 = vmatpush3.bf16.msra.mxu1 %v1227_v32  ;;  %1127 = vmatprep.subr.bf16.mxu0 %v1228_v38 }
  0x2d   : > { %1149 = vmatprep.subr.bf16.mxu1 %v1229_v41 }
  0x2e   : > { %804 = vmatmul.mubr.bf16.vlgmr.msra.gmra.mxu0 %v207_v45 }
  0x2f   : > { %1128 = vmatpush3.bf16.msra.mxu0 %v1230_v46  ;;  %844 = vmatmul.mubr.bf16.vlgmr.msra.gmra.mxu1 %v218_v50 }
  0x30   : > { %1129 = vmatprep.subr.bf16.mxu0 %v1232_v48  ;;  %1150 = vmatpush3.bf16.msra.mxu1 %v1231_v51 }
  0x31   : > { %883 = vmatprep.mubr.bf16.mxu0 %v247_v47  ;;  %1151 = vmatprep.subr.bf16.mxu1 %v1233_v52 }
  0x32   : > { %923 = vmatprep.mubr.bf16.mxu1 %v254_v54 }
  0x33   : > { %1130 = vmatpush3.bf16.msra.mxu0 %v1234_v53 }
  0x34   : > { %1131 = vmatprep.subr.bf16.mxu0 %v1236_v55  ;;  %1152 = vmatpush3.bf16.msra.mxu1 %v1235_v56 }
  0x35   : > { %1153 = vmatprep.subr.bf16.mxu1 %v1237_v57 }
  0x37   : > { %1132 = vmatpush3.bf16.msra.mxu0 %v1238_v58 }
  0x38   : > { %1133 = vmatprep.subr.bf16.mxu0 %v1240_v59  ;;  %1154 = vmatpush3.bf16.msra.mxu1 %v1239_v60 }
  0x39   : > { %1155 = vmatprep.subr.bf16.mxu1 %v1241_v61 }
  0x3b   : > { %1134 = vmatpush3.bf16.msra.mxu0 %v1242_v62 }
  0x3c   : > { %1135 = vmatprep.subr.bf16.mxu0 %v1244_v63  ;;  %1156 = vmatpush3.bf16.msra.mxu1 %v1243_v0 }
  0x3d   : > { %1157 = vmatprep.subr.bf16.mxu1 %v1245_v1 }
  0x3f   : > { %1136 = vmatpush3.bf16.msra.mxu0 %v1246_v2 }
  0x40   : > { %1137 = vmatprep.subr.bf16.mxu0 %v1248_v3  ;;  %1158 = vmatpush3.bf16.msra.mxu1 %v1247_v4 }
  0x41   : > { %1159 = vmatprep.subr.bf16.mxu1 %v1249_v5 }
  0x43   : > { %1138 = vmatpush3.bf16.msra.mxu0 %v1250_v6 }
  0x44   : > { %1139 = vmatprep.subr.bf16.mxu0 %v1252_v7  ;;  %1160 = vmatpush3.bf16.msra.mxu1 %v1251_v8 }
  0x45   : > { %1161 = vmatprep.subr.bf16.mxu1 %v1253_v9 }
  0x47   : > { %1140 = vmatpush3.bf16.msra.mxu0 %v1254_v10 }
  0x48   : > { %1141 = vmatprep.subr.bf16.mxu0 %v1256_v11  ;;  %1162 = vmatpush3.bf16.msra.mxu1 %v1255_v12 }
  0x49   : > { %1163 = vmatprep.subr.bf16.mxu1 %v1257_v13 }
  0x4b   : > { %1142 = vmatpush3.bf16.msra.mxu0 %v1258_v14 }
  0x4c   : > { %1164 = vmatpush3.bf16.msra.mxu1 %v1259_v16 }
  0x4e   : > { %884 = vmatmul.mubr.bf16.vlgmr.msra.gmra.mxu0 %v240_v15 }
  0x4f   : > { %924 = vmatmul.mubr.bf16.vlgmr.msra.gmra.mxu1 %v251_v17 }
  0xee   : > { %v1099_v18 = vpop.f32.mrf.mxu0 }
  0xef   : > { %v1121_v19 = vpop.f32.mrf.mxu1 }
  0xf0   : > { %v1100_v20 = vpop.f32.mrf.mxu0 }
  0xf1   : > { %v1122_v21 = vpop.f32.mrf.mxu1  ;;  %v1101_v26 = vadd.f32 %v1100_v20, %v1099_v18 }
  0xf2   : > { %v1102_v22 = vpop.f32.mrf.mxu0  ;;  %v1123_v29 = vadd.f32 %v1122_v21, %v1121_v19 }
  0xf3   : > { %v1124_v23 = vpop.f32.mrf.mxu1  ;;  %v806_v28 = vadd.f32 %v1101_v26, %v386_v27 }
  0xf4   : > { %v1103_v24 = vpop.f32.mrf.mxu0 }
  0xf5   : > { %v1125_v25 = vpop.f32.mrf.mxu1  ;;  %v846_v33 = vadd.f32 %v1123_v29, %v806_v28 }
 0x10e   : > { %v1143_v30 = vpop.f32.mrf.mxu0 }
 0x10f   : > { %v1165_v31 = vpop.f32.mrf.mxu1 }
 0x110   : > { %v1144_v32 = vpop.f32.mrf.mxu0 }
 0x111   : > { %v1145_v34 = vadd.f32 %v1144_v32, %v1143_v30  ;;  %v1166_v35 = vpop.f32.mrf.mxu1 }
 0x112   : > { %v1146_v36 = vpop.f32.mrf.mxu0  ;;  %v1167_v38 = vadd.f32 %v1166_v35, %v1165_v31 }
 0x113   : > { %v886_v37 = vadd.f32 %v1145_v34, %v846_v33  ;;  %v1168_v39 = vpop.f32.mrf.mxu1 }
 0x114   : > { %v1147_v40 = vpop.f32.mrf.mxu0 }
 0x115   : > { %v926_v41 = vadd.f32 %v1167_v38, %v886_v37  ;;  %v1169_v43 = vpop.f32.mrf.mxu1 }
 0x117   : > { %v931_v44 = vpack.c.bf16 %v926_v41, %v926_v41 }
 0x119   : > { %v936_v45 = vsel %vm934_vm2, %v931_v44, %v935_v42 }
 0x11a   : > { %937 = vst [vmem:[%s183_s10] sm:$0x1] %v936_v45 }
 0x11b PF: > { %s13_s14 = sadd.s32 1, %s1282_s14   ;;  %s1556_s12 = smov %s1278_s13 }
 0x11c   : > { %p10_p5 = scmp.ge.s32.totalorder %s13_s14, 4   ;;  %s1557_s13 = smov %s1559_s15 }
 0x11e   :  { %12 = sbr.rel (!%p10_p5) target bundleno = 2 (0x2), region = 64 }

// kernel: fc_discriminator_forward.12
= control target key start
LH: loop header
LB: loop body
LE: loop exit
PB: predicated region body
PF: predicated region fallthrough
CT: control target
= control target key end

     0   :  { %s2479_s12 = smov 0   ;;  %s2481_s13 = smov 0   ;;  %s2951_s0 = inlined_call_operand.vmem [shape: bf16[2,3,3,128], index: 0, kind: input, shape index: {}]   ;;  %s2952_s1 = inlined_call_operand.vmem [shape: bf16[4,512,64], index: 1, kind: input, shape index: {}]   ;;  %s2953_s2 = inlined_call_operand.vmem [shape: f32[1,64], index: 2, kind: input, shape index: {}]   ;;  %s2954_s3 = inlined_call_operand.vmem [shape: bf16[2,1,2,1,128], index: 3, kind: output, shape index: {}]  }
   0x1   :  { %s2483_s14 = smov 0  }
   0x2 LB: > { %s25_s15 = sadd.s32 1, %s2451_s13  ;;  %p1765_p0 = scmp.ge.s32.totalorder %s2455_s14, 1  ;;  %s2455_s14 = sphi %s2483_s14, %s13_s14   ;;  %s2451_s13 = sphi %s2481_s13, %s2956_s13   ;;  %s2447_s12 = sphi %s2479_s12, %s2955_s12  }
   0x3   : > { %p27_p1 = scmp.ge.s32.totalorder %s25_s15, 2  ;;  %p151_p2 = scmp.lt.s32.totalorder %s2455_s14, 3 }
   0x5   : > { %s2958_s15 = smov (%p27_p1, %s25_s15), 0  ;;  %p152_p3 = pnand %p1765_p0, %p151_p2 }
   0x6   : > { %p178_p4 = scmp.lt.s32.totalorder (!%p152_p3), %s2447_s12, 1  ;;  %s2458_s5 = smov (!%p152_p3), 64  }
   0x7   : > { %155 = sbr.rel (%p152_p3) target bundleno = 469 (0x1d5), region = 32 }
   0xc   : > { %v2305_v0 = vld [vmem:[%s2952_s1 + $0x78] sm:$0xff]   ;;  %v2309_v4 = vld [vmem:[%s2952_s1 + $0x70] sm:$0xff]   ;;  %v2313_v8 = vld [vmem:[%s2952_s1 + $0x68] sm:$0xff]   ;;  %s2960_s12 = smov (!%p178_p4, %s2447_s12), 1  ;;  %v203_v30 = vlaneseq  ;;  %v2457_v33 = vmov 1983009808  }
   0xd   : > { %v2306_v1 = vld [vmem:[%s2952_s1 + $0xf8] sm:$0xff]   ;;  %2097 = vmatprep.subr.bf16.mxu0 %v2305_v0  ;;  %v2310_v5 = vld [vmem:[%s2952_s1 + $0xf0] sm:$0xff]   ;;  %v2314_v9 = vld [vmem:[%s2952_s1 + $0xe8] sm:$0xff]   ;;  %s2273_s28 = smul.u32 6, %s2960_s12  ;;  %v201_v34 = vunpack.c.l.s4 %v2457_v33  ;;  %s1767_s6 = sshll.u32 %s2960_s12, 1  ;;  %vm945_vm0 = vcmask 523264  }
   0xe   : > { %v2307_v2 = vld [vmem:[%s2952_s1 + $0x38] sm:$0xff]   ;;  %2119 = vmatprep.subr.bf16.mxu1 %v2306_v1  ;;  %v2311_v6 = vld [vmem:[%s2952_s1 + $0x30] sm:$0xff]   ;;  %v2315_v10 = vld [vmem:[%s2952_s1 + $0x28] sm:$0xff]   ;;  %v204_v35 = vshrl.u32 %v203_v30, 7  ;;  %s190_s9 = scalar_lea.vmem %s2954_s3, %s1767_s6  ;;  %vm1667_vm1 = vcmask 1040384  }
   0xf   : > { %v2308_v3 = vld [vmem:[%s2952_s1 + $0xb8] sm:$0xff]   ;;  %2098 = vmatpush3.bf16.msra.mxu0 %v2307_v2  ;;  %v2312_v7 = vld [vmem:[%s2952_s1 + $0xb0] sm:$0xff]   ;;  %v2316_v11 = vld [vmem:[%s2952_s1 + $0xa8] sm:$0xff]   ;;  %s2603_s10 = scalar_lea.vmem %s2951_s0, %s2273_s28  ;;  %v202_v39 = vunpack.c.0.s8 %v201_v34  ;;  %vm1668_vm2 = vsmask.f32 256 }
  0x10   : > { %2120 = vmatpush3.bf16.msra.mxu1 %v2308_v3  ;;  %2099 = vmatprep.subr.bf16.mxu0 %v2309_v4  ;;  %v2317_v12 = vld [vmem:[%s2952_s1 + $0x60] sm:$0xff]   ;;  %v2321_v16 = vld [vmem:[%s2952_s1 + $0x58] sm:$0xff]   ;;  %v2325_v20 = vld [vmem:[%s2952_s1 + $0x50] sm:$0xff]  }
  0x11   : > { %2121 = vmatprep.subr.bf16.mxu1 %v2310_v5  ;;  %v2318_v13 = vld [vmem:[%s2952_s1 + $0xe0] sm:$0xff]   ;;  %v2322_v17 = vld [vmem:[%s2952_s1 + $0xd8] sm:$0xff]   ;;  %v2326_v21 = vld [vmem:[%s2952_s1 + $0xd0] sm:$0xff]   ;;  %v2617_v41 = vsub.s32 %v202_v39, %v204_v35 }
  0x12   : > { %v2319_v14 = vld [vmem:[%s2952_s1 + $0x20] sm:$0xff]   ;;  %v2323_v18 = vld [vmem:[%s2952_s1 + $0x18] sm:$0xff]   ;;  %v2327_v22 = vld [vmem:[%s2952_s1 + $0x10] sm:$0xff]  }
  0x13   : > { %2100 = vmatpush3.bf16.msra.mxu0 %v2311_v6  ;;  %v2320_v15 = vld [vmem:[%s2952_s1 + $0xa0] sm:$0xff]   ;;  %v2324_v19 = vld [vmem:[%s2952_s1 + $0x98] sm:$0xff]   ;;  %v2328_v23 = vld [vmem:[%s2952_s1 + $0x90] sm:$0xff]  }
  0x14   : > { %2122 = vmatpush3.bf16.msra.mxu1 %v2312_v7  ;;  %2101 = vmatprep.subr.bf16.mxu0 %v2313_v8  ;;  %v2329_v24 = vld [vmem:[%s2952_s1 + $0x48] sm:$0xff]   ;;  %v2333_v28 = vld [vmem:[%s2952_s1 + $0x40] sm:$0xff]   ;;  %v2337_v36 = vld [vmem:[%s2952_s1 + $0x178] sm:$0xff]  }
  0x15   : > { %2123 = vmatprep.subr.bf16.mxu1 %v2314_v9  ;;  %v2330_v25 = vld [vmem:[%s2952_s1 + $0xc8] sm:$0xff]   ;;  %v2334_v29 = vld [vmem:[%s2952_s1 + $0xc0] sm:$0xff]   ;;  %v2338_v37 = vld [vmem:[%s2952_s1 + $0x1f8] sm:$0xff]  }
  0x16   : > { %v2331_v26 = vld [vmem:[%s2952_s1 + $0x8] sm:$0xff]   ;;  %v2335_v31 = vld [vmem:[%s2952_s1] sm:$0xff]   ;;  %v2339_v44 = vld [vmem:[%s2952_s1 + $0x138] sm:$0xff]  }
  0x17   : > { %2102 = vmatpush3.bf16.msra.mxu0 %v2315_v10  ;;  %v2332_v27 = vld [vmem:[%s2952_s1 + $0x88] sm:$0xff]   ;;  %v2336_v32 = vld [vmem:[%s2952_s1 + $0x80] sm:$0xff]   ;;  %v2340_v45 = vld [vmem:[%s2952_s1 + $0x1b8] sm:$0xff]  }
  0x18   : > { %2124 = vmatpush3.bf16.msra.mxu1 %v2316_v11  ;;  %2103 = vmatprep.subr.bf16.mxu0 %v2317_v12  ;;  %v2612_v38 = vld [vmem:[%s2603_s10] sm:$0x1]  ;;  %v2615_v40 = vld [vmem:[%s2603_s10 + $0x2] sm:$0x1]  ;;  %v2341_v46 = vld [vmem:[%s2952_s1 + $0x170] sm:$0xff]  }
  0x19   : > { %2125 = vmatprep.subr.bf16.mxu1 %v2318_v13  ;;  %v206_v42 = vrot.slane %v2612_v38, %v2617_v41  ;;  %v218_v43 = vrot.slane %v2615_v40, %v2617_v41  ;;  %v2342_v49 = vld [vmem:[%s2952_s1 + $0x1f0] sm:$0xff]   ;;  %v2345_v52 = vld [vmem:[%s2952_s1 + $0x168] sm:$0xff]   ;;  %v2349_v56 = vld [vmem:[%s2952_s1 + $0x160] sm:$0xff]   ;;  %v653_v6 = vshrl.u32 %v2612_v38, 16  ;;  %v659_v8 = vshrl.u32 %v2615_v40, 16 }
  0x1a   : > { %v2343_v50 = vld [vmem:[%s2952_s1 + $0x130] sm:$0xff]   ;;  %v2346_v53 = vld [vmem:[%s2952_s1 + $0x1e8] sm:$0xff]   ;;  %v2350_v57 = vld [vmem:[%s2952_s1 + $0x1e0] sm:$0xff]  }
  0x1b   : > { %2104 = vmatpush3.bf16.msra.mxu0 %v2319_v14  ;;  %v208_v47 = vshrl.u32 %v206_v42, 16  ;;  %v2632_v48 = vshrl.u32 %v218_v43, 16  ;;  %v2344_v51 = vld [vmem:[%s2952_s1 + $0x1b0] sm:$0xff]   ;;  %v2347_v54 = vld [vmem:[%s2952_s1 + $0x128] sm:$0xff]   ;;  %v2351_v58 = vld [vmem:[%s2952_s1 + $0x120] sm:$0xff]  }
  0x1c   : > { %2126 = vmatpush3.bf16.msra.mxu1 %v2320_v15  ;;  %2105 = vmatprep.subr.bf16.mxu0 %v2321_v16  ;;  %v2348_v55 = vld [vmem:[%s2952_s1 + $0x1a8] sm:$0xff]   ;;  %v2352_v59 = vld [vmem:[%s2952_s1 + $0x1a0] sm:$0xff]   ;;  %v2353_v60 = vld [vmem:[%s2952_s1 + $0x158] sm:$0xff]  }
  0x1d   : > { %2127 = vmatprep.subr.bf16.mxu1 %v2322_v17  ;;  %512 = vmatprep.mubr.bf16.mxu0 %v208_v47  ;;  %v2354_v61 = vld [vmem:[%s2952_s1 + $0x1d8] sm:$0xff]   ;;  %v2357_v0 = vld [vmem:[%s2952_s1 + $0x150] sm:$0xff]   ;;  %v2361_v4 = vld [vmem:[%s2952_s1 + $0x148] sm:$0xff]  }
  0x1e   : > { %552 = vmatprep.mubr.bf16.mxu1 %v2632_v48  ;;  %v2355_v62 = vld [vmem:[%s2952_s1 + $0x118] sm:$0xff]   ;;  %v2358_v1 = vld [vmem:[%s2952_s1 + $0x1d0] sm:$0xff]   ;;  %v2362_v5 = vld [vmem:[%s2952_s1 + $0x1c8] sm:$0xff]  }
  0x1f   : > { %2106 = vmatpush3.bf16.msra.mxu0 %v2323_v18  ;;  %v2356_v63 = vld [vmem:[%s2952_s1 + $0x198] sm:$0xff]   ;;  %v2359_v2 = vld [vmem:[%s2952_s1 + $0x110] sm:$0xff]   ;;  %v2363_v7 = vld [vmem:[%s2952_s1 + $0x108] sm:$0xff]  }
  0x20   : > { %2128 = vmatpush3.bf16.msra.mxu1 %v2324_v19  ;;  %2107 = vmatprep.subr.bf16.mxu0 %v2325_v20  ;;  %v2360_v3 = vld [vmem:[%s2952_s1 + $0x190] sm:$0xff]   ;;  %v2364_v9 = vld [vmem:[%s2952_s1 + $0x188] sm:$0xff]   ;;  %v2365_v10 = vld [vmem:[%s2952_s1 + $0x140] sm:$0xff]  }
  0x21   : > { %2129 = vmatprep.subr.bf16.mxu1 %v2326_v21  ;;  %v1802_v11 = vld.sshfl [vmem:[%s2603_s10] sm:$0x2 pattern:$0x76325410]  ;;  %v2369_v20 = vld [vmem:[%s2952_s1 + $0x278] sm:$0xff]   ;;  %v2377_v30 = vld [vmem:[%s2952_s1 + $0x268] sm:$0xff]  }
  0x22   : > { %v2366_v12 = vld [vmem:[%s2952_s1 + $0x1c0] sm:$0xff]   ;;  %v572_v13 = vshll.u32 %v1802_v11, 16  ;;  %v2380_v33 = vld [vmem:[%s2952_s1 + $0x2a8] sm:$0xff]   ;;  %v2386_v39 = vld [vmem:[%s2952_s1 + $0x2d8] sm:$0xff]  }
  0x23   : > { %2108 = vmatpush3.bf16.msra.mxu0 %v2327_v22  ;;  %v1803_v14 = vld.sshfl [vmem:[%s2603_s10 + $0x2] sm:$0x2 pattern:$0x76325410]  ;;  %v2370_v22 = vld [vmem:[%s2952_s1 + $0x2f8] sm:$0xff]   ;;  %v2392_v47 = vld [vmem:[%s2952_s1 + $0x290] sm:$0xff]  }
  0x24   : > { %2130 = vmatpush3.bf16.msra.mxu1 %v2328_v23  ;;  %2109 = vmatprep.subr.bf16.mxu0 %v2329_v24  ;;  %v2367_v15 = vld [vmem:[%s2952_s1 + $0x100] sm:$0xff]   ;;  %v584_v16 = vshll.u32 %v1803_v14, 16  ;;  %v574_v18 = vrot.slane %v572_v13, 1  ;;  %v2371_v24 = vld [vmem:[%s2952_s1 + $0x238] sm:$0xff]   ;;  %vm1669_vm3 = vmand %vm1667_vm1, %vm1668_vm2 }
  0x25   : > { %2131 = vmatprep.subr.bf16.mxu1 %v2330_v25  ;;  %v2368_v17 = vld [vmem:[%s2952_s1 + $0x180] sm:$0xff]   ;;  %v2372_v25 = vld [vmem:[%s2952_s1 + $0x2b8] sm:$0xff]  }
  0x26   : > { %v2722_v19 = vrot.slane %v584_v16, 1  ;;  %v656_v21 = vshrl.u32 %v574_v18, 16  ;;  %v2381_v34 = vld [vmem:[%s2952_s1 + $0x260] sm:$0xff]   ;;  %v2387_v42 = vld [vmem:[%s2952_s1 + $0x218] sm:$0xff]   ;;  %v2422_v16 = vld [vmem:[%s2952_s1 + $0x3d0] sm:$0xff]  }
  0x27   : > { %2110 = vmatpush3.bf16.msra.mxu0 %v2331_v26  ;;  %v2373_v26 = vld [vmem:[%s2952_s1 + $0x270] sm:$0xff]   ;;  %v2382_v35 = vld [vmem:[%s2952_s1 + $0x2e0] sm:$0xff]   ;;  %v2388_v43 = vld [vmem:[%s2952_s1 + $0x298] sm:$0xff]  }
  0x28   : > { %2132 = vmatpush3.bf16.msra.mxu1 %v2332_v27  ;;  %2111 = vmatprep.subr.bf16.mxu0 %v2333_v28  ;;  %v662_v23 = vshrl.u32 %v2722_v19, 16  ;;  %v2374_v27 = vld [vmem:[%s2952_s1 + $0x2f0] sm:$0xff]   ;;  %v2417_v11 = vld [vmem:[%s2952_s1 + $0x358] sm:$0xff]   ;;  %v2425_v19 = vld [vmem:[%s2952_s1 + $0x348] sm:$0xff]  }
  0x29   : > { %2133 = vmatprep.subr.bf16.mxu1 %v2334_v29  ;;  %v2375_v28 = vld [vmem:[%s2952_s1 + $0x230] sm:$0xff]   ;;  %v2419_v13 = vld [vmem:[%s2952_s1 + $0x318] sm:$0xff]  }
  0x2a   : > { %v2376_v29 = vld [vmem:[%s2952_s1 + $0x2b0] sm:$0xff]   ;;  %v2420_v14 = vld [vmem:[%s2952_s1 + $0x398] sm:$0xff]  }
  0x2b   : > { %2112 = vmatpush3.bf16.msra.mxu0 %v2335_v31  ;;  %v2378_v31 = vld [vmem:[%s2952_s1 + $0x2e8] sm:$0xff]   ;;  %v2424_v18 = vld [vmem:[%s2952_s1 + $0x390] sm:$0xff]  }
  0x2c   : > { %2134 = vmatpush3.bf16.msra.mxu1 %v2336_v32  ;;  %2141 = vmatprep.subr.bf16.mxu0 %v2337_v36  ;;  %v2379_v32 = vld [vmem:[%s2952_s1 + $0x228] sm:$0xff]   ;;  %v2383_v36 = vld [vmem:[%s2952_s1 + $0x220] sm:$0xff]  }
  0x2d   : > { %2163 = vmatprep.subr.bf16.mxu1 %v2338_v37  ;;  %v2384_v37 = vld [vmem:[%s2952_s1 + $0x2a0] sm:$0xff]  }
  0x2e   : > { %513 = vmatmul.mubr.bf16.vlgmr.msra.gmra.mxu0 %v2612_v38  ;;  %v2385_v38 = vld [vmem:[%s2952_s1 + $0x258] sm:$0xff]  }
  0x2f   : > { %553 = vmatmul.mubr.bf16.vlgmr.msra.gmra.mxu1 %v2615_v40  ;;  %2142 = vmatpush3.bf16.msra.mxu0 %v2339_v44  ;;  %v2389_v44 = vld [vmem:[%s2952_s1 + $0x250] sm:$0xff]  }
  0x30   : > { %2164 = vmatpush3.bf16.msra.mxu1 %v2340_v45  ;;  %2143 = vmatprep.subr.bf16.mxu0 %v2341_v46  ;;  %v2390_v45 = vld [vmem:[%s2952_s1 + $0x2d0] sm:$0xff]  }
  0x31   : > { %2165 = vmatprep.subr.bf16.mxu1 %v2342_v49  ;;  %892 = vmatprep.mubr.bf16.mxu0 %v656_v21  ;;  %v2391_v46 = vld [vmem:[%s2952_s1 + $0x210] sm:$0xff]   ;;  %v2394_v49 = vld [vmem:[%s2952_s1 + $0x2c8] sm:$0xff]  }
  0x32   : > { %932 = vmatprep.mubr.bf16.mxu1 %v662_v23  ;;  %v2427_v21 = vld [vmem:[%s2952_s1 + $0x308] sm:$0xff]  }
  0x33   : > { %2144 = vmatpush3.bf16.msra.mxu0 %v2343_v50  ;;  %v2395_v50 = vld [vmem:[%s2952_s1 + $0x208] sm:$0xff]  }
  0x34   : > { %2166 = vmatpush3.bf16.msra.mxu1 %v2344_v51  ;;  %2145 = vmatprep.subr.bf16.mxu0 %v2345_v52  ;;  %v2396_v51 = vld [vmem:[%s2952_s1 + $0x288] sm:$0xff]   ;;  %v2397_v52 = vld [vmem:[%s2952_s1 + $0x240] sm:$0xff]  }
  0x35   : > { %2167 = vmatprep.subr.bf16.mxu1 %v2346_v53  ;;  %v2398_v53 = vld [vmem:[%s2952_s1 + $0x2c0] sm:$0xff]  }
  0x37   : > { %2146 = vmatpush3.bf16.msra.mxu0 %v2347_v54  ;;  %v2821_v54 = vld [vmem:[%s2603_s10 + $0x4] sm:$0x1] }
  0x38   : > { %2168 = vmatpush3.bf16.msra.mxu1 %v2348_v55  ;;  %2147 = vmatprep.subr.bf16.mxu0 %v2349_v56  ;;  %v2399_v55 = vld [vmem:[%s2952_s1 + $0x200] sm:$0xff]   ;;  %v958_v56 = vrot.slane %v2821_v54, %v2617_v41  ;;  %v2403_v41 = vld [vmem:[%s2952_s1 + $0x338] sm:$0xff]  }
  0x39   : > { %2169 = vmatprep.subr.bf16.mxu1 %v2350_v57  ;;  %v2400_v57 = vld [vmem:[%s2952_s1 + $0x280] sm:$0xff]  }
  0x3b   : > { %2148 = vmatpush3.bf16.msra.mxu0 %v2351_v58  ;;  %v960_v58 = vshrl.u32 %v958_v56, 16 }
  0x3c   : > { %2170 = vmatpush3.bf16.msra.mxu1 %v2352_v59  ;;  %2149 = vmatprep.subr.bf16.mxu0 %v2353_v60  ;;  %v2401_v59 = vld [vmem:[%s2952_s1 + $0x378] sm:$0xff]  }
  0x3d   : > { %2171 = vmatprep.subr.bf16.mxu1 %v2354_v61  ;;  %v2402_v60 = vld [vmem:[%s2952_s1 + $0x3f8] sm:$0xff]  }
  0x3e   : > { %v2404_v61 = vld [vmem:[%s2952_s1 + $0x3b8] sm:$0xff]  }
  0x3f   : > { %2150 = vmatpush3.bf16.msra.mxu0 %v2355_v62  ;;  %v2405_v62 = vld [vmem:[%s2952_s1 + $0x370] sm:$0xff]  }
  0x40   : > { %2172 = vmatpush3.bf16.msra.mxu1 %v2356_v63  ;;  %2151 = vmatprep.subr.bf16.mxu0 %v2357_v0  ;;  %v2406_v63 = vld [vmem:[%s2952_s1 + $0x3f0] sm:$0xff]  }
  0x41   : > { %2173 = vmatprep.subr.bf16.mxu1 %v2358_v1  ;;  %v2407_v0 = vld [vmem:[%s2952_s1 + $0x330] sm:$0xff]  }
  0x42   : > { %v2408_v1 = vld [vmem:[%s2952_s1 + $0x3b0] sm:$0xff]  }
  0x43   : > { %2152 = vmatpush3.bf16.msra.mxu0 %v2359_v2  ;;  %v2409_v2 = vld [vmem:[%s2952_s1 + $0x368] sm:$0xff]  }
  0x44   : > { %2174 = vmatpush3.bf16.msra.mxu1 %v2360_v3  ;;  %2153 = vmatprep.subr.bf16.mxu0 %v2361_v4  ;;  %v2410_v3 = vld [vmem:[%s2952_s1 + $0x3e8] sm:$0xff]  }
  0x45   : > { %2175 = vmatprep.subr.bf16.mxu1 %v2362_v5  ;;  %v2411_v4 = vld [vmem:[%s2952_s1 + $0x328] sm:$0xff]  }
  0x46   : > { %v2412_v5 = vld [vmem:[%s2952_s1 + $0x3a8] sm:$0xff]  }
  0x47   : > { %2154 = vmatpush3.bf16.msra.mxu0 %v2363_v7  ;;  %v2414_v7 = vld [vmem:[%s2952_s1 + $0x3e0] sm:$0xff]  }
  0x48   : > { %2176 = vmatpush3.bf16.msra.mxu1 %v2364_v9  ;;  %2155 = vmatprep.subr.bf16.mxu0 %v2365_v10  ;;  %v2415_v9 = vld [vmem:[%s2952_s1 + $0x320] sm:$0xff]  }
  0x49   : > { %2177 = vmatprep.subr.bf16.mxu1 %v2366_v12  ;;  %v2416_v10 = vld [vmem:[%s2952_s1 + $0x3a0] sm:$0xff]   ;;  %v2418_v12 = vld [vmem:[%s2952_s1 + $0x3d8] sm:$0xff]  }
  0x4b   : > { %2156 = vmatpush3.bf16.msra.mxu0 %v2367_v15  ;;  %v2421_v15 = vld [vmem:[%s2952_s1 + $0x350] sm:$0xff]  }
  0x4c   : > { %2178 = vmatpush3.bf16.msra.mxu1 %v2368_v17  ;;  %2185 = vmatprep.subr.bf16.mxu0 %v2369_v20  ;;  %v2423_v17 = vld [vmem:[%s2952_s1 + $0x310] sm:$0xff]   ;;  %v2426_v20 = vld [vmem:[%s2952_s1 + $0x3c8] sm:$0xff]  }
  0x4d   : > { %2207 = vmatprep.subr.bf16.mxu1 %v2370_v22  ;;  %v2428_v22 = vld [vmem:[%s2952_s1 + $0x388] sm:$0xff]  }
  0x4e   : > { %893 = vmatmul.mubr.bf16.vlgmr.msra.gmra.mxu0 %v653_v6  ;;  %v2413_v6 = vld [vmem:[%s2952_s1 + $0x360] sm:$0xff]  }
  0x4f   : > { %933 = vmatmul.mubr.bf16.vlgmr.msra.gmra.mxu1 %v659_v8  ;;  %2186 = vmatpush3.bf16.msra.mxu0 %v2371_v24  ;;  %v2430_v24 = vld [vmem:[%s2952_s1 + $0x3c0] sm:$0xff]  }
  0x50   : > { %2208 = vmatpush3.bf16.msra.mxu1 %v2372_v25  ;;  %2187 = vmatprep.subr.bf16.mxu0 %v2373_v26  ;;  %v1998_v25 = vld.sshfl [vmem:[%s2603_s10 + $0x4] sm:$0x2 pattern:$0x76325410] }
  0x51   : > { %2209 = vmatprep.subr.bf16.mxu1 %v2374_v27  ;;  %1252 = vmatprep.mubr.bf16.mxu0 %v2632_v48  ;;  %v2393_v48 = vld [vmem:[%s2952_s1 + $0x248] sm:$0xff]   ;;  %v1311_v26 = vshll.u32 %v1998_v25, 16  ;;  %v2431_v27 = vld [vmem:[%s2952_s1 + $0x300] sm:$0xff]  }
  0x52   : > { %1292 = vmatprep.mubr.bf16.mxu1 %v960_v58  ;;  %v1670_v25 = vld [vmem:[%s190_s9] sm:$0x1] }
  0x53   : > { %2188 = vmatpush3.bf16.msra.mxu0 %v2375_v28  ;;  %v2432_v28 = vld [vmem:[%s2952_s1 + $0x380] sm:$0xff]  }
  0x54   : > { %2210 = vmatpush3.bf16.msra.mxu1 %v2376_v29  ;;  %2189 = vmatprep.subr.bf16.mxu0 %v2377_v30  ;;  %v1313_v29 = vrot.slane %v1311_v26, 1  ;;  %v1673_v26 = vld [vmem:[%s190_s9 + $0x1] sm:$0x1] }
  0x55   : > { %2211 = vmatprep.subr.bf16.mxu1 %v2378_v31  ;;  %v1380_v31 = vshrl.u32 %v2821_v54, 16 }
  0x56   : > { %v1383_v30 = vshrl.u32 %v1313_v29, 16 }
  0x57   : > { %2190 = vmatpush3.bf16.msra.mxu0 %v2379_v32 }
  0x58   : > { %2212 = vmatpush3.bf16.msra.mxu1 %v2380_v33  ;;  %2191 = vmatprep.subr.bf16.mxu0 %v2381_v34  ;;  %v287_v34 = vld [vmem:[%s2953_s2] sm:$0x1] }
  0x59   : > { %2213 = vmatprep.subr.bf16.mxu1 %v2382_v35 }
  0x5b   : > { %2192 = vmatpush3.bf16.msra.mxu0 %v2383_v36 }
  0x5c   : > { %2214 = vmatpush3.bf16.msra.mxu1 %v2384_v37  ;;  %2193 = vmatprep.subr.bf16.mxu0 %v2385_v38 }
  0x5d   : > { %2215 = vmatprep.subr.bf16.mxu1 %v2386_v39 }
  0x5f   : > { %2194 = vmatpush3.bf16.msra.mxu0 %v2387_v42 }
  0x60   : > { %2216 = vmatpush3.bf16.msra.mxu1 %v2388_v43  ;;  %2195 = vmatprep.subr.bf16.mxu0 %v2389_v44 }
  0x61   : > { %2217 = vmatprep.subr.bf16.mxu1 %v2390_v45 }
  0x63   : > { %2196 = vmatpush3.bf16.msra.mxu0 %v2391_v46 }
  0x64   : > { %2218 = vmatpush3.bf16.msra.mxu1 %v2392_v47  ;;  %2197 = vmatprep.subr.bf16.mxu0 %v2393_v48 }
  0x65   : > { %2219 = vmatprep.subr.bf16.mxu1 %v2394_v49 }
  0x67   : > { %2198 = vmatpush3.bf16.msra.mxu0 %v2395_v50 }
  0x68   : > { %2220 = vmatpush3.bf16.msra.mxu1 %v2396_v51  ;;  %2199 = vmatprep.subr.bf16.mxu0 %v2397_v52 }
  0x69   : > { %2221 = vmatprep.subr.bf16.mxu1 %v2398_v53 }
  0x6b   : > { %2200 = vmatpush3.bf16.msra.mxu0 %v2399_v55 }
  0x6c   : > { %2222 = vmatpush3.bf16.msra.mxu1 %v2400_v57  ;;  %2229 = vmatprep.subr.bf16.mxu0 %v2401_v59 }
  0x6d   : > { %2251 = vmatprep.subr.bf16.mxu1 %v2402_v60 }
  0x6e   : > { %1253 = vmatmul.mubr.bf16.vlgmr.msra.gmra.mxu0 %v2615_v40 }
  0x6f   : > { %1293 = vmatmul.mubr.bf16.vlgmr.msra.gmra.mxu1 %v2821_v54  ;;  %2230 = vmatpush3.bf16.msra.mxu0 %v2403_v41 }
  0x70   : > { %2252 = vmatpush3.bf16.msra.mxu1 %v2404_v61  ;;  %2231 = vmatprep.subr.bf16.mxu0 %v2405_v62 }
  0x71   : > { %2253 = vmatprep.subr.bf16.mxu1 %v2406_v63  ;;  %1611 = vmatprep.mubr.bf16.mxu0 %v662_v23  ;;  %v2429_v23 = vld [vmem:[%s2952_s1 + $0x340] sm:$0xff]  }
  0x72   : > { %1651 = vmatprep.mubr.bf16.mxu1 %v1383_v30 }
  0x73   : > { %2232 = vmatpush3.bf16.msra.mxu0 %v2407_v0 }
  0x74   : > { %2254 = vmatpush3.bf16.msra.mxu1 %v2408_v1  ;;  %2233 = vmatprep.subr.bf16.mxu0 %v2409_v2 }
  0x75   : > { %2255 = vmatprep.subr.bf16.mxu1 %v2410_v3 }
  0x77   : > { %2234 = vmatpush3.bf16.msra.mxu0 %v2411_v4 }
  0x78   : > { %2256 = vmatpush3.bf16.msra.mxu1 %v2412_v5  ;;  %2235 = vmatprep.subr.bf16.mxu0 %v2413_v6 }
  0x79   : > { %2257 = vmatprep.subr.bf16.mxu1 %v2414_v7 }
  0x7b   : > { %2236 = vmatpush3.bf16.msra.mxu0 %v2415_v9 }
  0x7c   : > { %2258 = vmatpush3.bf16.msra.mxu1 %v2416_v10  ;;  %2237 = vmatprep.subr.bf16.mxu0 %v2417_v11 }
  0x7d   : > { %2259 = vmatprep.subr.bf16.mxu1 %v2418_v12 }
  0x7f   : > { %2238 = vmatpush3.bf16.msra.mxu0 %v2419_v13 }
  0x80   : > { %2260 = vmatpush3.bf16.msra.mxu1 %v2420_v14  ;;  %2239 = vmatprep.subr.bf16.mxu0 %v2421_v15 }
  0x81   : > { %2261 = vmatprep.subr.bf16.mxu1 %v2422_v16 }
  0x83   : > { %2240 = vmatpush3.bf16.msra.mxu0 %v2423_v17 }
  0x84   : > { %2262 = vmatpush3.bf16.msra.mxu1 %v2424_v18  ;;  %2241 = vmatprep.subr.bf16.mxu0 %v2425_v19 }
  0x85   : > { %2263 = vmatprep.subr.bf16.mxu1 %v2426_v20 }
  0x87   : > { %2242 = vmatpush3.bf16.msra.mxu0 %v2427_v21 }
  0x88   : > { %2264 = vmatpush3.bf16.msra.mxu1 %v2428_v22  ;;  %2243 = vmatprep.subr.bf16.mxu0 %v2429_v23 }
  0x89   : > { %2265 = vmatprep.subr.bf16.mxu1 %v2430_v24 }
  0x8b   : > { %2244 = vmatpush3.bf16.msra.mxu0 %v2431_v27 }
  0x8c   : > { %2266 = vmatpush3.bf16.msra.mxu1 %v2432_v28 }
  0x8e   : > { %1612 = vmatmul.mubr.bf16.vlgmr.msra.gmra.mxu0 %v659_v8 }
  0x8f   : > { %1652 = vmatmul.mubr.bf16.vlgmr.msra.gmra.mxu1 %v1380_v31 }
  0xee   : > { %v2113_v32 = vpop.f32.mrf.mxu0 }
  0xef   : > { %v2135_v33 = vpop.f32.mrf.mxu1 }
  0xf0   : > { %v2114_v35 = vpop.f32.mrf.mxu0 }
  0xf1   : > { %v2136_v36 = vpop.f32.mrf.mxu1  ;;  %v2115_v37 = vadd.f32 %v2114_v35, %v2113_v32 }
  0xf2   : > { %v2137_v38 = vadd.f32 %v2136_v36, %v2135_v33  ;;  %v2116_v39 = vpop.f32.mrf.mxu0 }
  0xf3   : > { %v2138_v42 = vpop.f32.mrf.mxu1  ;;  %v515_v43 = vadd.f32 %v2115_v37, %v287_v34 }
  0xf4   : > { %v2117_v44 = vpop.f32.mrf.mxu0 }
  0xf5   : > { %v2139_v45 = vpop.f32.mrf.mxu1  ;;  %v555_v46 = vadd.f32 %v2137_v38, %v515_v43 }
  0xf7   : > { %v560_v21 = vmax.f32 %v555_v46, 0.0 }
 0x10e   : > { %v2157_v47 = vpop.f32.mrf.mxu0 }
 0x10f   : > { %v2179_v40 = vpop.f32.mrf.mxu1 }
 0x110   : > { %v2158_v8 = vpop.f32.mrf.mxu0 }
 0x111   : > { %v2180_v48 = vpop.f32.mrf.mxu1  ;;  %v2159_v49 = vadd.f32 %v2158_v8, %v2157_v47 }
 0x112   : > { %v2181_v50 = vadd.f32 %v2180_v48, %v2179_v40  ;;  %v2160_v51 = vpop.f32.mrf.mxu0 }
 0x113   : > { %v2182_v52 = vpop.f32.mrf.mxu1  ;;  %v895_v53 = vadd.f32 %v2159_v49, %v287_v34 }
 0x114   : > { %v2161_v54 = vpop.f32.mrf.mxu0 }
 0x115   : > { %v2183_v55 = vpop.f32.mrf.mxu1  ;;  %v935_v56 = vadd.f32 %v2181_v50, %v895_v53 }
 0x117   : > { %v940_v17 = vmax.f32 %v935_v56, 0.0 }
 0x12e   : > { %v2201_v57 = vpop.f32.mrf.mxu0 }
 0x12f   : > { %v2223_v58 = vpop.f32.mrf.mxu1 }
 0x130   : > { %v2202_v59 = vpop.f32.mrf.mxu0 }
 0x131   : > { %v2224_v60 = vpop.f32.mrf.mxu1  ;;  %v2203_v41 = vadd.f32 %v2202_v59, %v2201_v57 }
 0x132   : > { %v2225_v61 = vadd.f32 %v2224_v60, %v2223_v58  ;;  %v2204_v62 = vpop.f32.mrf.mxu0 }
 0x133   : > { %v2226_v63 = vpop.f32.mrf.mxu1  ;;  %v1255_v0 = vadd.f32 %v2203_v41, %v287_v34 }
 0x134   : > { %v2205_v1 = vpop.f32.mrf.mxu0 }
 0x135   : > { %v2227_v2 = vpop.f32.mrf.mxu1  ;;  %v1295_v3 = vadd.f32 %v2225_v61, %v1255_v0 }
 0x137   : > { %v1300_v22 = vmax.f32 %v1295_v3, 0.0 }
 0x14e   : > { %v2245_v4 = vpop.f32.mrf.mxu0 }
 0x14f   : > { %v2267_v5 = vpop.f32.mrf.mxu1 }
 0x150   : > { %v2246_v6 = vpop.f32.mrf.mxu0 }
 0x151   : > { %v2268_v7 = vpop.f32.mrf.mxu1  ;;  %v2247_v9 = vadd.f32 %v2246_v6, %v2245_v4 }
 0x152   : > { %v2248_v10 = vpop.f32.mrf.mxu0  ;;  %v2269_v13 = vadd.f32 %v2268_v7, %v2267_v5 }
 0x153   : > { %v2270_v11 = vpop.f32.mrf.mxu1  ;;  %v1614_v12 = vadd.f32 %v2247_v9, %v287_v34 }
 0x154   : > { %v2249_v14 = vpop.f32.mrf.mxu0 }
 0x155   : > { %v2271_v15 = vpop.f32.mrf.mxu1  ;;  %v1654_v16 = vadd.f32 %v2269_v13, %v1614_v12 }
 0x157   : > { %v1659_v18 = vmax.f32 %v1654_v16, 0.0 }
 0x159   : > { %v2300_v19 = vpack.i.bf16 %v1659_v18, %v940_v17 }
 0x15b   : > { %2301 = vrot.lane.b32.xlu0 %v2300_v19, %s2458_s5 }
 0x1cd   : > { %v2302_v20 = vpop.permute.xlu0 %2301 }
 0x1ce   : > { %v2304_v23 = vunpack.i.h.bf16 %v2302_v20  ;;  %v2303_v24 = vunpack.i.l.bf16 %v2302_v20 }
 0x1d0   : > { %v1664_v27 = vsel %vm945_vm0, %v1300_v22, %v2304_v23  ;;  %v946_v28 = vsel %vm945_vm0, %v560_v21, %v2303_v24 }
 0x1d1   : > { %v1666_v29 = vpack.c.bf16 %v1664_v27, %v1664_v27  ;;  %v1665_v30 = vpack.c.bf16 %v946_v28, %v946_v28 }
 0x1d3   : > { %v1674_v31 = vsel %vm1669_vm3, %v1666_v29, %v1673_v26  ;;  %v1671_v32 = vsel %vm1669_vm3, %v1665_v30, %v1670_v25 }
 0x1d4   : > { %1675 = vst [vmem:[%s190_s9 + $0x1] sm:$0x1] %v1674_v31  ;;  %1672 = vst [vmem:[%s190_s9] sm:$0x1] %v1671_v32 }
 0x1d5 PF: > { %s13_s14 = sadd.s32 1, %s2455_s14   ;;  %s2955_s12 = smov %s2451_s13 }
 0x1d6   : > { %p10_p5 = scmp.ge.s32.totalorder %s13_s14, 4   ;;  %s2956_s13 = smov %s2958_s15 }
 0x1d8   :  { %12 = sbr.rel (!%p10_p5) target bundleno = 2 (0x2), region = 68 }

// kernel: fc_discriminator_forward.13
= control target key start
LH: loop header
LB: loop body
LE: loop exit
PB: predicated region body
PF: predicated region fallthrough
CT: control target
= control target key end

     0   :  { %s1592_s12 = smov 0   ;;  %s1594_s13 = smov 0   ;;  %s1886_s0 = inlined_call_operand.vmem [shape: bf16[2,4,4,64], index: 0, kind: input, shape index: {}]   ;;  %s1887_s1 = inlined_call_operand.vmem [shape: bf16[4,256,32], index: 1, kind: input, shape index: {}]   ;;  %s1888_s2 = inlined_call_operand.vmem [shape: f32[1,32], index: 2, kind: input, shape index: {}]   ;;  %s1889_s3 = inlined_call_operand.vmem [shape: bf16[2,2,2,2,64], index: 3, kind: output, shape index: {}]  }
   0x1   :  { %s1596_s14 = smov 0   ;;  %s1598_s15 = smov 0  }
   0x2   :  { %s1600_s16 = smov 0  }
   0x3 LB: > { %s22_s17 = sadd.s32 1, %s1559_s14  ;;  %s25_s18 = sadd.s32 1, %s1563_s15  ;;  %s1567_s16 = sphi %s1600_s16, %s13_s16   ;;  %s1563_s15 = sphi %s1598_s15, %s1893_s15   ;;  %s1559_s14 = sphi %s1596_s14, %s1892_s14   ;;  %s1555_s13 = sphi %s1594_s13, %s1891_s13   ;;  %s1551_s12 = sphi %s1592_s12, %s1890_s12  }
   0x4   : > { %p23_p0 = scmp.ge.s32.totalorder %s22_s17, 2  ;;  %p1148_p1 = scmp.ge.s32.totalorder %s1567_s16, 1 }
   0x5   : > { %p151_p2 = scmp.lt.s32.totalorder %s1567_s16, 5 }
   0x6   : > { %s1895_s17 = smov (%p23_p0, %s22_s17), 0  ;;  %s1897_s18 = smov (!%p23_p0, %s25_s18), %s1563_s15 }
   0x7   : > { %p152_p3 = pnand %p1148_p1, %p151_p2  ;;  %p27_p4 = scmp.ge.s32.totalorder %s1897_s18, 2 }
   0x8   : > { %p178_p5 = scmp.lt.s32.totalorder (!%p152_p3), %s1555_s13, 1  ;;  %s1153_s19 = sshll.u32 (!%p152_p3), %s1551_s12, 1 }
   0x9   : > { %s1899_s18 = smov (%p27_p4, %s1897_s18), 0  ;;  %155 = sbr.rel (%p152_p3) target bundleno = 507 (0x1fb), region = 32 }
   0xa   : > { %s1570_s23 = smov (!%p152_p3), 64   ;;  %p185_p6 = scmp.lt.s32.totalorder (!%p152_p3), %s1551_s12, 1 }
   0xe   : > { %v205_v0 = vlaneseq  ;;  %v1569_v1 = vmov 1983009808   ;;  %v1465_v3 = vld [vmem:[%s1887_s1 + $0xf8] sm:$0xff]   ;;  %s1901_s13 = smov (!%p178_p5, %s1555_s13), 1  ;;  %v1467_v6 = vld [vmem:[%s1887_s1 + $0xf0] sm:$0xff]   ;;  %v1469_v10 = vld [vmem:[%s1887_s1 + $0xe8] sm:$0xff]  }
   0xf   : > { %v203_v2 = vunpack.c.l.s4 %v1569_v1  ;;  %v1466_v5 = vld [vmem:[%s1887_s1 + $0xb8] sm:$0xff]   ;;  %1351 = vmatprep.subr.bf16.mxu1 %v1465_v3  ;;  %s1328_s26 = sshll.u32 %s1901_s13, 3  ;;  %v1468_v8 = vld [vmem:[%s1887_s1 + $0xb0] sm:$0xff]   ;;  %v1470_v11 = vld [vmem:[%s1887_s1 + $0xa8] sm:$0xff]   ;;  %vm235_vm0 = vcmask 523264   ;;  %s1903_s12 = smov (!%p185_p6, %s1551_s12), 1 }
  0x10   : > { %v206_v4 = vshrl.u32 %v205_v0, 7  ;;  %1352 = vmatpush3.bf16.msra.mxu1 %v1466_v5  ;;  %s182_s4 = scalar_lea.vmem %s1886_s0, %s1328_s26  ;;  %v1471_v29 = vld [vmem:[%s1887_s1 + $0xe0] sm:$0xff]   ;;  %v1473_v36 = vld [vmem:[%s1887_s1 + $0xd8] sm:$0xff]   ;;  %v1475_v42 = vld [vmem:[%s1887_s1 + $0xd0] sm:$0xff]   ;;  %s1151_s20 = sshll.u32 %s1903_s12, 1  ;;  %vm650_vm1 = vcmask 261120  }
  0x11   : > { %v204_v7 = vunpack.c.0.s8 %v203_v2  ;;  %1353 = vmatprep.subr.bf16.mxu1 %v1467_v6  ;;  %s1646_s7 = scalar_lea.vmem %s182_s4, %s1153_s19  ;;  %v1472_v32 = vld [vmem:[%s1887_s1 + $0xa0] sm:$0xff]   ;;  %v1474_v41 = vld [vmem:[%s1887_s1 + $0x98] sm:$0xff]   ;;  %v1476_v44 = vld [vmem:[%s1887_s1 + $0x90] sm:$0xff]   ;;  %s1571_s19 = smov 32   ;;  %vm1053_vm2 = vcmask 516096  }
  0x12   : > { %v1176_v12 = vld.sshfl [vmem:[%s1646_s7 + $0x2] sm:$0x2 pattern:$0x76325410]  ;;  %v1659_v24 = vld [vmem:[%s1646_s7] sm:$0x3] }
  0x13   : > { %v207_v9 = vsub.s32 %v204_v7, %v206_v4  ;;  %v1653_v13 = vld [vmem:[%s1646_s7 + $0x2] sm:$0x3]  ;;  %v448_v14 = vshrl.u32 %v1176_v12, 16  ;;  %v450_v15 = vshll.u32 %v1176_v12, 16  ;;  %v1227_v45 = vld [vmem:[%s1646_s7 + $0x4] sm:$0x3] }
  0x14   : > { %v1175_v16 = vld.sshfl [vmem:[%s1646_s7] sm:$0x2 pattern:$0x76325410]  ;;  %1354 = vmatpush3.bf16.msra.mxu1 %v1468_v8  ;;  %v1477_v46 = vld [vmem:[%s1887_s1 + $0xc8] sm:$0xff]   ;;  %v1481_v55 = vld [vmem:[%s1887_s1 + $0x1f8] sm:$0xff]  }
  0x15   : > { %v225_v17 = vrot.slane %v1653_v13, %v207_v9  ;;  %v433_v18 = vshll.u32 %v1175_v16, 16  ;;  %v1277_v19 = vld.sshfl [vmem:[%s1646_s7 + $0x4] sm:$0x2 pattern:$0x76325410]  ;;  %1355 = vmatprep.subr.bf16.mxu1 %v1469_v10  ;;  %v452_v20 = vrot.slane %v450_v15, 1  ;;  %v208_v28 = vrot.slane %v1659_v24, %v207_v9 }
  0x16   : > { %v431_v21 = vshrl.u32 %v1175_v16, 16  ;;  %v858_v22 = vshrl.u32 %v1277_v19, 16  ;;  %v860_v23 = vshll.u32 %v1277_v19, 16  ;;  %v664_v47 = vrot.slane %v1227_v45, %v207_v9  ;;  %v1478_v48 = vld [vmem:[%s1887_s1 + $0x88] sm:$0xff]   ;;  %v1479_v51 = vld [vmem:[%s1887_s1 + $0xc0] sm:$0xff]   ;;  %v1497_v56 = vld [vmem:[%s1887_s1 + $0x78] sm:$0xff]  }
  0x17   : > { %v435_v25 = vrot.slane %v433_v18, 1  ;;  %v227_v26 = vshrl.u32 %v225_v17, 16  ;;  %v229_v27 = vshll.u32 %v225_v17, 16  ;;  %v453_v30 = vor.u32 %v452_v20, %v448_v14  ;;  %v1480_v54 = vld [vmem:[%s1887_s1 + $0x80] sm:$0xff]   ;;  %v1498_v57 = vld [vmem:[%s1887_s1 + $0x38] sm:$0xff]   ;;  %v1499_v58 = vld [vmem:[%s1887_s1 + $0x70] sm:$0xff]   ;;  %1329 = vmatprep.subr.bf16.mxu0 %v1497_v56 }
  0x18   : > { %v862_v31 = vrot.slane %v860_v23, 1  ;;  %1356 = vmatpush3.bf16.msra.mxu1 %v1470_v11  ;;  %v210_v34 = vshrl.u32 %v208_v28, 16  ;;  %v212_v35 = vshll.u32 %v208_v28, 16  ;;  %v666_v49 = vshrl.u32 %v664_v47, 16  ;;  %1330 = vmatpush3.bf16.msra.mxu0 %v1498_v57  ;;  %v1500_v59 = vld [vmem:[%s1887_s1 + $0x30] sm:$0xff]   ;;  %v1501_v60 = vld [vmem:[%s1887_s1 + $0x68] sm:$0xff]  }
  0x19   : > { %v231_v33 = vrot.slane %v229_v27, 1  ;;  %1357 = vmatprep.subr.bf16.mxu1 %v1471_v29  ;;  %454 = vrot.lane.b32.xlu0 %v453_v30, %s1570_s23  ;;  %v436_v37 = vor.u32 %v435_v25, %v431_v21  ;;  %v668_v50 = vshll.u32 %v664_v47, 16  ;;  %v1502_v61 = vld [vmem:[%s1887_s1 + $0x28] sm:$0xff]   ;;  %v1503_v62 = vld [vmem:[%s1887_s1 + $0x60] sm:$0xff]   ;;  %v1505_v0 = vld [vmem:[%s1887_s1 + $0x58] sm:$0xff]   ;;  %s1152_s21 = sshll.u32 %s1901_s13, 2 }
  0x1a   : > { %v863_v38 = vor.u32 %v862_v31, %v858_v22  ;;  %v214_v39 = vrot.slane %v212_v35, 1  ;;  %1331 = vmatprep.subr.bf16.mxu0 %v1499_v58  ;;  %v1504_v63 = vld [vmem:[%s1887_s1 + $0x20] sm:$0xff]   ;;  %v1506_v1 = vld [vmem:[%s1887_s1 + $0x18] sm:$0xff]   ;;  %v1507_v2 = vld [vmem:[%s1887_s1 + $0x50] sm:$0xff]   ;;  %s189_s22 = sadd.s32 %s1152_s21, %s1151_s20 }
  0x1b   : > { %v232_v40 = vor.u32 %v231_v33, %v227_v26  ;;  %v670_v52 = vrot.slane %v668_v50, 1  ;;  %v1508_v3 = vld [vmem:[%s1887_s1 + $0x10] sm:$0xff]   ;;  %v1509_v4 = vld [vmem:[%s1887_s1 + $0x48] sm:$0xff]   ;;  %v1511_v6 = vld [vmem:[%s1887_s1 + $0x40] sm:$0xff]   ;;  %s190_s26 = scalar_lea.vmem %s1889_s3, %s189_s22 }
  0x1c   : > { %864 = vrot.lane.b32.xlu1 %v863_v38, %s1570_s23  ;;  %1358 = vmatpush3.bf16.msra.mxu1 %v1472_v32  ;;  %v215_v43 = vor.u32 %v214_v39, %v210_v34  ;;  %v1510_v5 = vld [vmem:[%s1887_s1 + $0x8] sm:$0xff]   ;;  %v1512_v7 = vld [vmem:[%s1887_s1] sm:$0xff]   ;;  %v1513_v8 = vld [vmem:[%s1887_s1 + $0x178] sm:$0xff]  }
  0x1d   : > { %1359 = vmatprep.subr.bf16.mxu1 %v1473_v36  ;;  %437 = vrot.lane.b32.xlu0 %v436_v37, %s1570_s23  ;;  %v671_v53 = vor.u32 %v670_v52, %v666_v49  ;;  %v1155_v19 = vld [vmem:[%s1646_s7 + $0x2] sm:$0x1]  ;;  %v194_v27 = vld [vmem:[%s1646_s7] sm:$0x1]  ;;  %v1514_v28 = vld [vmem:[%s1887_s1 + $0x138] sm:$0xff]  }
  0x1e   : > { %1332 = vmatpush3.bf16.msra.mxu0 %v1500_v59  ;;  %v1482_v32 = vld [vmem:[%s1887_s1 + $0x1b8] sm:$0xff]   ;;  %v1483_v36 = vld [vmem:[%s1887_s1 + $0x1f0] sm:$0xff]   ;;  %v1517_v38 = vld [vmem:[%s1887_s1 + $0x168] sm:$0xff]  }
  0x1f   : > { %1333 = vmatprep.subr.bf16.mxu0 %v1501_v60  ;;  %v1516_v37 = vld [vmem:[%s1887_s1 + $0x130] sm:$0xff]   ;;  %v1487_v47 = vld [vmem:[%s1887_s1 + $0x1e0] sm:$0xff]   ;;  %v1521_v49 = vld [vmem:[%s1887_s1 + $0x158] sm:$0xff]  }
  0x20   : > { %233 = vrot.lane.b32.xlu1 %v232_v40, %s1570_s23  ;;  %1360 = vmatpush3.bf16.msra.mxu1 %v1474_v41  ;;  %v1484_v39 = vld [vmem:[%s1887_s1 + $0x1b0] sm:$0xff]   ;;  %v1226_v40 = vld [vmem:[%s1646_s7 + $0x4] sm:$0x1]  ;;  %v1485_v41 = vld [vmem:[%s1887_s1 + $0x1e8] sm:$0xff]  }
  0x21   : > { %1361 = vmatprep.subr.bf16.mxu1 %v1475_v42  ;;  %216 = vrot.lane.b32.xlu0 %v215_v43, %s1570_s23  ;;  %v1518_v42 = vld [vmem:[%s1887_s1 + $0x128] sm:$0xff]   ;;  %v1488_v50 = vld [vmem:[%s1887_s1 + $0x1a0] sm:$0xff]   ;;  %v1522_v52 = vld [vmem:[%s1887_s1 + $0x118] sm:$0xff]  }
  0x22   : > { %1334 = vmatpush3.bf16.msra.mxu0 %v1502_v61  ;;  %v1524_v56 = vld [vmem:[%s1887_s1 + $0x110] sm:$0xff]   ;;  %v1525_v57 = vld [vmem:[%s1887_s1 + $0x148] sm:$0xff]   ;;  %v1527_v61 = vld [vmem:[%s1887_s1 + $0x140] sm:$0xff]  }
  0x23   : > { %1335 = vmatprep.subr.bf16.mxu0 %v1503_v62  ;;  %v1492_v58 = vld [vmem:[%s1887_s1 + $0x190] sm:$0xff]   ;;  %v1493_v59 = vld [vmem:[%s1887_s1 + $0x1c8] sm:$0xff]  }
  0x24   : > { %1362 = vmatpush3.bf16.msra.mxu1 %v1476_v44  ;;  %672 = vrot.lane.b32.xlu1 %v671_v53, %s1570_s23  ;;  %v1519_v44 = vld [vmem:[%s1887_s1 + $0x160] sm:$0xff]   ;;  %v1523_v53 = vld [vmem:[%s1887_s1 + $0x150] sm:$0xff]   ;;  %v1526_v60 = vld [vmem:[%s1887_s1 + $0x108] sm:$0xff]  }
  0x25   : > { %1363 = vmatprep.subr.bf16.mxu1 %v1477_v46  ;;  %v1486_v46 = vld [vmem:[%s1887_s1 + $0x1a8] sm:$0xff]  }
  0x26   : > { %1336 = vmatpush3.bf16.msra.mxu0 %v1504_v63  ;;  %v1494_v62 = vld [vmem:[%s1887_s1 + $0x188] sm:$0xff]   ;;  %v1495_v63 = vld [vmem:[%s1887_s1 + $0x1c0] sm:$0xff]  }
  0x27   : > { %1337 = vmatprep.subr.bf16.mxu0 %v1505_v0  ;;  %v1528_v0 = vld [vmem:[%s1887_s1 + $0x100] sm:$0xff]  }
  0x28   : > { %1364 = vmatpush3.bf16.msra.mxu1 %v1478_v48  ;;  %v1520_v48 = vld [vmem:[%s1887_s1 + $0x120] sm:$0xff]  }
  0x29   : > { %1365 = vmatprep.subr.bf16.mxu1 %v1479_v51  ;;  %v1489_v51 = vld [vmem:[%s1887_s1 + $0x1d8] sm:$0xff]  }
  0x2a   : > { %1338 = vmatpush3.bf16.msra.mxu0 %v1506_v1  ;;  %v1496_v1 = vld [vmem:[%s1887_s1 + $0x180] sm:$0xff]  }
  0x2b   : > { %1339 = vmatprep.subr.bf16.mxu0 %v1507_v2 }
  0x2c   : > { %1366 = vmatpush3.bf16.msra.mxu1 %v1480_v54  ;;  %v1490_v54 = vld [vmem:[%s1887_s1 + $0x198] sm:$0xff]  }
  0x2d   : > { %1395 = vmatprep.subr.bf16.mxu1 %v1481_v55  ;;  %v1491_v55 = vld [vmem:[%s1887_s1 + $0x1d0] sm:$0xff]  }
  0x2e   : > { %1340 = vmatpush3.bf16.msra.mxu0 %v1508_v3 }
  0x2f   : > { %1341 = vmatprep.subr.bf16.mxu0 %v1509_v4 }
  0x32   : > { %1342 = vmatpush3.bf16.msra.mxu0 %v1510_v5 }
  0x33   : > { %1343 = vmatprep.subr.bf16.mxu0 %v1511_v6  ;;  %v1157_v6 = vld [vmem:[%s1888_s2] ss:$0 sm:$0xff] }
  0x36   : > { %1344 = vmatpush3.bf16.msra.mxu0 %v1512_v7 }
  0x37   : > { %1373 = vmatprep.subr.bf16.mxu0 %v1513_v8 }
  0x8b   : > { %v455_v9 = vpop.permute.xlu0 %454 }
  0x8c   : > { %v461_v10 = vsel %vm235_vm0, %v1653_v13, %v455_v9 }
  0x8d   : > { %v503_v11 = vshll.u32 %v461_v10, 16  ;;  %v501_v15 = vshrl.u32 %v461_v10, 16 }
  0x8e   : > { %v865_v12 = vpop.permute.xlu1 %864 }
  0x8f   : > { %v868_v14 = vsel %vm235_vm0, %v1227_v45, %v865_v12  ;;  %v505_v16 = vrot.slane %v503_v11, 1  ;;  %v438_v17 = vpop.permute.xlu0 %437 }
  0x90   : > { %v904_v18 = vshll.u32 %v868_v14, 16  ;;  %v458_v20 = vsel %vm235_vm0, %v1659_v24, %v438_v17  ;;  %v902_v21 = vshrl.u32 %v868_v14, 16  ;;  %v1515_v24 = vld [vmem:[%s1887_s1 + $0x170] sm:$0xff]  }
  0x91   : > { %v497_v22 = vshll.u32 %v458_v20, 16  ;;  %v1759_v23 = vor.u32 %v505_v16, %v501_v15  ;;  %v495_v29 = vshrl.u32 %v458_v20, 16 }
  0x92   : > { %v906_v25 = vrot.slane %v904_v18, 1  ;;  %v234_v26 = vpop.permute.xlu1 %233 }
  0x93   : > { %v1763_v13 = vsel %vm235_vm0, %v1155_v19, %v234_v26  ;;  %v499_v30 = vrot.slane %v497_v22, 1  ;;  %637 = vmatprep.mubr.bf16.mxu1 %v1759_v23  ;;  %v217_v31 = vpop.permute.xlu0 %216 }
  0x94   : > { %411 = vmatprep.mubr.bf16.mxu0 %v1763_v13  ;;  %v907_v33 = vor.u32 %v906_v25, %v902_v21  ;;  %v238_v34 = vsel %vm235_vm0, %v194_v27, %v217_v31 }
  0x95   : > { %v500_v35 = vor.u32 %v499_v30, %v495_v29  ;;  %412 = vmatmul.mubr.bf16.vlgmr.msra.gmra.mxu0 %v238_v34 }
  0x96   : > { %1374 = vmatpush3.bf16.msra.mxu0 %v1514_v28  ;;  %v673_v43 = vpop.permute.xlu1 %672 }
  0x97   : > { %638 = vmatmul.mubr.bf16.vlgmr.msra.gmra.mxu1 %v500_v35  ;;  %1375 = vmatprep.subr.bf16.mxu0 %v1515_v24  ;;  %v676_v45 = vsel %vm235_vm0, %v1226_v40, %v673_v43 }
  0x98   : > { %1396 = vmatpush3.bf16.msra.mxu1 %v1482_v32  ;;  %1037 = vmatprep.mubr.bf16.mxu1 %v907_v33 }
  0x99   : > { %1397 = vmatprep.subr.bf16.mxu1 %v1483_v36  ;;  %839 = vmatprep.mubr.bf16.mxu0 %v676_v45 }
  0x9a   : > { %1376 = vmatpush3.bf16.msra.mxu0 %v1516_v37 }
  0x9b   : > { %1377 = vmatprep.subr.bf16.mxu0 %v1517_v38 }
  0x9c   : > { %1398 = vmatpush3.bf16.msra.mxu1 %v1484_v39 }
  0x9d   : > { %1399 = vmatprep.subr.bf16.mxu1 %v1485_v41 }
  0x9e   : > { %1378 = vmatpush3.bf16.msra.mxu0 %v1518_v42 }
  0x9f   : > { %1379 = vmatprep.subr.bf16.mxu0 %v1519_v44 }
  0xa0   : > { %1400 = vmatpush3.bf16.msra.mxu1 %v1486_v46 }
  0xa1   : > { %1401 = vmatprep.subr.bf16.mxu1 %v1487_v47 }
  0xa2   : > { %1380 = vmatpush3.bf16.msra.mxu0 %v1520_v48 }
  0xa3   : > { %1381 = vmatprep.subr.bf16.mxu0 %v1521_v49 }
  0xa4   : > { %1402 = vmatpush3.bf16.msra.mxu1 %v1488_v50 }
  0xa5   : > { %1403 = vmatprep.subr.bf16.mxu1 %v1489_v51 }
  0xa6   : > { %1382 = vmatpush3.bf16.msra.mxu0 %v1522_v52 }
  0xa7   : > { %1383 = vmatprep.subr.bf16.mxu0 %v1523_v53 }
  0xa8   : > { %1404 = vmatpush3.bf16.msra.mxu1 %v1490_v54 }
  0xa9   : > { %1405 = vmatprep.subr.bf16.mxu1 %v1491_v55 }
  0xaa   : > { %1384 = vmatpush3.bf16.msra.mxu0 %v1524_v56 }
  0xab   : > { %1385 = vmatprep.subr.bf16.mxu0 %v1525_v57 }
  0xac   : > { %1406 = vmatpush3.bf16.msra.mxu1 %v1492_v58 }
  0xad   : > { %1407 = vmatprep.subr.bf16.mxu1 %v1493_v59 }
  0xae   : > { %1386 = vmatpush3.bf16.msra.mxu0 %v1526_v60 }
  0xaf   : > { %1387 = vmatprep.subr.bf16.mxu0 %v1527_v61 }
  0xb0   : > { %1408 = vmatpush3.bf16.msra.mxu1 %v1494_v62 }
  0xb1   : > { %1409 = vmatprep.subr.bf16.mxu1 %v1495_v63 }
  0xb2   : > { %1388 = vmatpush3.bf16.msra.mxu0 %v1528_v0 }
  0xb4   : > { %1410 = vmatpush3.bf16.msra.mxu1 %v1496_v1 }
  0xb5   : > { %840 = vmatmul.mubr.bf16.vlgmr.msra.gmra.mxu0 %v1763_v13 }
  0xb7   : > { %1038 = vmatmul.mubr.bf16.vlgmr.msra.gmra.mxu1 %v1759_v23 }
 0x155   : > { %v1345_v2 = vpop.f32.mrf.mxu0 }
 0x157   : > { %v1367_v3 = vpop.f32.mrf.mxu1  ;;  %v1346_v4 = vpop.f32.mrf.mxu0 }
 0x158   : > { %v1347_v5 = vadd.f32 %v1346_v4, %v1345_v2 }
 0x159   : > { %v1368_v7 = vpop.f32.mrf.mxu1  ;;  %v1348_v8 = vpop.f32.mrf.mxu0 }
 0x15a   : > { %v414_v9 = vadd.f32 %v1347_v5, %v1157_v6  ;;  %v1369_v15 = vadd.f32 %v1368_v7, %v1367_v3 }
 0x15b   : > { %v1370_v10 = vpop.f32.mrf.mxu1  ;;  %v1349_v11 = vpop.f32.mrf.mxu0 }
 0x15c   : > { %v640_v21 = vadd.f32 %v1369_v15, %v1157_v6  ;;  %v419_v24 = vmax.f32 %v414_v9, 0.0 }
 0x15d   : > { %v1371_v12 = vpop.f32.mrf.mxu1 }
 0x15e   : > { %v645_v28 = vmax.f32 %v640_v21, 0.0 }
 0x175   : > { %v1389_v14 = vpop.f32.mrf.mxu0 }
 0x177   : > { %v1411_v16 = vpop.f32.mrf.mxu1  ;;  %v1390_v17 = vpop.f32.mrf.mxu0 }
 0x178   : > { %v1391_v18 = vadd.f32 %v1390_v17, %v1389_v14 }
 0x179   : > { %v1412_v19 = vpop.f32.mrf.mxu1  ;;  %v1392_v20 = vpop.f32.mrf.mxu0 }
 0x17a   : > { %v1413_v22 = vadd.f32 %v1412_v19, %v1411_v16  ;;  %v842_v23 = vadd.f32 %v1391_v18, %v1157_v6 }
 0x17b   : > { %v1414_v25 = vpop.f32.mrf.mxu1  ;;  %v1393_v26 = vpop.f32.mrf.mxu0 }
 0x17c   : > { %v1040_v27 = vadd.f32 %v1413_v22, %v1157_v6  ;;  %v847_v32 = vmax.f32 %v842_v23, 0.0 }
 0x17d   : > { %v1415_v13 = vpop.f32.mrf.mxu1 }
 0x17e   : > { %v1045_v29 = vmax.f32 %v1040_v27, 0.0 }
 0x180   : > { %v1460_v30 = vpack.i.bf16 %v1045_v29, %v645_v28 }
 0x182   : > { %1461 = vrot.lane.b32.xlu0 %v1460_v30, %s1571_s19 }
 0x1f4   : > { %v1462_v31 = vpop.permute.xlu0 %1461 }
 0x1f5   : > { %v1464_v33 = vunpack.i.h.bf16 %v1462_v31  ;;  %v1463_v34 = vunpack.i.l.bf16 %v1462_v31 }
 0x1f7   : > { %v651_v35 = vsel %vm650_vm1, %v419_v24, %v1463_v34  ;;  %v1050_v36 = vsel %vm650_vm1, %v847_v32, %v1464_v33 }
 0x1f8   : > { %v1051_v37 = vpack.c.bf16 %v651_v35, %v651_v35  ;;  %v1052_v38 = vpack.c.bf16 %v1050_v36, %v1050_v36 }
 0x1fa   : > { %1054 = vst.msk [vmem:[%s190_s26] sm:$0x1] %vm1053_vm2, %v1051_v37  ;;  %1055 = vst.msk [vmem:[%s190_s26 + $0x1] sm:$0x1] %vm1053_vm2, %v1052_v38 }
 0x1fb PF: > { %s13_s16 = sadd.s32 1, %s1567_s16   ;;  %s1890_s12 = smov %s1559_s14 }
 0x1fc   : > { %p10_p7 = scmp.ge.s32.totalorder %s13_s16, 6   ;;  %s1891_s13 = smov %s1563_s15 }
 0x1fd   : > { %s1892_s14 = smov %s1895_s17  ;;  %s1893_s15 = smov %s1899_s18 }
 0x1fe   :  { %12 = sbr.rel (!%p10_p7) target bundleno = 3 (0x3), region = 68 }

// kernel: fc_discriminator_forward.14
= control target key start
LH: loop header
LB: loop body
LE: loop exit
PB: predicated region body
PF: predicated region fallthrough
CT: control target
= control target key end

     0   :  { %s1587_s12 = smov 0   ;;  %s1589_s13 = smov 0   ;;  %s1928_s0 = inlined_call_operand.vmem [shape: bf16[2,6,6,32], index: 0, kind: input, shape index: {}]   ;;  %s1929_s1 = inlined_call_operand.vmem [shape: bf16[4,128,16], index: 1, kind: input, shape index: {}]   ;;  %s1930_s2 = inlined_call_operand.vmem [shape: f32[1,16], index: 2, kind: input, shape index: {}]   ;;  %s1931_s3 = inlined_call_operand.vmem [shape: bf16[2,4,2,4,32], index: 3, kind: output, shape index: {}]  }
   0x1   :  { %s1591_s14 = smov 0   ;;  %s1593_s15 = smov 0  }
   0x2   :  { %s1595_s16 = smov 0  }
   0x3 LB: > { %s22_s17 = sadd.s32 1, %s1550_s14  ;;  %s25_s18 = sadd.s32 1, %s1554_s15  ;;  %s1558_s16 = sphi %s1595_s16, %s13_s16   ;;  %s1554_s15 = sphi %s1593_s15, %s1937_s15   ;;  %s1550_s14 = sphi %s1591_s14, %s1936_s14   ;;  %s1546_s13 = sphi %s1589_s13, %s1935_s13   ;;  %s1542_s12 = sphi %s1587_s12, %s1934_s12  }
   0x4   : > { %p23_p0 = scmp.ge.s32.totalorder %s22_s17, 2  ;;  %p1172_p1 = scmp.ge.s32.totalorder %s1558_s16, 1 }
   0x5   : > { %p151_p2 = scmp.lt.s32.totalorder %s1558_s16, 5 }
   0x6   : > { %s1939_s17 = smov (%p23_p0, %s22_s17), 0  ;;  %s1941_s18 = smov (!%p23_p0, %s25_s18), %s1554_s15 }
   0x7   : > { %p152_p3 = pnand %p1172_p1, %p151_p2  ;;  %p27_p4 = scmp.ge.s32.totalorder %s1941_s18, 2 }
   0x8   : > { %p180_p5 = scmp.lt.s32.totalorder (!%p152_p3), %s1546_s13, 1  ;;  %s1295_s24 = sshll.u32 (!%p152_p3), %s1542_s12, 3 }
   0x9   : > { %s1943_s18 = smov (%p27_p4, %s1941_s18), 0  ;;  %155 = sbr.rel (%p152_p3) target bundleno = 521 (0x209), region = 32 }
   0xa   : > { %s1561_s6 = smov (!%p152_p3), 64   ;;  %s1562_s9 = smov (!%p152_p3), 32  }
   0xb   : > { %s1563_s10 = smov (!%p152_p3), 96   ;;  %s1566_s8 = smov (!%p152_p3), 16  }
   0xe   : > { %v1482_v0 = vld [vmem:[%s1929_s1 + $0x78] sm:$0xff]   ;;  %v1560_v1 = vmov 0.0   ;;  %s1945_s13 = smov (!%p180_p5, %s1546_s13), 1  ;;  %v1483_v2 = vld [vmem:[%s1929_s1 + $0x70] sm:$0xff]   ;;  %v1485_v3 = vld [vmem:[%s1929_s1 + $0x68] sm:$0xff]   ;;  %vm1564_vm0 = vmmov 0  }
   0xf   : > { %1354 = vmatprep.subr.bf16.mxu1 %v1560_v1  ;;  %1334 = vmatprep.subr.bf16.mxu0 %v1560_v1  ;;  %s1414_s23 = smul.u32 24, %s1945_s13  ;;  %v1487_v9 = vld [vmem:[%s1929_s1 + $0x60] sm:$0xff]   ;;  %v1490_v21 = vld [vmem:[%s1929_s1 + $0x58] sm:$0xff]   ;;  %v1491_v36 = vld [vmem:[%s1929_s1 + $0x50] sm:$0xff]   ;;  %vm269_vm1 = vcmask 261120   ;;  %vm281_vm2 = vcmask 785408  }
  0x10   : > { %1355 = vmatpush3.bf16.msra.mxu1 %v1482_v0  ;;  %v1492_v39 = vld [vmem:[%s1929_s1 + $0x48] sm:$0xff]   ;;  %1370 = vmatprep.mubr.msk.bf16.mxu1 %vm1564_vm0, %v1560_v1  ;;  %v1493_v49 = vld [vmem:[%s1929_s1 + $0x40] sm:$0xff]   ;;  %vm276_vm3 = vcmask 523264   ;;  %vm500_vm4 = vsmask.f32 1280  ;;  %s1176_s11 = sshll.u32 %s1945_s13, 3 }
  0x11   : > { %1356 = vmatprep.subr.bf16.mxu1 %v1560_v1  ;;  %s184_s27 = scalar_lea.vmem %s1928_s0, %s1414_s23  ;;  %1350 = vmatprep.mubr.msk.bf16.mxu0 %vm1564_vm0, %v1560_v1  ;;  %vm501_vm5 = vsmask.f32 3336  ;;  %vm503_vm7 = vsmask.f32 5392  ;;  %vm505_vm8 = vsmask.f32 7448 }
  0x12   : > { %s1638_s30 = scalar_lea.vmem %s184_s27, %s1295_s24  ;;  %vm502_vm6 = vmor %vm500_vm4, %vm501_vm5  ;;  %vm658_vm11 = vcmask 130048   ;;  %vm1063_vm12 = vcmask 254976  }
  0x13   : > { %v1642_v4 = vld [vmem:[%s1638_s30 + $0x4] sm:$0x7]  ;;  %v1645_v5 = vld [vmem:[%s1638_s30 + $0x8] sm:$0x7]  ;;  %v1683_v34 = vld [vmem:[%s1638_s30] sm:$0x7] }
  0x14   : > { %1357 = vmatpush3.bf16.msra.mxu1 %v1483_v2  ;;  %v1649_v6 = vcombine.low %v1642_v4, %v1642_v4  ;;  %v1473_v7 = vld [vmem:[%s1638_s30] ss:$0 sps:$4 sm:$0x66]   ;;  %v1475_v8 = vld [vmem:[%s1638_s30 + $0x4] ss:$0 sps:$4 sm:$0x66]   ;;  %v1660_v12 = vcombine.low %v1645_v5, %v1645_v5  ;;  %v1186_v42 = vcombine.low %v1683_v34, %v1683_v34  ;;  %vm504_vm9 = vmor %vm502_vm6, %vm503_vm7 }
  0x15   : > { %1358 = vmatprep.subr.bf16.mxu1 %v1560_v1  ;;  %v423_v10 = vshrl.u32 %v1473_v7, 16  ;;  %v425_v11 = vshll.u32 %v1473_v7, 16  ;;  %v1476_v13 = vld [vmem:[%s1638_s30 + $0x8] ss:$0 sps:$4 sm:$0x66]   ;;  %v430_v14 = vshrl.u32 %v1475_v8, 16  ;;  %vm1789_vm10 = vmor %vm504_vm9, %vm505_vm8 }
  0x16   : > { %440 = vrot.lane.b32.xlu1 %v1649_v6, %s1561_s6  ;;  %v432_v15 = vshll.u32 %v1475_v8, 16  ;;  %v458_v17 = vshrl.u32 %v1476_v13, 16  ;;  %v460_v18 = vshll.u32 %v1476_v13, 16  ;;  %v1477_v19 = vld [vmem:[%s1638_s30 + $0x4] ss:$0 sps:$4 sm:$0x66]  }
  0x17   : > { %v427_v16 = vrot.slane %v425_v11, 1  ;;  %v453_v24 = vshll.u32 %v1477_v19, 16  ;;  %v451_v25 = vshrl.u32 %v1477_v19, 16  ;;  %v1480_v26 = vld [vmem:[%s1638_s30 + $0x8] ss:$0 sps:$4 sm:$0x66]  }
  0x18   : > { %1359 = vmatpush3.bf16.msra.mxu1 %v1485_v3  ;;  %v434_v20 = vrot.slane %v432_v15, 1  ;;  %v462_v23 = vrot.slane %v460_v18, 1  ;;  %v1481_v30 = vld [vmem:[%s1638_s30 + $0xc] ss:$0 sps:$4 sm:$0x66]   ;;  %v859_v38 = vshll.u32 %v1480_v26, 16 }
  0x19   : > { %1360 = vmatprep.subr.bf16.mxu1 %v1560_v1  ;;  %v428_v22 = vor.u32 %v427_v16, %v423_v10  ;;  %v455_v29 = vrot.slane %v453_v24, 1  ;;  %v1675_v31 = vld [vmem:[%s1638_s30 + $0x4] sm:$0x7]  ;;  %v1679_v32 = vld [vmem:[%s1638_s30 + $0xc] ss:$0 sps:$4 sm:$0x77]  }
  0x1a   : > { %442 = vrot.lane.b32.xlu1 %v1660_v12, %s1561_s6  ;;  %v435_v27 = vor.u32 %v434_v20, %v430_v14  ;;  %v463_v28 = vor.u32 %v462_v23, %v458_v17  ;;  %v866_v33 = vshll.u32 %v1481_v30, 16  ;;  %v1187_v35 = vcombine.low %v1675_v31, %v1675_v31  ;;  %v1478_v44 = vld [vmem:[%s1638_s30 + $0x8] ss:$0 sps:$4 sm:$0x77]   ;;  %v1724_v62 = vld [vmem:[%s1638_s30 + $0x4] sm:$0x3] }
  0x1b   : > { %436 = vrot.lane.b32.xlu0 %v428_v22, %s1562_s9  ;;  %v456_v37 = vor.u32 %v455_v29, %v451_v25  ;;  %v864_v40 = vshrl.u32 %v1481_v30, 16  ;;  %v857_v45 = vshrl.u32 %v1480_v26, 16  ;;  %v861_v46 = vrot.slane %v859_v38, 1  ;;  %v1713_v54 = vld [vmem:[%s1638_s30 + $0x8] sm:$0x3]  ;;  %v1504_v18 = vld [vmem:[%s1929_s1 + $0x38] sm:$0xff]  }
  0x1c   : > { %1361 = vmatpush3.bf16.msra.mxu1 %v1487_v9  ;;  %v868_v41 = vrot.slane %v866_v33, 1  ;;  %v227_v43 = vshll.u32 %v1187_v35, 16  ;;  %v259_v47 = vshrl.u32 %v1660_v12, 16  ;;  %v218_v48 = vshrl.u32 %v1186_v42, 16  ;;  %1335 = vmatpush3.bf16.msra.mxu0 %v1504_v18  ;;  %v1505_v19 = vld [vmem:[%s1929_s1 + $0x30] sm:$0xff]   ;;  %v1506_v20 = vld [vmem:[%s1929_s1 + $0x28] sm:$0xff]  }
  0x1d   : > { %1362 = vmatprep.subr.bf16.mxu1 %v1560_v1  ;;  %v225_v51 = vshrl.u32 %v1187_v35, 16  ;;  %v220_v53 = vshll.u32 %v1186_v42, 16  ;;  %v261_v57 = vshll.u32 %v1660_v12, 16  ;;  %v862_v58 = vor.u32 %v861_v46, %v857_v45  ;;  %v1498_v10 = vld [vmem:[%s1638_s30 + $0xc] ss:$0 sps:$4 sm:$0x33]   ;;  %1336 = vmatprep.subr.bf16.mxu0 %v1560_v1 }
  0x1e   : > { %466 = vrot.lane.b32.xlu1 %v463_v28, %s1563_s10  ;;  %v869_v50 = vor.u32 %v868_v41, %v864_v40  ;;  %v229_v52 = vrot.slane %v227_v43, 1  ;;  %v1189_v59 = vcombine.low %v1713_v54, %v1713_v54  ;;  %v254_v61 = vshll.u32 %v1649_v6, 16  ;;  %v1499_v14 = vld [vmem:[%s1638_s30 + $0x8] ss:$0 sps:$4 sm:$0x33]   ;;  %v1508_v22 = vld [vmem:[%s1929_s1 + $0x18] sm:$0xff]  }
  0x1f   : > { %438 = vrot.lane.b32.xlu0 %v435_v27, %s1562_s9  ;;  %v222_v56 = vrot.slane %v220_v53, 1  ;;  %v263_v60 = vrot.slane %v261_v57, 1  ;;  %v252_v2 = vshrl.u32 %v1649_v6, 16  ;;  %v1188_v7 = vcombine.low %v1724_v62, %v1724_v62  ;;  %v1509_v23 = vld [vmem:[%s1929_s1 + $0x10] sm:$0xff]   ;;  %v1510_v24 = vld [vmem:[%s1929_s1 + $0x8] sm:$0xff]   ;;  %v1511_v25 = vld [vmem:[%s1929_s1] sm:$0xff]  }
  0x20   : > { %1363 = vmatpush3.bf16.msra.mxu1 %v1490_v21  ;;  %v230_v55 = vor.u32 %v229_v52, %v225_v51  ;;  %v256_v3 = vrot.slane %v254_v61, 1  ;;  %v698_v8 = vshll.u32 %v1679_v32, 16  ;;  %v696_v11 = vshrl.u32 %v1679_v32, 16  ;;  %1337 = vmatpush3.bf16.msra.mxu0 %v1505_v19  ;;  %v1507_v21 = vld [vmem:[%s1929_s1 + $0x20] sm:$0xff]  }
  0x21   : > { %1364 = vmatprep.subr.bf16.mxu1 %v1560_v1  ;;  %v223_v63 = vor.u32 %v222_v56, %v218_v48  ;;  %v264_v0 = vor.u32 %v263_v60, %v259_v47  ;;  %v691_v12 = vshll.u32 %v1478_v44, 16  ;;  %v689_v15 = vshrl.u32 %v1478_v44, 16  ;;  %1338 = vmatprep.subr.bf16.mxu0 %v1560_v1  ;;  %v201_v19 = vld [vmem:[%s1638_s30 + $0x4] sm:$0x3] }
  0x22   : > { %848 = vrot.lane.b32.xlu1 %v1679_v32, %s1561_s6  ;;  %v257_v9 = vor.u32 %v256_v3, %v252_v2  ;;  %v700_v6 = vrot.slane %v698_v8, 1  ;;  %v1565_v27 = vmov 1983009808   ;;  %v315_v29 = vlaneseq }
  0x23   : > { %464 = vrot.lane.b32.xlu0 %v456_v37, %s1563_s10  ;;  %v693_v16 = vrot.slane %v691_v12, 1 }
  0x24   : > { %1365 = vmatpush3.bf16.msra.mxu1 %v1491_v36  ;;  %v701_v13 = vor.u32 %v700_v6, %v696_v11  ;;  %1339 = vmatpush3.bf16.msra.mxu0 %v1506_v20  ;;  %v316_v35 = vshrl.u32 %v315_v29, 7 }
  0x25   : > { %1366 = vmatprep.subr.bf16.mxu1 %v1560_v1  ;;  %v694_v17 = vor.u32 %v693_v16, %v689_v15  ;;  %1340 = vmatprep.subr.bf16.mxu0 %v1560_v1 }
  0x26   : > { %844 = vrot.lane.b32.xlu1 %v463_v28, %s1562_s9  ;;  %v313_v28 = vunpack.c.l.s4 %v1565_v27  ;;  %v1495_v27 = vld [vmem:[%s1929_s1 + $0xf0] sm:$0xff]  }
  0x27   : > { %846 = vrot.lane.b32.xlu0 %v1478_v44, %s1561_s6 }
  0x28   : > { %1367 = vmatpush3.bf16.msra.mxu1 %v1492_v39  ;;  %1341 = vmatpush3.bf16.msra.mxu0 %v1507_v21  ;;  %v314_v33 = vunpack.c.0.s8 %v313_v28  ;;  %v1494_v21 = vld [vmem:[%s1929_s1 + $0xf8] sm:$0xff]  }
  0x29   : > { %1368 = vmatprep.subr.bf16.mxu1 %v1560_v1  ;;  %1342 = vmatprep.subr.bf16.mxu0 %v1560_v1 }
  0x2a   : > { %872 = vrot.lane.b32.xlu1 %v869_v50, %s1563_s10  ;;  %v1777_v38 = vsub.s32 %v314_v33, %v316_v35 }
  0x2b   : > { %842 = vrot.lane.b32.xlu0 %v456_v37, %s1562_s9 }
  0x2c   : > { %1369 = vmatpush3.bf16.msra.mxu1 %v1493_v49  ;;  %1343 = vmatpush3.bf16.msra.mxu0 %v1508_v22 }
  0x2d   : > { %1394 = vmatprep.subr.bf16.mxu1 %v1560_v1  ;;  %1344 = vmatprep.subr.bf16.mxu0 %v1560_v1 }
  0x2e   : > { %233 = vrot.lane.b32.xlu1 %v230_v55, %s1562_s9 }
  0x2f   : > { %870 = vrot.lane.b32.xlu0 %v862_v58, %s1563_s10 }
  0x30   : > { %1345 = vmatpush3.bf16.msra.mxu0 %v1509_v23  ;;  %v200_v23 = vld [vmem:[%s1638_s30] sm:$0x3] }
  0x31   : > { %1346 = vmatprep.subr.bf16.mxu0 %v1560_v1 }
  0x32   : > { %243 = vrot.lane.b32.xlu1 %v1189_v59, %s1561_s6 }
  0x33   : > { %231 = vrot.lane.b32.xlu0 %v223_v63, %s1562_s9 }
  0x34   : > { %1347 = vmatpush3.bf16.msra.mxu0 %v1510_v24 }
  0x35   : > { %1348 = vmatprep.subr.bf16.mxu0 %v1560_v1 }
  0x36   : > { %267 = vrot.lane.b32.xlu1 %v264_v0, %s1563_s10 }
  0x37   : > { %241 = vrot.lane.b32.xlu0 %v1188_v7, %s1561_s6 }
  0x38   : > { %1349 = vmatpush3.bf16.msra.mxu0 %v1511_v25 }
  0x39   : > { %1374 = vmatprep.subr.bf16.mxu0 %v1560_v1 }
  0x3a   : > { %670 = vrot.lane.b32.xlu1 %v264_v0, %s1562_s9 }
  0x3b   : > { %265 = vrot.lane.b32.xlu0 %v257_v9, %s1563_s10 }
  0x3e   : > { %680 = vrot.lane.b32.xlu1 %v1498_v10, %s1561_s6 }
  0x3f   : > { %668 = vrot.lane.b32.xlu0 %v257_v9, %s1562_s9  ;;  %s1174_s9 = sshll.u32 %s1542_s12, 1 }
  0x40   : > { %p188_p6 = scmp.lt.s32.totalorder %s1174_s9, 3 }
  0x42   : > { %704 = vrot.lane.b32.xlu1 %v701_v13, %s1563_s10  ;;  %s1947_s9 = smov (!%p188_p6, %s1174_s9), 3 }
  0x43   : > { %678 = vrot.lane.b32.xlu0 %v1499_v14, %s1561_s6 }
  0x47   : > { %702 = vrot.lane.b32.xlu0 %v694_v17, %s1563_s10  ;;  %s1175_s10 = sshll.u32 %s1947_s9, 1 }
  0x48   : > { %s192_s19 = sadd.s32 %s1176_s11, %s1175_s10 }
  0x49   : > { %s1177_s20 = sshll.u32 %s192_s19, 1 }
  0x4a   : > { %s194_s23 = scalar_lea.vmem %s1931_s3, %s1177_s20 }
  0x88   : > { %v441_v26 = vpop.permute.xlu1 %440 }
  0x8c   : > { %v443_v30 = vpop.permute.xlu1 %442 }
  0x8d   : > { %v437_v32 = vpop.permute.xlu0 %436 }
  0x8e   : > { %v470_v39 = vsel %vm269_vm1, %v1683_v34, %v437_v32 }
  0x8f   : > { %v475_v46 = vsel %vm276_vm3, %v470_v39, %v441_v26 }
  0x90   : > { %v467_v36 = vpop.permute.xlu1 %466 }
  0x91   : > { %v439_v37 = vpop.permute.xlu0 %438 }
  0x92   : > { %v473_v40 = vsel %vm269_vm1, %v1675_v31, %v439_v37  ;;  %v1496_v37 = vld [vmem:[%s1929_s1 + $0xe8] sm:$0xff]  }
  0x93   : > { %v477_v41 = vsel %vm276_vm3, %v473_v40, %v443_v30 }
  0x94   : > { %v849_v42 = vpop.permute.xlu1 %848  ;;  %v481_v43 = vsel %vm281_vm2, %v477_v41, %v467_v36 }
  0x95   : > { %v498_v44 = vrot.slane %v481_v43, %v1777_v38  ;;  %v465_v45 = vpop.permute.xlu0 %464 }
  0x96   : > { %v479_v47 = vsel %vm281_vm2, %v475_v46, %v465_v45 }
  0x97   : > { %v522_v48 = vshrl.u32 %v498_v44, 16  ;;  %v525_v34 = vshll.u32 %v498_v44, 16  ;;  %v490_v49 = vrot.slane %v479_v47, %v1777_v38  ;;  %v499_v50 = vcombine.high %v498_v44, %v498_v44  ;;  %v1497_v47 = vld [vmem:[%s1929_s1 + $0xe0] sm:$0xff]  }
  0x98   : > { %v845_v31 = vpop.permute.xlu1 %844 }
  0x99   : > { %v524_v51 = vrot.slane %v522_v48, 6  ;;  %v527_v52 = vrot.slane %v525_v34, 7  ;;  %v491_v53 = vcombine.high %v490_v49, %v490_v49  ;;  %v847_v55 = vpop.permute.xlu0 %846  ;;  %v508_v56 = vshrl.u32 %v490_v49, 16  ;;  %v1512_v48 = vld [vmem:[%s1929_s1 + $0xb8] sm:$0xff]  }
  0x9a   : > { %v511_v57 = vshll.u32 %v490_v49, 16  ;;  %v531_v60 = vshll.u32 %v499_v50, 16  ;;  %v879_v12 = vsel %vm269_vm1, %v1645_v5, %v845_v31 }
  0x9b   : > { %v528_v58 = vor.u32 %v527_v52, %v524_v51  ;;  %v510_v61 = vrot.slane %v508_v56, 6  ;;  %v517_v0 = vshll.u32 %v491_v53, 16  ;;  %v883_v18 = vsel %vm276_vm3, %v879_v12, %v849_v42  ;;  %v1513_v56 = vld [vmem:[%s1929_s1 + $0xb0] sm:$0xff]  }
  0x9c   : > { %v873_v59 = vpop.permute.xlu1 %872  ;;  %v513_v63 = vrot.slane %v511_v57, 7  ;;  %v533_v10 = vrot.slane %v531_v60, 7 }
  0x9d   : > { %v843_v2 = vpop.permute.xlu0 %842  ;;  %v529_v3 = vrot.slane %v528_v58, 2  ;;  %v519_v6 = vrot.slane %v517_v0, 7  ;;  %v887_v24 = vsel %vm281_vm2, %v883_v18, %v873_v59 }
  0x9e   : > { %v514_v7 = vor.u32 %v513_v63, %v510_v61  ;;  %v876_v13 = vsel %vm269_vm1, %v1642_v4, %v843_v2  ;;  %v904_v29 = vrot.slane %v887_v24, %v1777_v38  ;;  %v1501_v61 = vld [vmem:[%s1929_s1 + $0xd0] sm:$0xff]   ;;  %v1514_v63 = vld [vmem:[%s1929_s1 + $0xa8] sm:$0xff]  }
  0x9f   : > { %v534_v16 = vsel %vm1789_vm10, %v529_v3, %v533_v10  ;;  %v881_v5 = vsel %vm276_vm3, %v876_v13, %v847_v55  ;;  %v1500_v55 = vld [vmem:[%s1929_s1 + $0xd8] sm:$0xff]  }
  0xa0   : > { %v234_v9 = vpop.permute.xlu1 %233  ;;  %v515_v11 = vrot.slane %v514_v7, 2  ;;  %v921_v40 = vshrl.u32 %v904_v29, 16  ;;  %v924_v44 = vshll.u32 %v904_v29, 16  ;;  %v905_v34 = vcombine.high %v904_v29, %v904_v29 }
  0xa1   : > { %v871_v14 = vpop.permute.xlu0 %870  ;;  %v275_v25 = vsel %vm269_vm1, %v201_v19, %v234_v9 }
  0xa2   : > { %v520_v15 = vsel %vm1789_vm10, %v515_v11, %v519_v6  ;;  %v885_v26 = vsel %vm281_vm2, %v881_v5, %v871_v14  ;;  %v923_v49 = vrot.slane %v921_v40, 6  ;;  %v926_v53 = vrot.slane %v924_v44, 7  ;;  %v1502_v11 = vld [vmem:[%s1929_s1 + $0xc8] sm:$0xff]   ;;  %v1515_v6 = vld [vmem:[%s1929_s1 + $0xa0] sm:$0xff]  }
  0xa3   : > { %v552_v17 = vcombine.low %v520_v15, %v534_v16  ;;  %v896_v35 = vrot.slane %v885_v26, %v1777_v38  ;;  %v930_v60 = vshll.u32 %v905_v34, 16  ;;  %v1503_v16 = vld [vmem:[%s1929_s1 + $0xc0] sm:$0xff]  }
  0xa4   : > { %v244_v20 = vpop.permute.xlu1 %243  ;;  %v927_v59 = vor.u32 %v926_v53, %v923_v49  ;;  %v1519_v26 = vld [vmem:[%s1929_s1 + $0x80] sm:$0xff]  }
  0xa5   : > { %v559_v4 = vrot.slane %v552_v17, %v1777_v38  ;;  %v232_v22 = vpop.permute.xlu0 %231  ;;  %v280_v30 = vsel %vm276_vm3, %v275_v25, %v244_v20  ;;  %v907_v42 = vshrl.u32 %v896_v35, 16  ;;  %v910_v43 = vshll.u32 %v896_v35, 16  ;;  %v1516_v17 = vld [vmem:[%s1929_s1 + $0x98] sm:$0xff]   ;;  %v1517_v20 = vld [vmem:[%s1929_s1 + $0x90] sm:$0xff]  }
  0xa6   : > { %v272_v28 = vsel %vm269_vm1, %v200_v23, %v232_v22  ;;  %v897_v50 = vcombine.high %v896_v35, %v896_v35  ;;  %v928_v9 = vrot.slane %v927_v59, 2  ;;  %v932_v10 = vrot.slane %v930_v60, 7 }
  0xa7   : > { %1371 = vmatmul.mubr.bf16.vlgmr.msra.gmra.mxu1 %v559_v4  ;;  %v909_v51 = vrot.slane %v907_v42, 6  ;;  %v912_v52 = vrot.slane %v910_v43, 7 }
  0xa8   : > { %1395 = vmatpush3.bf16.msra.mxu1 %v1494_v21  ;;  %1410 = vmatprep.mubr.msk.bf16.mxu1 %vm1564_vm0, %v1560_v1  ;;  %v268_v33 = vpop.permute.xlu1 %267  ;;  %v916_v58 = vshll.u32 %v897_v50, 16  ;;  %v933_v13 = vsel %vm1789_vm10, %v928_v9, %v932_v10 }
  0xa9   : > { %1396 = vmatprep.subr.bf16.mxu1 %v1560_v1  ;;  %v242_v32 = vpop.permute.xlu0 %241  ;;  %v285_v39 = vsel %vm281_vm2, %v280_v30, %v268_v33  ;;  %v913_v57 = vor.u32 %v912_v52, %v909_v51 }
  0xaa   : > { %v278_v36 = vsel %vm276_vm3, %v272_v28, %v242_v32  ;;  %v918_v7 = vrot.slane %v916_v58, 7  ;;  %v1192_v28 = vld [vmem:[%s1930_s2] ss:$0 sm:$0xff] }
  0xab   : > { %v914_v3 = vrot.slane %v913_v57, 2 }
  0xac   : > { %1397 = vmatpush3.bf16.msra.mxu1 %v1495_v27  ;;  %v671_v0 = vpop.permute.xlu1 %670 }
  0xad   : > { %1398 = vmatprep.subr.bf16.mxu1 %v1560_v1  ;;  %v266_v41 = vpop.permute.xlu0 %265  ;;  %v919_v12 = vsel %vm1789_vm10, %v914_v3, %v918_v7  ;;  %v711_v8 = vsel %vm269_vm1, %v1713_v54, %v671_v0  ;;  %v1518_v54 = vld [vmem:[%s1929_s1 + $0x88] sm:$0xff]  }
  0xae   : > { %v283_v45 = vsel %vm281_vm2, %v278_v36, %v266_v41  ;;  %v951_v18 = vcombine.low %v919_v12, %v933_v13 }
  0xaf   : > { %v311_v46 = vcombine.low %v283_v45, %v285_v39 }
  0xb0   : > { %1399 = vmatpush3.bf16.msra.mxu1 %v1496_v37  ;;  %v681_v14 = vpop.permute.xlu1 %680  ;;  %v958_v21 = vrot.slane %v951_v18, %v1777_v38 }
  0xb1   : > { %1400 = vmatprep.subr.bf16.mxu1 %v1560_v1  ;;  %v318_v31 = vrot.slane %v311_v46, %v1777_v38  ;;  %v669_v2 = vpop.permute.xlu0 %668  ;;  %v715_v5 = vsel %vm276_vm3, %v711_v8, %v681_v14 }
  0xb2   : > { %v708_v19 = vsel %vm269_vm1, %v1724_v62, %v669_v2 }
  0xb3   : > { %1351 = vmatmul.mubr.bf16.vlgmr.msra.gmra.mxu0 %v318_v31 }
  0xb4   : > { %1401 = vmatpush3.bf16.msra.mxu1 %v1497_v47  ;;  %1375 = vmatpush3.bf16.msra.mxu0 %v1512_v48  ;;  %v705_v22 = vpop.permute.xlu1 %704 }
  0xb5   : > { %1402 = vmatprep.subr.bf16.mxu1 %v1560_v1  ;;  %1376 = vmatprep.subr.bf16.mxu0 %v1560_v1  ;;  %v679_v15 = vpop.permute.xlu0 %678  ;;  %v719_v62 = vsel %vm281_vm2, %v715_v5, %v705_v22 }
  0xb6   : > { %1390 = vmatprep.mubr.msk.bf16.mxu0 %vm1564_vm0, %v1560_v1  ;;  %v713_v4 = vsel %vm276_vm3, %v708_v19, %v679_v15 }
  0xb8   : > { %1403 = vmatpush3.bf16.msra.mxu1 %v1500_v55  ;;  %1377 = vmatpush3.bf16.msra.mxu0 %v1513_v56 }
  0xb9   : > { %1404 = vmatprep.subr.bf16.mxu1 %v1560_v1  ;;  %1378 = vmatprep.subr.bf16.mxu0 %v1560_v1  ;;  %v703_v23 = vpop.permute.xlu0 %702 }
  0xba   : > { %v717_v24 = vsel %vm281_vm2, %v713_v4, %v703_v23 }
  0xbb   : > { %v739_v25 = vcombine.low %v717_v24, %v719_v62 }
  0xbc   : > { %1405 = vmatpush3.bf16.msra.mxu1 %v1501_v61  ;;  %1379 = vmatpush3.bf16.msra.mxu0 %v1514_v63 }
  0xbd   : > { %1406 = vmatprep.subr.bf16.mxu1 %v1560_v1  ;;  %1380 = vmatprep.subr.bf16.mxu0 %v1560_v1  ;;  %v746_v27 = vrot.slane %v739_v25, %v1777_v38 }
  0xc0   : > { %1407 = vmatpush3.bf16.msra.mxu1 %v1502_v11  ;;  %1381 = vmatpush3.bf16.msra.mxu0 %v1515_v6 }
  0xc1   : > { %1408 = vmatprep.subr.bf16.mxu1 %v1560_v1  ;;  %1382 = vmatprep.subr.bf16.mxu0 %v1560_v1 }
  0xc4   : > { %1409 = vmatpush3.bf16.msra.mxu1 %v1503_v16  ;;  %1383 = vmatpush3.bf16.msra.mxu0 %v1516_v17 }
  0xc5   : > { %1384 = vmatprep.subr.bf16.mxu0 %v1560_v1 }
  0xc7   : > { %1411 = vmatmul.mubr.bf16.vlgmr.msra.gmra.mxu1 %v958_v21 }
  0xc8   : > { %1385 = vmatpush3.bf16.msra.mxu0 %v1517_v20 }
  0xc9   : > { %1386 = vmatprep.subr.bf16.mxu0 %v1560_v1 }
  0xcc   : > { %1387 = vmatpush3.bf16.msra.mxu0 %v1518_v54 }
  0xcd   : > { %1388 = vmatprep.subr.bf16.mxu0 %v1560_v1 }
  0xd0   : > { %1389 = vmatpush3.bf16.msra.mxu0 %v1519_v26 }
  0xd3   : > { %1391 = vmatmul.mubr.bf16.vlgmr.msra.gmra.mxu0 %v746_v27 }
 0x167   : > { %v643_v29 = vpop.f32.mrf.mxu1 }
 0x168   : > { %v644_v30 = vadd.f32 %v1192_v28, %v643_v29 }
 0x169   : > { %v1372_v32 = vpop.f32.mrf.mxu1 }
 0x16a   : > { %v649_v33 = vmax.f32 %v644_v30, 0.0 }
 0x16b   : > { %v646_v35 = vpop.f32.mrf.mxu1 }
 0x16c   : > { %v651_v36 = vcombine.high %v649_v33, %v649_v33 }
 0x16d   : > { %v1373_v37 = vpop.f32.mrf.mxu1 }
 0x16e   : > { %v1462_v39 = vpack.i.bf16 %v651_v36, %v649_v33 }
 0x170   : > { %1463 = vrot.lane.b32.xlu0 %v1462_v39, %s1566_s8 }
 0x173   : > { %v402_v40 = vpop.f32.mrf.mxu0 }
 0x174   : > { %v403_v1 = vadd.f32 %v1192_v28, %v402_v40 }
 0x175   : > { %v1352_v41 = vpop.f32.mrf.mxu0 }
 0x176   : > { %v408_v55 = vmax.f32 %v403_v1, 0.0 }
 0x177   : > { %v405_v38 = vpop.f32.mrf.mxu0 }
 0x178   : > { %v410_v57 = vcombine.high %v408_v55, %v408_v55 }
 0x179   : > { %v1353_v42 = vpop.f32.mrf.mxu0 }
 0x187   : > { %v1042_v43 = vpop.f32.mrf.mxu1 }
 0x188   : > { %v1043_v44 = vadd.f32 %v1192_v28, %v1042_v43 }
 0x189   : > { %v1412_v45 = vpop.f32.mrf.mxu1 }
 0x18a   : > { %v1048_v46 = vmax.f32 %v1043_v44, 0.0 }
 0x18b   : > { %v1045_v47 = vpop.f32.mrf.mxu1 }
 0x18c   : > { %v1050_v48 = vcombine.high %v1048_v46, %v1048_v46 }
 0x18d   : > { %v1413_v34 = vpop.f32.mrf.mxu1 }
 0x18e   : > { %v1467_v49 = vpack.i.bf16 %v1050_v48, %v1048_v46 }
 0x190   : > { %1468 = vrot.lane.b32.xlu1 %v1467_v49, %s1566_s8 }
 0x193   : > { %v830_v31 = vpop.f32.mrf.mxu0 }
 0x194   : > { %v831_v50 = vadd.f32 %v1192_v28, %v830_v31 }
 0x195   : > { %v1392_v51 = vpop.f32.mrf.mxu0 }
 0x196   : > { %v836_v2 = vmax.f32 %v831_v50, 0.0 }
 0x197   : > { %v833_v52 = vpop.f32.mrf.mxu0 }
 0x198   : > { %v838_v7 = vcombine.high %v836_v2, %v836_v2 }
 0x199   : > { %v1393_v53 = vpop.f32.mrf.mxu0 }
 0x1e2   : > { %v1464_v56 = vpop.permute.xlu0 %1463 }
 0x1e3   : > { %v1466_v58 = vunpack.i.h.bf16 %v1464_v56  ;;  %v1465_v59 = vunpack.i.l.bf16 %v1464_v56 }
 0x1e5   : > { %v659_v60 = vsel %vm658_vm11, %v408_v55, %v1465_v59  ;;  %v660_v61 = vsel %vm658_vm11, %v410_v57, %v1466_v58 }
 0x1e6   : > { %v1059_v63 = vpack.c.bf16 %v659_v60, %v659_v60  ;;  %v1061_v0 = vpack.c.bf16 %v660_v61, %v660_v61 }
 0x1e8   : > { %1064 = vst.msk [vmem:[%s194_s23] sm:$0x3] %vm1063_vm12, %v1059_v63  ;;  %1066 = vst.msk [vmem:[%s194_s23 + $0x4] sm:$0x3] %vm1063_vm12, %v1061_v0 }
 0x202   : > { %v1469_v3 = vpop.permute.xlu1 %1468 }
 0x203   : > { %v1471_v9 = vunpack.i.h.bf16 %v1469_v3  ;;  %v1470_v10 = vunpack.i.l.bf16 %v1469_v3 }
 0x205   : > { %v1057_v11 = vsel %vm658_vm11, %v836_v2, %v1470_v10  ;;  %v1058_v6 = vsel %vm658_vm11, %v838_v7, %v1471_v9 }
 0x206   : > { %v1060_v12 = vpack.c.bf16 %v1057_v11, %v1057_v11  ;;  %v1062_v13 = vpack.c.bf16 %v1058_v6, %v1058_v6 }
 0x208   : > { %1065 = vst.msk [vmem:[%s194_s23 + $0x2] sm:$0x3] %vm1063_vm12, %v1060_v12  ;;  %1067 = vst.msk [vmem:[%s194_s23 + $0x6] sm:$0x3] %vm1063_vm12, %v1062_v13 }
 0x209 PF: > { %s13_s16 = sadd.s32 1, %s1558_s16   ;;  %s1934_s12 = smov %s1550_s14 }
 0x20a   : > { %p10_p7 = scmp.ge.s32.totalorder %s13_s16, 6   ;;  %s1935_s13 = smov %s1554_s15 }
 0x20b   : > { %s1936_s14 = smov %s1939_s17  ;;  %s1937_s15 = smov %s1943_s18 }
 0x20c   :  { %12 = sbr.rel (!%p10_p7) target bundleno = 3 (0x3), region = 68 }

// kernel: fc_discriminator_forward.15
= control target key start
LH: loop header
LB: loop body
LE: loop exit
PB: predicated region body
PF: predicated region fallthrough
CT: control target
= control target key end

     0   :  { %s1973_s12 = smov 0   ;;  %s1975_s13 = smov 0   ;;  %s2439_s0 = inlined_call_operand.vmem [shape: bf16[2,10,10,16], index: 0, kind: input, shape index: {}]   ;;  %s2440_s1 = inlined_call_operand.vmem [shape: bf16[4,64,4], index: 1, kind: input, shape index: {}]   ;;  %s2441_s2 = inlined_call_operand.vmem [shape: f32[1,4], index: 2, kind: input, shape index: {}]   ;;  %s2442_s3 = inlined_call_operand.vmem [shape: f32[2,8,2,8,8], index: 3, kind: output, shape index: {}]  }
   0x1   :  { %s1977_s14 = smov 0   ;;  %s1979_s15 = smov 0  }
   0x2   :  { %s1981_s16 = smov 0  }
   0x3 LB: > { %s22_s17 = sadd.s32 1, %s1939_s14  ;;  %s25_s18 = sadd.s32 1, %s1943_s15  ;;  %s1947_s16 = sphi %s1981_s16, %s13_s16   ;;  %s1943_s15 = sphi %s1979_s15, %s2448_s15   ;;  %s1939_s14 = sphi %s1977_s14, %s2447_s14   ;;  %s1935_s13 = sphi %s1975_s13, %s2446_s13   ;;  %s1931_s12 = sphi %s1973_s12, %s2445_s12  }
   0x4   : > { %p23_p0 = scmp.ge.s32.totalorder %s22_s17, 2  ;;  %p1516_p1 = scmp.ge.s32.totalorder %s1947_s16, 1 }
   0x5   : > { %p151_p2 = scmp.lt.s32.totalorder %s1947_s16, 5 }
   0x6   : > { %s2450_s17 = smov (%p23_p0, %s22_s17), 0  ;;  %s2452_s18 = smov (!%p23_p0, %s25_s18), %s1943_s15 }
   0x7   : > { %p152_p3 = pnand %p1516_p1, %p151_p2  ;;  %p27_p4 = scmp.ge.s32.totalorder %s2452_s18, 2 }
   0x8   : > { %p180_p5 = scmp.lt.s32.totalorder (!%p152_p3), %s1935_s13, 1  ;;  %s1677_s19 = sshll.u32 (!%p152_p3), %s1931_s12, 5 }
   0x9   : > { %s2454_s18 = smov (%p27_p4, %s2452_s18), 0  ;;  %155 = sbr.rel (%p152_p3) target bundleno = 552 (0x228), region = 32 }
   0xa   : > { %s1949_s25 = smov (!%p152_p3), 32   ;;  %s1950_s28 = smov (!%p152_p3), 16  }
   0xb   : > { %s1951_s6 = smov (!%p152_p3), 48   ;;  %s1952_s22 = smov (!%p152_p3), 4  }
   0xe   : > { %s2456_s13 = smov (!%p180_p5, %s1935_s13), 1  ;;  %v1825_v35 = vld [vmem:[%s2440_s1 + $0x38] sm:$0xff]   ;;  %v1826_v56 = vld [vmem:[%s2440_s1 + $0x30] sm:$0xff]   ;;  %vm345_vm0 = vcmask 130048   ;;  %vm358_vm1 = vcmask 261120   ;;  %vm367_vm2 = vcmask 392192  }
   0xf   : > { %s1752_s20 = smul.u32 80, %s2456_s13  ;;  %1716 = vmatprep.subr.bf16.mxu1 %v1825_v35  ;;  %vm661_vm3 = vsmask.f32 3328  ;;  %vm662_vm4 = vsmask.f32 7440  ;;  %vm425_vm6 = vcmask 523264  }
  0x10   : > { %1717 = vmatpush3.bf16.msra.mxu1 %v1825_v35  ;;  %vm2276_vm5 = vmor %vm661_vm3, %vm662_vm4  ;;  %vm854_vm7 = vcmask 31744   ;;  %vm1403_vm8 = vcmask 64512  }
  0x11   : > { %s184_s23 = scalar_lea.vmem %s2439_s0, %s1752_s20  ;;  %1718 = vmatprep.subr.bf16.mxu1 %v1826_v56 }
  0x12   : > { %s2012_s24 = scalar_lea.vmem %s184_s23, %s1677_s19  ;;  %s1518_s23 = sshll.u32 %s1931_s12, 2 }
  0x13   : > { %v2015_v0 = vld [vmem:[%s2012_s24 + $0x10] sm:$0xf]  ;;  %v1532_v1 = vld [vmem:[%s2012_s24 + $0x14] sm:$0x1]  ;;  %v2019_v2 = vld [vmem:[%s2012_s24 + $0x8] sm:$0xf] }
  0x14   : > { %v2022_v3 = vcombine.low %v2015_v0, %v1532_v1  ;;  %v1531_v4 = vld [vmem:[%s2012_s24 + $0xc] sm:$0x1]  ;;  %v2026_v5 = vld [vmem:[%s2012_s24 + $0x20] sm:$0xf]  ;;  %v1534_v6 = vld [vmem:[%s2012_s24 + $0x24] sm:$0x1]  ;;  %1719 = vmatpush3.bf16.msra.mxu1 %v1826_v56 }
  0x15   : > { %v2030_v7 = vcombine.low %v2019_v2, %v1531_v4  ;;  %v2033_v8 = vld [vmem:[%s2012_s24 + $0x18] sm:$0xf]  ;;  %v1533_v9 = vld [vmem:[%s2012_s24 + $0x1c] sm:$0x1]  ;;  %v2037_v10 = vld [vmem:[%s2012_s24 + $0x14] sm:$0x1]  ;;  %v2042_v11 = vcombine.low %v2026_v5, %v1534_v6 }
  0x16   : > { %563 = vrot.lane.b32.xlu1 %v2022_v3, %s1949_s25  ;;  %v507_v12 = vld [vmem:[%s2012_s24 + $0x10] sm:$0xe]  ;;  %v2046_v13 = vld [vmem:[%s2012_s24 + $0x4] sm:$0x1]  ;;  %v2051_v14 = vcombine.low %v2033_v8, %v1533_v9  ;;  %v505_v16 = vld [vmem:[%s2012_s24] sm:$0xe] }
  0x17   : > { %561 = vrot.lane.b32.xlu0 %v2030_v7, %s1949_s25  ;;  %v1566_v15 = vcombine.low %v507_v12, %v2037_v10  ;;  %v2056_v17 = vld [vmem:[%s2012_s24 + $0x1c] sm:$0x1]  ;;  %v1564_v18 = vcombine.low %v505_v16, %v2046_v13  ;;  %v508_v19 = vld [vmem:[%s2012_s24 + $0x18] sm:$0xe]  ;;  %v2061_v20 = vld [vmem:[%s2012_s24 + $0xc] sm:$0x1] }
  0x18   : > { %v1567_v23 = vcombine.low %v508_v19, %v2056_v17  ;;  %v506_v24 = vld [vmem:[%s2012_s24 + $0x8] sm:$0xe]  ;;  %v1561_v28 = vld [vmem:[%s2012_s24 + $0x10] sm:$0xe]  ;;  %v1563_v34 = vld [vmem:[%s2012_s24 + $0x20] sm:$0xe] }
  0x19   : > { %v540_v21 = vshrl.u32 %v1566_v15, 16  ;;  %v542_v22 = vshll.u32 %v1566_v15, 16  ;;  %v526_v25 = vshrl.u32 %v1564_v18, 16  ;;  %v528_v26 = vshll.u32 %v1564_v18, 16  ;;  %v1560_v29 = vld [vmem:[%s2012_s24 + $0x8] sm:$0xe] }
  0x1a   : > { %567 = vrot.lane.b32.xlu1 %v2042_v11, %s1949_s25  ;;  %v1565_v27 = vcombine.low %v506_v24, %v2061_v20  ;;  %v547_v31 = vshrl.u32 %v1567_v23, 16  ;;  %v549_v32 = vshll.u32 %v1567_v23, 16  ;;  %v1569_v33 = vcombine.low %v1561_v28, %v1532_v1  ;;  %v1562_v40 = vld [vmem:[%s2012_s24 + $0x18] sm:$0xe]  ;;  %v1827_v1 = vld [vmem:[%s2440_s1 + $0x28] sm:$0xff]   ;;  %p188_p6 = scmp.lt.s32.totalorder %s1518_s23, 7 }
  0x1b   : > { %565 = vrot.lane.b32.xlu0 %v2051_v14, %s1949_s25  ;;  %v544_v30 = vrot.slane %v542_v22, 1  ;;  %v530_v36 = vrot.slane %v528_v26, 1  ;;  %v1568_v39 = vcombine.low %v1560_v29, %v1531_v4  ;;  %v1571_v50 = vcombine.low %v1563_v34, %v1534_v6  ;;  %1720 = vmatprep.subr.bf16.mxu1 %v1827_v1  ;;  %v1639_v12 = vld [vmem:[%s2012_s24 + $0x18] sm:$0xe]  ;;  %v1638_v15 = vld [vmem:[%s2012_s24 + $0x10] sm:$0xe] }
  0x1c   : > { %v533_v37 = vshrl.u32 %v1565_v27, 16  ;;  %v535_v38 = vshll.u32 %v1565_v27, 16  ;;  %v551_v42 = vrot.slane %v549_v32, 1  ;;  %v591_v43 = vshll.u32 %v1569_v33, 16  ;;  %1721 = vmatpush3.bf16.msra.mxu1 %v1827_v1  ;;  %v1607_v16 = vld [vmem:[%s2012_s24 + $0x1c] sm:$0x1] }
  0x1d   : > { %v545_v41 = vor.u32 %v544_v30, %v540_v21  ;;  %v531_v44 = vor.u32 %v530_v36, %v526_v25  ;;  %v589_v46 = vshrl.u32 %v1569_v33, 16  ;;  %v584_v47 = vshll.u32 %v1568_v39, 16  ;;  %v1606_v19 = vld [vmem:[%s2012_s24 + $0x14] sm:$0x1]  ;;  %v2101_v21 = vld [vmem:[%s2012_s24 + $0x18] sm:$0xf] }
  0x1e   : > { %v537_v45 = vrot.slane %v535_v38, 1  ;;  %v552_v48 = vor.u32 %v551_v42, %v547_v31  ;;  %v593_v49 = vrot.slane %v591_v43, 1  ;;  %v1570_v51 = vcombine.low %v1562_v40, %v1533_v9  ;;  %v1830_v9 = vld [vmem:[%s2440_s1 + $0x20] sm:$0xff]   ;;  %v1641_v23 = vld [vmem:[%s2012_s24 + $0x28] sm:$0xe]  ;;  %v2133_v38 = vld [vmem:[%s2440_s1 + $0x78] sm:$0xff]  }
  0x1f   : > { %557 = vrot.lane.b32.xlu1 %v545_v41, %s1950_s28  ;;  %553 = vrot.lane.b32.xlu0 %v531_v44, %s1950_s28  ;;  %v582_v53 = vshrl.u32 %v1568_v39, 16  ;;  %v586_v54 = vrot.slane %v584_v47, 1  ;;  %v605_v55 = vshll.u32 %v1571_v50, 16  ;;  %v603_v59 = vshrl.u32 %v1571_v50, 16  ;;  %v2105_v24 = vld [vmem:[%s2012_s24 + $0x10] sm:$0xf] }
  0x20   : > { %v538_v52 = vor.u32 %v537_v45, %v533_v37  ;;  %v598_v57 = vshll.u32 %v1570_v51, 16  ;;  %v594_v58 = vor.u32 %v593_v49, %v589_v46  ;;  %v596_v62 = vshrl.u32 %v1570_v51, 16  ;;  %1722 = vmatprep.subr.bf16.mxu1 %v1830_v9  ;;  %v1640_v25 = vld [vmem:[%s2012_s24 + $0x20] sm:$0xe]  ;;  %v1609_v27 = vld [vmem:[%s2012_s24 + $0x2c] sm:$0x1] }
  0x21   : > { %v607_v60 = vrot.slane %v605_v55, 1  ;;  %v587_v61 = vor.u32 %v586_v54, %v582_v53  ;;  %1723 = vmatpush3.bf16.msra.mxu1 %v1830_v9  ;;  %v1643_v18 = vcombine.low %v1639_v12, %v1607_v16  ;;  %v1642_v22 = vcombine.low %v1638_v15, %v1606_v19  ;;  %v2109_v26 = vld [vmem:[%s2012_s24] sm:$0xf]  ;;  %v2113_v28 = vld [vmem:[%s2012_s24 + $0x8] sm:$0xf]  ;;  %s2458_s23 = smov (!%p188_p6, %s1518_s23), 7 }
  0x22   : > { %v600_v63 = vrot.slane %v598_v57, 1  ;;  %v2117_v29 = vcombine.low %v2101_v21, %v1607_v16  ;;  %v1645_v30 = vcombine.low %v1641_v23, %v1609_v27  ;;  %v1608_v31 = vld [vmem:[%s2012_s24 + $0x24] sm:$0x1]  ;;  %v2122_v33 = vcombine.low %v2105_v24, %v1606_v19  ;;  %v2125_v34 = vld [vmem:[%s2012_s24 + $0x28] sm:$0xf]  ;;  %1740 = vmatprep.subr.bf16.mxu1 %v2133_v38  ;;  %v1837_v19 = vld [vmem:[%s2440_s1 + $0x18] sm:$0xff]  }
  0x23   : > { %559 = vrot.lane.b32.xlu1 %v552_v48, %s1950_s28  ;;  %555 = vrot.lane.b32.xlu0 %v538_v52, %s1950_s28  ;;  %v608_v4 = vor.u32 %v607_v60, %v603_v59  ;;  %v1139_v32 = vshll.u32 %v1643_v18, 16  ;;  %v1644_v35 = vcombine.low %v1640_v25, %v1608_v31  ;;  %v1132_v36 = vshll.u32 %v1642_v22, 16  ;;  %v2128_v37 = vld [vmem:[%s2012_s24 + $0x20] sm:$0xf]  ;;  %v2136_v39 = vld [vmem:[%s2012_s24 + $0x10] sm:$0xf] }
  0x24   : > { %v601_v6 = vor.u32 %v600_v63, %v596_v62  ;;  %v2140_v40 = vcombine.low %v2109_v26, %v2046_v13  ;;  %v2144_v41 = vcombine.low %v2113_v28, %v2061_v20  ;;  %v2147_v42 = vld [vmem:[%s2012_s24 + $0x18] sm:$0xf]  ;;  %v2152_v43 = vcombine.low %v2125_v34, %v1609_v27  ;;  %1704 = vmatprep.subr.bf16.mxu0 %v1837_v19  ;;  %s1519_s12 = sshll.u32 %s2458_s23, 1  ;;  %s1520_s24 = sshll.u32 %s2456_s13, 4 }
  0x25   : > { %v1137_v44 = vshrl.u32 %v1643_v18, 16  ;;  %v1141_v45 = vrot.slane %v1139_v32, 1  ;;  %v1153_v46 = vshll.u32 %v1645_v30, 16  ;;  %v2158_v13 = vcombine.low %v2128_v37, %v1608_v31  ;;  %1705 = vmatpush3.bf16.msra.mxu0 %v1837_v19  ;;  %s192_s26 = sadd.s32 %s1520_s24, %s1519_s12 }
  0x26   : > { %v1130_v20 = vshrl.u32 %v1642_v22, 16  ;;  %v1134_v47 = vrot.slane %v1132_v36, 1  ;;  %v1146_v48 = vshll.u32 %v1644_v35, 16  ;;  %v2162_v49 = vcombine.low %v2136_v39, %v2037_v10  ;;  %v1838_v22 = vld [vmem:[%s2440_s1 + $0x10] sm:$0xff]   ;;  %s1521_s27 = sshll.u32 %s192_s26, 3 }
  0x27   : > { %611 = vrot.lane.b32.xlu1 %v594_v58, %s1951_s6  ;;  %609 = vrot.lane.b32.xlu0 %v587_v61, %s1951_s6  ;;  %v2166_v50 = vcombine.low %v2147_v42, %v2056_v17  ;;  %v1142_v51 = vor.u32 %v1141_v45, %v1137_v44  ;;  %v1151_v52 = vshrl.u32 %v1645_v30, 16  ;;  %v1155_v53 = vrot.slane %v1153_v46, 1  ;;  %v1839_v30 = vld [vmem:[%s2440_s1 + $0x8] sm:$0xff]   ;;  %v1840_v46 = vld [vmem:[%s2440_s1] sm:$0xff]  }
  0x28   : > { %v251_v54 = vshll.u32 %v2144_v41, 16  ;;  %v1135_v55 = vor.u32 %v1134_v47, %v1130_v20  ;;  %v1144_v56 = vshrl.u32 %v1644_v35, 16  ;;  %v1148_v57 = vrot.slane %v1146_v48, 1  ;;  %1706 = vmatprep.subr.bf16.mxu0 %v1838_v22 }
  0x29   : > { %v244_v10 = vshll.u32 %v2140_v40, 16  ;;  %v1156_v17 = vor.u32 %v1155_v53, %v1151_v52  ;;  %v265_v60 = vshll.u32 %v2166_v50, 16  ;;  %v242_v62 = vshrl.u32 %v2140_v40, 16  ;;  %1707 = vmatpush3.bf16.msra.mxu0 %v1838_v22 }
  0x2a   : > { %v253_v59 = vrot.slane %v251_v54, 1  ;;  %v258_v1 = vshll.u32 %v2162_v49, 16  ;;  %v256_v15 = vshrl.u32 %v2162_v49, 16  ;;  %v1540_v25 = vcombine.low %v2015_v0, %v2015_v0  ;;  %1708 = vmatprep.subr.bf16.mxu0 %v1839_v30 }
  0x2b   : > { %615 = vrot.lane.b32.xlu1 %v608_v4, %s1951_s6  ;;  %613 = vrot.lane.b32.xlu0 %v601_v6, %s1951_s6  ;;  %v246_v63 = vrot.slane %v244_v10, 1  ;;  %v267_v9 = vrot.slane %v265_v60, 1  ;;  %v319_v27 = vshll.u32 %v2022_v3, 16  ;;  %v1539_v31 = vcombine.low %v2019_v2, %v2019_v2 }
  0x2c   : > { %v260_v16 = vrot.slane %v258_v1, 1  ;;  %v312_v32 = vshll.u32 %v2030_v7, 16  ;;  %v1542_v35 = vcombine.low %v2026_v5, %v2026_v5  ;;  %v317_v36 = vshrl.u32 %v2022_v3, 16 }
  0x2d   : > { %v247_v12 = vor.u32 %v246_v63, %v242_v62  ;;  %v321_v44 = vrot.slane %v319_v27, 1  ;;  %v333_v45 = vshll.u32 %v2042_v11, 16  ;;  %v1541_v20 = vcombine.low %v2033_v8, %v2033_v8  ;;  %1709 = vmatpush3.bf16.msra.mxu0 %v1839_v30 }
  0x2e   : > { %v261_v23 = vor.u32 %v260_v16, %v256_v15  ;;  %v310_v47 = vshrl.u32 %v2030_v7, 16  ;;  %v314_v48 = vrot.slane %v312_v32, 1  ;;  %v331_v53 = vshrl.u32 %v2042_v11, 16  ;;  %1710 = vmatprep.subr.bf16.mxu0 %v1840_v46 }
  0x2f   : > { %1103 = vrot.lane.b32.xlu1 %v594_v58, %s1950_s28  ;;  %1101 = vrot.lane.b32.xlu0 %v587_v61, %s1950_s28  ;;  %v249_v58 = vshrl.u32 %v2144_v41, 16  ;;  %v1149_v61 = vor.u32 %v1148_v57, %v1144_v56  ;;  %v322_v52 = vor.u32 %v321_v44, %v317_v36  ;;  %v335_v54 = vrot.slane %v333_v45, 1 }
  0x30   : > { %v324_v56 = vshrl.u32 %v2051_v14, 16  ;;  %v921_v60 = vshll.u32 %v2117_v29, 16  ;;  %v914_v62 = vshll.u32 %v2122_v33, 16  ;;  %v1613_v63 = vcombine.low %v2125_v34, %v2125_v34 }
  0x31   : > { %1711 = vmatpush3.bf16.msra.mxu0 %v1840_v46  ;;  %v336_v10 = vor.u32 %v335_v54, %v331_v53  ;;  %v919_v1 = vshrl.u32 %v2117_v29, 16  ;;  %v933_v34 = vshrl.u32 %v2152_v43, 16 }
  0x33   : > { %1107 = vrot.lane.b32.xlu1 %v608_v4, %s1950_s28  ;;  %1105 = vrot.lane.b32.xlu0 %v601_v6, %s1950_s28  ;;  %v254_v4 = vor.u32 %v253_v59, %v249_v58  ;;  %v263_v6 = vshrl.u32 %v2166_v50, 16  ;;  %v1611_v59 = vcombine.low %v2101_v21, %v2101_v21  ;;  %v1612_v21 = vcombine.low %v2128_v37, %v2128_v37 }
  0x35   : > { %v268_v18 = vor.u32 %v267_v9, %v263_v6  ;;  %v935_v6 = vshll.u32 %v2152_v43, 16  ;;  %v912_v9 = vshrl.u32 %v2122_v33, 16 }
  0x37   : > { %1111 = vrot.lane.b32.xlu1 %v2117_v29, %s1949_s25  ;;  %1109 = vrot.lane.b32.xlu0 %v2122_v33, %s1949_s25  ;;  %v937_v16 = vrot.slane %v935_v6, 1 }
  0x39   : > { %v938_v37 = vor.u32 %v937_v16, %v933_v34 }
  0x3b   : > { %1115 = vrot.lane.b32.xlu1 %v2152_v43, %s1949_s25  ;;  %1113 = vrot.lane.b32.xlu0 %v2158_v13, %s1949_s25 }
  0x3f   : > { %1159 = vrot.lane.b32.xlu1 %v1142_v51, %s1951_s6  ;;  %1157 = vrot.lane.b32.xlu0 %v1135_v55, %s1951_s6  ;;  %v326_v51 = vshll.u32 %v2051_v14, 16  ;;  %v315_v55 = vor.u32 %v314_v48, %v310_v47 }
  0x41   : > { %v328_v57 = vrot.slane %v326_v51, 1 }
  0x43   : > { %1163 = vrot.lane.b32.xlu1 %v1156_v17, %s1951_s6  ;;  %1161 = vrot.lane.b32.xlu0 %v1149_v61, %s1951_s6  ;;  %v2224_v17 = vld [vmem:[%s2440_s1 + $0x58] sm:$0xff]   ;;  %v329_v58 = vor.u32 %v328_v57, %v324_v56  ;;  %v1610_v61 = vcombine.low %v2105_v24, %v2105_v24  ;;  %v916_v24 = vrot.slane %v914_v62, 1 }
  0x44   : > { %1728 = vmatprep.subr.bf16.mxu0 %v2224_v17 }
  0x45   : > { %v917_v29 = vor.u32 %v916_v24, %v912_v9 }
  0x47   : > { %271 = vrot.lane.b32.xlu1 %v254_v4, %s1950_s28  ;;  %269 = vrot.lane.b32.xlu0 %v247_v12, %s1950_s28  ;;  %v923_v4 = vrot.slane %v921_v60, 1  ;;  %v928_v12 = vshll.u32 %v2158_v13, 16 }
  0x49   : > { %v924_v15 = vor.u32 %v923_v4, %v919_v1  ;;  %v930_v19 = vrot.slane %v928_v12, 1 }
  0x4b   : > { %275 = vrot.lane.b32.xlu1 %v268_v18, %s1950_s28  ;;  %273 = vrot.lane.b32.xlu0 %v261_v23, %s1950_s28  ;;  %v926_v18 = vshrl.u32 %v2158_v13, 16 }
  0x4d   : > { %v931_v33 = vor.u32 %v930_v19, %v926_v18 }
  0x4f   : > { %291 = vrot.lane.b32.xlu1 %v1540_v25, %s1949_s25  ;;  %289 = vrot.lane.b32.xlu0 %v1539_v31, %s1949_s25 }
  0x53   : > { %295 = vrot.lane.b32.xlu1 %v1542_v35, %s1949_s25  ;;  %293 = vrot.lane.b32.xlu0 %v1541_v20, %s1949_s25 }
  0x57   : > { %339 = vrot.lane.b32.xlu1 %v322_v52, %s1951_s6  ;;  %337 = vrot.lane.b32.xlu0 %v315_v55, %s1951_s6 }
  0x5b   : > { %343 = vrot.lane.b32.xlu1 %v336_v10, %s1951_s6  ;;  %341 = vrot.lane.b32.xlu0 %v329_v58, %s1951_s6 }
  0x5f   : > { %873 = vrot.lane.b32.xlu1 %v322_v52, %s1950_s28  ;;  %871 = vrot.lane.b32.xlu0 %v315_v55, %s1950_s28 }
  0x63   : > { %877 = vrot.lane.b32.xlu1 %v336_v10, %s1950_s28  ;;  %875 = vrot.lane.b32.xlu0 %v329_v58, %s1950_s28  ;;  %s2398_s28 = scalar_lea.vmem %s2442_s3, %s1521_s27 }
  0x67   : > { %893 = vrot.lane.b32.xlu1 %v1611_v59, %s1949_s25  ;;  %891 = vrot.lane.b32.xlu0 %v1610_v61, %s1949_s25 }
  0x6b   : > { %897 = vrot.lane.b32.xlu1 %v1613_v63, %s1949_s25  ;;  %895 = vrot.lane.b32.xlu0 %v1612_v21, %s1949_s25 }
  0x6f   : > { %941 = vrot.lane.b32.xlu1 %v924_v15, %s1951_s6  ;;  %939 = vrot.lane.b32.xlu0 %v917_v29, %s1951_s6 }
  0x73   : > { %945 = vrot.lane.b32.xlu1 %v938_v37, %s1951_s6  ;;  %943 = vrot.lane.b32.xlu0 %v931_v33, %s1951_s6 }
  0x88   : > { %v564_v22 = vpop.permute.xlu1 %563 }
  0x89   : > { %v562_v23 = vpop.permute.xlu0 %561 }
  0x8c   : > { %v568_v43 = vpop.permute.xlu1 %567 }
  0x8d   : > { %v566_v25 = vpop.permute.xlu0 %565 }
  0x91   : > { %v558_v27 = vpop.permute.xlu1 %557  ;;  %v554_v30 = vpop.permute.xlu0 %553 }
  0x92   : > { %v618_v32 = vsel %vm345_vm0, %v2140_v40, %v554_v30  ;;  %v622_v48 = vsel %vm345_vm0, %v2162_v49, %v558_v27 }
  0x93   : > { %v626_v47 = vsel %vm358_vm1, %v618_v32, %v562_v23  ;;  %v630_v49 = vsel %vm358_vm1, %v622_v48, %v566_v25 }
  0x95   : > { %v560_v31 = vpop.permute.xlu1 %559  ;;  %v556_v13 = vpop.permute.xlu0 %555 }
  0x96   : > { %v620_v35 = vsel %vm345_vm0, %v2144_v41, %v556_v13  ;;  %v624_v45 = vsel %vm345_vm0, %v2166_v50, %v560_v31 }
  0x97   : > { %v628_v44 = vsel %vm358_vm1, %v620_v35, %v564_v22  ;;  %v632_v50 = vsel %vm358_vm1, %v624_v45, %v568_v43 }
  0x99   : > { %v612_v36 = vpop.permute.xlu1 %611  ;;  %v610_v20 = vpop.permute.xlu0 %609 }
  0x9a   : > { %v636_v46 = vsel %vm367_vm2, %v628_v44, %v612_v36  ;;  %v634_v41 = vsel %vm367_vm2, %v626_v47, %v610_v20 }
  0x9b   : > { %v1574_v40 = vcombine.low %v636_v46, %v636_v46  ;;  %v1575_v51 = vcombine.high %v636_v46, %v636_v46  ;;  %v1572_v52 = vcombine.low %v634_v41, %v634_v41  ;;  %v1573_v53 = vcombine.high %v634_v41, %v634_v41 }
  0x9d   : > { %v679_v54 = vshrl.u32 %v1574_v40, 16  ;;  %v682_v55 = vshll.u32 %v1574_v40, 16  ;;  %v616_v56 = vpop.permute.xlu1 %615  ;;  %v665_v57 = vshrl.u32 %v1572_v52, 16  ;;  %v668_v10 = vshll.u32 %v1572_v52, 16  ;;  %v614_v59 = vpop.permute.xlu0 %613 }
  0x9e   : > { %v640_v58 = vsel %vm367_vm2, %v632_v50, %v616_v56  ;;  %v688_v62 = vshll.u32 %v1575_v51, 16  ;;  %v674_v6 = vshll.u32 %v1573_v53, 16  ;;  %v638_v15 = vsel %vm367_vm2, %v630_v49, %v614_v59 }
  0x9f   : > { %v681_v60 = vrot.slane %v679_v54, 4  ;;  %v684_v61 = vrot.slane %v682_v55, 5  ;;  %v1578_v63 = vcombine.low %v640_v58, %v640_v58  ;;  %v667_v1 = vrot.slane %v665_v57, 4 }
  0xa0   : > { %v670_v4 = vrot.slane %v668_v10, 5  ;;  %v1579_v21 = vcombine.high %v640_v58, %v640_v58  ;;  %v1576_v29 = vcombine.low %v638_v15, %v638_v15  ;;  %v1577_v18 = vcombine.high %v638_v15, %v638_v15  ;;  %v1834_v58 = vld [vmem:[%s2440_s1 + $0x70] sm:$0xff]  }
  0xa1   : > { %v685_v9 = vor.u32 %v684_v61, %v681_v60  ;;  %v707_v24 = vshrl.u32 %v1578_v63, 16  ;;  %v710_v12 = vshll.u32 %v1578_v63, 16  ;;  %v1104_v34 = vpop.permute.xlu1 %1103  ;;  %v1102_v19 = vpop.permute.xlu0 %1101  ;;  %v690_v22 = vrot.slane %v688_v62, 5  ;;  %v1835_v63 = vld [vmem:[%s2440_s1 + $0x68] sm:$0xff]  }
  0xa2   : > { %v671_v16 = vor.u32 %v670_v4, %v667_v1  ;;  %v716_v43 = vshll.u32 %v1579_v21, 16  ;;  %v693_v25 = vshrl.u32 %v1576_v29, 16  ;;  %v696_v27 = vshll.u32 %v1576_v29, 16 }
  0xa3   : > { %v709_v37 = vrot.slane %v707_v24, 4  ;;  %v712_v33 = vrot.slane %v710_v12, 5  ;;  %v676_v30 = vrot.slane %v674_v6, 5  ;;  %v686_v35 = vrot.slane %v685_v9, 4 }
  0xa4   : > { %v672_v32 = vrot.slane %v671_v16, 4  ;;  %v695_v36 = vrot.slane %v693_v25, 4  ;;  %v698_v44 = vrot.slane %v696_v27, 5  ;;  %v702_v45 = vshll.u32 %v1577_v18, 16  ;;  %v1836_v18 = vld [vmem:[%s2440_s1 + $0x60] sm:$0xff]  }
  0xa5   : > { %v713_v31 = vor.u32 %v712_v33, %v709_v37  ;;  %v1108_v13 = vpop.permute.xlu1 %1107  ;;  %v1106_v46 = vpop.permute.xlu0 %1105  ;;  %v691_v48 = vsel %vm2276_vm5, %v686_v35, %v690_v22  ;;  %v718_v40 = vrot.slane %v716_v43, 5  ;;  %v1168_v49 = vsel %vm345_vm0, %v2022_v3, %v1104_v34 }
  0xa6   : > { %v677_v47 = vsel %vm2276_vm5, %v672_v32, %v676_v30  ;;  %v699_v51 = vor.u32 %v698_v44, %v695_v36  ;;  %v704_v55 = vrot.slane %v702_v45, 5  ;;  %v1166_v60 = vsel %vm345_vm0, %v2030_v7, %v1102_v19 }
  0xa7   : > { %v714_v20 = vrot.slane %v713_v31, 4  ;;  %v1588_v41 = vcombine.low %v677_v47, %v691_v48  ;;  %v1172_v7 = vsel %vm345_vm0, %v2042_v11, %v1108_v13  ;;  %v1170_v12 = vsel %vm345_vm0, %v2051_v14, %v1106_v46 }
  0xa8   : > { %v700_v54 = vrot.slane %v699_v51, 4 }
  0xa9   : > { %v1112_v52 = vpop.permute.xlu1 %1111  ;;  %v719_v53 = vsel %vm2276_vm5, %v714_v20, %v718_v40  ;;  %1724 = vmatprep.mubr.msk.bf16.mxu1 %vm425_vm6, %v1588_v41  ;;  %v1110_v56 = vpop.permute.xlu0 %1109 }
  0xaa   : > { %v705_v50 = vsel %vm2276_vm5, %v700_v54, %v704_v55  ;;  %v1176_v61 = vsel %vm358_vm1, %v1168_v49, %v1112_v52  ;;  %v1174_v1 = vsel %vm358_vm1, %v1166_v60, %v1110_v56 }
  0xab   : > { %v1589_v57 = vcombine.low %v705_v50, %v719_v53 }
  0xad   : > { %v1116_v10 = vpop.permute.xlu1 %1115  ;;  %v1114_v59 = vpop.permute.xlu0 %1113  ;;  %1725 = vmatmul.mubr.msk.bf16.vlgmr.msra.gmra.mxu1 %vm425_vm6, %v1589_v57 }
  0xae   : > { %1741 = vmatpush3.bf16.msra.mxu1 %v2133_v38  ;;  %v1180_v15 = vsel %vm358_vm1, %v1172_v7, %v1116_v10  ;;  %v1178_v30 = vsel %vm358_vm1, %v1170_v12, %v1114_v59 }
  0xaf   : > { %1742 = vmatprep.subr.bf16.mxu1 %v1834_v58 }
  0xb1   : > { %v1160_v62 = vpop.permute.xlu1 %1159  ;;  %v1158_v6 = vpop.permute.xlu0 %1157 }
  0xb2   : > { %v1184_v4 = vsel %vm367_vm2, %v1176_v61, %v1160_v62  ;;  %v1182_v38 = vsel %vm367_vm2, %v1174_v1, %v1158_v6  ;;  %1743 = vmatpush3.bf16.msra.mxu1 %v1834_v58 }
  0xb3   : > { %v1648_v21 = vcombine.low %v1184_v4, %v1184_v4  ;;  %v1649_v3 = vcombine.high %v1184_v4, %v1184_v4  ;;  %v1646_v9 = vcombine.low %v1182_v38, %v1182_v38  ;;  %v1647_v24 = vcombine.high %v1182_v38, %v1182_v38  ;;  %1744 = vmatprep.subr.bf16.mxu1 %v1835_v63 }
  0xb5   : > { %v1224_v34 = vshrl.u32 %v1648_v21, 16  ;;  %v1227_v16 = vshll.u32 %v1648_v21, 16  ;;  %v1164_v29 = vpop.permute.xlu1 %1163  ;;  %v1233_v19 = vshll.u32 %v1649_v3, 16  ;;  %v1210_v37 = vshrl.u32 %v1646_v9, 16  ;;  %v1162_v22 = vpop.permute.xlu0 %1161 }
  0xb6   : > { %v1213_v33 = vshll.u32 %v1646_v9, 16  ;;  %v1188_v11 = vsel %vm367_vm2, %v1180_v15, %v1164_v29  ;;  %v1219_v27 = vshll.u32 %v1647_v24, 16  ;;  %1745 = vmatpush3.bf16.msra.mxu1 %v1835_v63  ;;  %v1186_v45 = vsel %vm367_vm2, %v1178_v30, %v1162_v22 }
  0xb7   : > { %v1226_v43 = vrot.slane %v1224_v34, 4  ;;  %v1229_v25 = vrot.slane %v1227_v16, 5  ;;  %v1652_v14 = vcombine.low %v1188_v11, %v1188_v11  ;;  %v1212_v31 = vrot.slane %v1210_v37, 4  ;;  %1746 = vmatprep.subr.bf16.mxu1 %v1836_v18 }
  0xb8   : > { %v1215_v13 = vrot.slane %v1213_v33, 5  ;;  %v1653_v32 = vcombine.high %v1188_v11, %v1188_v11  ;;  %v1235_v20 = vrot.slane %v1233_v19, 5  ;;  %v1650_v48 = vcombine.low %v1186_v45, %v1186_v45 }
  0xb9   : > { %v1230_v35 = vor.u32 %v1229_v25, %v1226_v43  ;;  %v1252_v36 = vshrl.u32 %v1652_v14, 16  ;;  %v1255_v44 = vshll.u32 %v1652_v14, 16  ;;  %v272_v46 = vpop.permute.xlu1 %271  ;;  %v1651_v40 = vcombine.high %v1186_v45, %v1186_v45  ;;  %v270_v51 = vpop.permute.xlu0 %269 }
  0xba   : > { %v1216_v47 = vor.u32 %v1215_v13, %v1212_v31  ;;  %v1221_v52 = vrot.slane %v1219_v27, 5  ;;  %v1261_v56 = vshll.u32 %v1653_v32, 16  ;;  %v1238_v50 = vshrl.u32 %v1650_v48, 16  ;;  %1747 = vmatpush3.bf16.msra.mxu1 %v1836_v18  ;;  %v1842_v13 = vld [vmem:[%s2440_s1 + $0x50] sm:$0xff]  }
  0xbb   : > { %v1231_v41 = vrot.slane %v1230_v35, 4  ;;  %v1254_v53 = vrot.slane %v1252_v36, 4  ;;  %v1257_v54 = vrot.slane %v1255_v44, 5  ;;  %v1241_v57 = vshll.u32 %v1650_v48, 16  ;;  %v1843_v36 = vld [vmem:[%s2440_s1 + $0x48] sm:$0xff]  }
  0xbc   : > { %v1217_v55 = vrot.slane %v1216_v47, 4  ;;  %v1240_v60 = vrot.slane %v1238_v50, 4  ;;  %v1247_v62 = vshll.u32 %v1651_v40, 16  ;;  %v1263_v6 = vrot.slane %v1261_v56, 5 }
  0xbd   : > { %v1236_v10 = vsel %vm2276_vm5, %v1231_v41, %v1235_v20  ;;  %v1258_v58 = vor.u32 %v1257_v54, %v1254_v53  ;;  %v276_v59 = vpop.permute.xlu1 %275  ;;  %v1243_v61 = vrot.slane %v1241_v57, 5  ;;  %v274_v63 = vpop.permute.xlu0 %273  ;;  %v351_v15 = vsel %vm345_vm0, %v2113_v28, %v272_v46  ;;  %v1844_v46 = vld [vmem:[%s2440_s1 + $0x40] sm:$0xff]  }
  0xbe   : > { %v1222_v49 = vsel %vm2276_vm5, %v1217_v55, %v1221_v52  ;;  %v1249_v9 = vrot.slane %v1247_v62, 5  ;;  %v348_v16 = vsel %vm345_vm0, %v2109_v26, %v270_v51  ;;  %v357_v37 = vsel %vm345_vm0, %v2147_v42, %v276_v59 }
  0xbf   : > { %v1259_v1 = vrot.slane %v1258_v58, 4  ;;  %v1662_v4 = vcombine.low %v1222_v49, %v1236_v10  ;;  %v1244_v21 = vor.u32 %v1243_v61, %v1240_v60  ;;  %v354_v23 = vsel %vm345_vm0, %v2136_v39, %v274_v63  ;;  %v2375_v60 = vld [vmem:[%s2441_s2] ss:$0 sm:$0xff] }
  0xc1   : > { %1748 = vmatprep.mubr.msk.bf16.mxu1 %vm425_vm6, %v1662_v4  ;;  %v292_v3 = vpop.permute.xlu1 %291  ;;  %v1264_v38 = vsel %vm2276_vm5, %v1259_v1, %v1263_v6  ;;  %v1245_v7 = vrot.slane %v1244_v21, 4  ;;  %v290_v24 = vpop.permute.xlu0 %289 }
  0xc2   : > { %v362_v19 = vsel %vm358_vm1, %v351_v15, %v292_v3  ;;  %v360_v33 = vsel %vm358_vm1, %v348_v16, %v290_v24 }
  0xc3   : > { %v1250_v12 = vsel %vm2276_vm5, %v1245_v7, %v1249_v9 }
  0xc4   : > { %v1663_v34 = vcombine.low %v1250_v12, %v1264_v38 }
  0xc5   : > { %v296_v29 = vpop.permute.xlu1 %295  ;;  %v294_v18 = vpop.permute.xlu0 %293 }
  0xc6   : > { %1749 = vmatmul.mubr.msk.bf16.vlgmr.msra.gmra.mxu1 %vm425_vm6, %v1663_v34  ;;  %v366_v26 = vsel %vm358_vm1, %v357_v37, %v296_v29  ;;  %v364_v25 = vsel %vm358_vm1, %v354_v23, %v294_v18 }
  0xc9   : > { %v340_v11 = vpop.permute.xlu1 %339  ;;  %v338_v22 = vpop.permute.xlu0 %337 }
  0xca   : > { %v371_v28 = vsel %vm367_vm2, %v362_v19, %v340_v11  ;;  %v369_v43 = vsel %vm367_vm2, %v360_v33, %v338_v22 }
  0xcb   : > { %v1548_v27 = vcombine.low %v369_v43, %v371_v28 }
  0xcd   : > { %v344_v14 = vpop.permute.xlu1 %343  ;;  %v342_v42 = vpop.permute.xlu0 %341  ;;  %1712 = vmatprep.mubr.msk.bf16.mxu0 %vm425_vm6, %v1548_v27 }
  0xce   : > { %v375_v30 = vsel %vm367_vm2, %v366_v26, %v344_v14  ;;  %v373_v31 = vsel %vm367_vm2, %v364_v25, %v342_v42 }
  0xcf   : > { %v1549_v39 = vcombine.low %v373_v31, %v375_v30 }
  0xd1   : > { %v874_v32 = vpop.permute.xlu1 %873  ;;  %1713 = vmatmul.mubr.msk.bf16.vlgmr.msra.gmra.mxu0 %vm425_vm6, %v1549_v39  ;;  %v872_v35 = vpop.permute.xlu0 %871 }
  0xd2   : > { %1729 = vmatpush3.bf16.msra.mxu0 %v2224_v17  ;;  %v952_v48 = vsel %vm345_vm0, %v2015_v0, %v874_v32  ;;  %v949_v17 = vsel %vm345_vm0, %v2019_v2, %v872_v35 }
  0xd3   : > { %1730 = vmatprep.subr.bf16.mxu0 %v1842_v13 }
  0xd5   : > { %v878_v44 = vpop.permute.xlu1 %877  ;;  %v876_v45 = vpop.permute.xlu0 %875 }
  0xd6   : > { %1731 = vmatpush3.bf16.msra.mxu0 %v1842_v13  ;;  %v958_v52 = vsel %vm345_vm0, %v2026_v5, %v878_v44  ;;  %v955_v54 = vsel %vm345_vm0, %v2033_v8, %v876_v45 }
  0xd7   : > { %1732 = vmatprep.subr.bf16.mxu0 %v1843_v36 }
  0xd9   : > { %v894_v20 = vpop.permute.xlu1 %893  ;;  %v892_v47 = vpop.permute.xlu0 %891 }
  0xda   : > { %1733 = vmatpush3.bf16.msra.mxu0 %v1843_v36  ;;  %v962_v41 = vsel %vm358_vm1, %v952_v48, %v894_v20  ;;  %v960_v53 = vsel %vm358_vm1, %v949_v17, %v892_v47 }
  0xdb   : > { %1734 = vmatprep.subr.bf16.mxu0 %v1844_v46 }
  0xdd   : > { %v898_v40 = vpop.permute.xlu1 %897  ;;  %v896_v51 = vpop.permute.xlu0 %895 }
  0xde   : > { %1735 = vmatpush3.bf16.msra.mxu0 %v1844_v46  ;;  %v966_v50 = vsel %vm358_vm1, %v958_v52, %v898_v40  ;;  %v964_v57 = vsel %vm358_vm1, %v955_v54, %v896_v51 }
  0xe1   : > { %v942_v55 = vpop.permute.xlu1 %941  ;;  %v940_v56 = vpop.permute.xlu0 %939 }
  0xe2   : > { %v970_v0 = vsel %vm367_vm2, %v962_v41, %v942_v55  ;;  %v968_v2 = vsel %vm367_vm2, %v960_v53, %v940_v56 }
  0xe3   : > { %v1626_v10 = vcombine.low %v968_v2, %v970_v0 }
  0xe5   : > { %v946_v58 = vpop.permute.xlu1 %945  ;;  %v944_v5 = vpop.permute.xlu0 %943  ;;  %1736 = vmatprep.mubr.msk.bf16.mxu0 %vm425_vm6, %v1626_v10 }
  0xe6   : > { %v974_v59 = vsel %vm367_vm2, %v966_v50, %v946_v58  ;;  %v972_v49 = vsel %vm367_vm2, %v964_v57, %v944_v5 }
  0xe7   : > { %v1627_v8 = vcombine.low %v972_v49, %v974_v59 }
  0xe9   : > { %1737 = vmatmul.mubr.msk.bf16.vlgmr.msra.gmra.mxu0 %vm425_vm6, %v1627_v8 }
 0x16d   : > { %v1726_v61 = vpop.f32.mrf.mxu1 }
 0x16e   : > { %v808_v62 = vadd.f32 %v1726_v61, %v2375_v60 }
 0x16f   : > { %v799_v63 = vpop.f32.mrf.mxu1 }
 0x170   : > { %v1598_v1 = vmul.f32 -1.442695, %v808_v62  ;;  %v800_v4 = vadd.f32 %v2375_v60, %v799_v63 }
 0x171   : > { %v1727_v6 = vpop.f32.mrf.mxu1 }
 0x172   : > { %1845 = vpow2.f32 %v1598_v1  ;;  %v1596_v21 = vmul.f32 -1.442695, %v800_v4  ;;  %v811_v3 = vadd.f32 %v1727_v6, %v2375_v60 }
 0x173   : > { %v802_v38 = vpop.f32.mrf.mxu1 }
 0x174   : > { %1847 = vpow2.f32 %v1596_v21  ;;  %v1599_v7 = vmul.f32 -1.442695, %v811_v3  ;;  %v803_v9 = vadd.f32 %v2375_v60, %v802_v38 }
 0x176   : > { %1849 = vpow2.f32 %v1599_v7  ;;  %v1597_v24 = vmul.f32 -1.442695, %v803_v9 }
 0x178   : > { %1851 = vpow2.f32 %v1597_v24 }
 0x17f   : > { %v1846_v12 = vpop.eup %1845 }
 0x180   : > { %v828_v15 = vadd.f32 1.0, %v1846_v12 }
 0x181   : > { %v1848_v34 = vpop.eup %1847 }
 0x182   : > { %1853 = vrcp.f32 %v828_v15  ;;  %v826_v16 = vadd.f32 1.0, %v1848_v34 }
 0x183   : > { %v1850_v29 = vpop.eup %1849 }
 0x184   : > { %v829_v18 = vadd.f32 1.0, %v1850_v29  ;;  %1855 = vrcp.f32 %v826_v16 }
 0x185   : > { %v1852_v19 = vpop.eup %1851 }
 0x186   : > { %v1750_v37 = vpop.f32.mrf.mxu1  ;;  %1857 = vrcp.f32 %v829_v18  ;;  %v827_v33 = vadd.f32 1.0, %v1852_v19 }
 0x187   : > { %v1353_v23 = vadd.f32 %v1750_v37, %v2375_v60 }
 0x188   : > { %v1344_v11 = vpop.f32.mrf.mxu1  ;;  %1859 = vrcp.f32 %v827_v33 }
 0x189   : > { %v1672_v28 = vmul.f32 -1.442695, %v1353_v23  ;;  %v1345_v22 = vadd.f32 %v2375_v60, %v1344_v11 }
 0x18a   : > { %v1751_v26 = vpop.f32.mrf.mxu1 }
 0x18b   : > { %v1670_v43 = vmul.f32 -1.442695, %v1345_v22  ;;  %v1356_v25 = vadd.f32 %v1751_v26, %v2375_v60  ;;  %1861 = vpow2.f32 %v1672_v28 }
 0x18c   : > { %v1347_v27 = vpop.f32.mrf.mxu1 }
 0x18d   : > { %1863 = vpow2.f32 %v1670_v43  ;;  %v1673_v14 = vmul.f32 -1.442695, %v1356_v25  ;;  %v1348_v30 = vadd.f32 %v2375_v60, %v1347_v27 }
 0x18f   : > { %v1671_v42 = vmul.f32 -1.442695, %v1348_v30  ;;  %v1854_v31 = vpop.eup %1853  ;;  %1865 = vpow2.f32 %v1673_v14 }
 0x190   : > { %846 = vrot.lane.b32.xlu0 %v1854_v31, %s1952_s22 }
 0x191   : > { %1867 = vpow2.f32 %v1671_v42  ;;  %v1856_v39 = vpop.eup %1855  ;;  %v1714_v52 = vpop.f32.mrf.mxu0 }
 0x192   : > { %v475_v54 = vadd.f32 %v1714_v52, %v2375_v60 }
 0x193   : > { %v1858_v13 = vpop.eup %1857  ;;  %v466_v53 = vpop.f32.mrf.mxu0 }
 0x194   : > { %848 = vrot.lane.b32.xlu1 %v1858_v13, %s1952_s22  ;;  %842 = vrot.lane.b32.xlu0 %v1856_v39, %s1952_s22  ;;  %v467_v0 = vadd.f32 %v2375_v60, %v466_v53  ;;  %v1558_v56 = vmul.f32 -1.442695, %v475_v54 }
 0x195   : > { %v1860_v32 = vpop.eup %1859  ;;  %v1715_v55 = vpop.f32.mrf.mxu0 }
 0x196   : > { %v478_v50 = vadd.f32 %v1715_v55, %v2375_v60  ;;  %v1556_v57 = vmul.f32 -1.442695, %v467_v0 }
 0x197   : > { %v469_v2 = vpop.f32.mrf.mxu0 }
 0x198   : > { %v1862_v35 = vpop.eup %1861  ;;  %844 = vrot.lane.b32.xlu1 %v1860_v32, %s1952_s22  ;;  %v1559_v10 = vmul.f32 -1.442695, %v478_v50  ;;  %v470_v58 = vadd.f32 %v2375_v60, %v469_v2 }
 0x199   : > { %v1373_v45 = vadd.f32 1.0, %v1862_v35 }
 0x19a   : > { %v1864_v36 = vpop.eup %1863  ;;  %v1557_v59 = vmul.f32 -1.442695, %v470_v58 }
 0x19b   : > { %v1371_v44 = vadd.f32 1.0, %v1864_v36 }
 0x19c   : > { %v1866_v46 = vpop.eup %1865 }
 0x19d   : > { %1869 = vrcp.f32 %v1371_v44  ;;  %v1374_v48 = vadd.f32 1.0, %v1866_v46 }
 0x19e   : > { %v1868_v20 = vpop.eup %1867  ;;  %1871 = vrcp.f32 %v1373_v45 }
 0x19f   : > { %v1372_v47 = vadd.f32 1.0, %v1868_v20 }
 0x1a1   : > { %1873 = vrcp.f32 %v1372_v47 }
 0x1a2   : > { %1875 = vrcp.f32 %v1374_v48 }
 0x1a3   : > { %1877 = vpow2.f32 %v1558_v56 }
 0x1a4   : > { %1879 = vpow2.f32 %v1556_v57 }
 0x1a5   : > { %1881 = vpow2.f32 %v1559_v10 }
 0x1a6   : > { %1883 = vpow2.f32 %v1557_v59 }
 0x1a9   : > { %v1738_v5 = vpop.f32.mrf.mxu0 }
 0x1aa   : > { %v1870_v17 = vpop.eup %1869  ;;  %v1067_v7 = vadd.f32 %v1738_v5, %v2375_v60 }
 0x1ab   : > { %1387 = vrot.lane.b32.xlu0 %v1870_v17, %s1952_s22  ;;  %v1872_v40 = vpop.eup %1871  ;;  %v1058_v49 = vpop.f32.mrf.mxu0 }
 0x1ac   : > { %v1059_v4 = vadd.f32 %v2375_v60, %v1058_v49  ;;  %v1636_v15 = vmul.f32 -1.442695, %v1067_v7 }
 0x1ad   : > { %v1739_v61 = vpop.f32.mrf.mxu0 }
 0x1ae   : > { %v1874_v51 = vpop.eup %1873  ;;  %v1634_v9 = vmul.f32 -1.442695, %v1059_v4  ;;  %v1070_v34 = vadd.f32 %v1739_v61, %v2375_v60 }
 0x1af   : > { %1389 = vrot.lane.b32.xlu1 %v1874_v51, %s1952_s22  ;;  %1391 = vrot.lane.b32.xlu0 %v1872_v40, %s1952_s22  ;;  %v1876_v41 = vpop.eup %1875  ;;  %v1061_v21 = vpop.f32.mrf.mxu0 }
 0x1b0   : > { %v1878_v8 = vpop.eup %1877  ;;  %v1062_v24 = vadd.f32 %v2375_v60, %v1061_v21  ;;  %v1637_v29 = vmul.f32 -1.442695, %v1070_v34 }
 0x1b1   : > { %v1880_v62 = vpop.eup %1879  ;;  %v495_v63 = vadd.f32 1.0, %v1878_v8 }
 0x1b2   : > { %v1882_v1 = vpop.eup %1881  ;;  %v493_v6 = vadd.f32 1.0, %v1880_v62  ;;  %v1635_v16 = vmul.f32 -1.442695, %v1062_v24 }
 0x1b3   : > { %1393 = vrot.lane.b32.xlu1 %v1876_v41, %s1952_s22  ;;  %1885 = vrcp.f32 %v495_v63  ;;  %v496_v3 = vadd.f32 1.0, %v1882_v1  ;;  %v1884_v38 = vpop.eup %1883 }
 0x1b4   : > { %1887 = vrcp.f32 %v493_v6  ;;  %v494_v12 = vadd.f32 1.0, %v1884_v38 }
 0x1b5   : > { %1889 = vrcp.f32 %v496_v3 }
 0x1b6   : > { %1891 = vpow2.f32 %v1634_v9 }
 0x1b7   : > { %1893 = vrcp.f32 %v494_v12 }
 0x1b8   : > { %1895 = vpow2.f32 %v1636_v15 }
 0x1b9   : > { %1897 = vpow2.f32 %v1635_v16 }
 0x1ba   : > { %1899 = vpow2.f32 %v1637_v29 }
 0x1c0   : > { %v1886_v18 = vpop.eup %1885 }
 0x1c1   : > { %v1888_v37 = vpop.eup %1887 }
 0x1c2   : > { %v1890_v33 = vpop.eup %1889 }
 0x1c3   : > { %v1892_v26 = vpop.eup %1891 }
 0x1c4   : > { %v1894_v43 = vpop.eup %1893  ;;  %v1085_v14 = vadd.f32 1.0, %v1892_v26 }
 0x1c5   : > { %v1896_v27 = vpop.eup %1895 }
 0x1c6   : > { %v1898_v42 = vpop.eup %1897  ;;  %v1087_v31 = vadd.f32 1.0, %v1896_v27  ;;  %1901 = vrcp.f32 %v1085_v14 }
 0x1c7   : > { %v1086_v39 = vadd.f32 1.0, %v1898_v42  ;;  %v1900_v13 = vpop.eup %1899 }
 0x1c8   : > { %1903 = vrcp.f32 %v1087_v31  ;;  %v1088_v32 = vadd.f32 1.0, %v1900_v13 }
 0x1c9   : > { %1905 = vrcp.f32 %v1086_v39 }
 0x1ca   : > { %1907 = vrcp.f32 %v1088_v32 }
 0x1d3   : > { %v1902_v35 = vpop.eup %1901 }
 0x1d5   : > { %v1904_v45 = vpop.eup %1903 }
 0x1d6   : > { %v1906_v46 = vpop.eup %1905 }
 0x1d7   : > { %v1908_v40 = vpop.eup %1907 }
 0x202   : > { %v847_v19 = vpop.permute.xlu0 %846 }
 0x203   : > { %v857_v60 = vsel %vm854_vm7, %v1886_v18, %v847_v19 }
 0x204   : > { %1408 = vst.msk [vmem:[%s2398_s28 + $0x20] sm:$0xff] %vm1403_vm8, %v857_v60 }
 0x206   : > { %v849_v23 = vpop.permute.xlu1 %848  ;;  %v843_v11 = vpop.permute.xlu0 %842 }
 0x207   : > { %v858_v28 = vsel %vm854_vm7, %v1890_v33, %v849_v23  ;;  %v855_v22 = vsel %vm854_vm7, %v1888_v37, %v843_v11 }
 0x208   : > { %1410 = vst.msk [vmem:[%s2398_s28 + $0x30] sm:$0xff] %vm1403_vm8, %v858_v28  ;;  %1404 = vst.msk [vmem:[%s2398_s28] sm:$0xff] %vm1403_vm8, %v855_v22 }
 0x20a   : > { %v845_v25 = vpop.permute.xlu1 %844 }
 0x20b   : > { %v856_v30 = vsel %vm854_vm7, %v1894_v43, %v845_v25 }
 0x20c   : > { %1406 = vst.msk [vmem:[%s2398_s28 + $0x10] sm:$0xff] %vm1403_vm8, %v856_v30 }
 0x21d   : > { %v1388_v36 = vpop.permute.xlu0 %1387 }
 0x21e   : > { %v1399_v44 = vsel %vm854_vm7, %v1902_v35, %v1388_v36 }
 0x21f   : > { %1405 = vst.msk [vmem:[%s2398_s28 + $0x8] sm:$0xff] %vm1403_vm8, %v1399_v44 }
 0x221   : > { %v1390_v20 = vpop.permute.xlu1 %1389  ;;  %v1392_v47 = vpop.permute.xlu0 %1391 }
 0x222   : > { %v1400_v48 = vsel %vm854_vm7, %v1906_v46, %v1390_v20  ;;  %v1401_v17 = vsel %vm854_vm7, %v1904_v45, %v1392_v47 }
 0x223   : > { %1407 = vst.msk [vmem:[%s2398_s28 + $0x18] sm:$0xff] %vm1403_vm8, %v1400_v48  ;;  %1409 = vst.msk [vmem:[%s2398_s28 + $0x28] sm:$0xff] %vm1403_vm8, %v1401_v17 }
 0x225   : > { %v1394_v51 = vpop.permute.xlu1 %1393 }
 0x226   : > { %v1402_v41 = vsel %vm854_vm7, %v1908_v40, %v1394_v51 }
 0x227   : > { %1411 = vst.msk [vmem:[%s2398_s28 + $0x38] sm:$0xff] %vm1403_vm8, %v1402_v41 }
 0x228 PF: > { %s13_s16 = sadd.s32 1, %s1947_s16   ;;  %s2445_s12 = smov %s1939_s14 }
 0x229   : > { %p10_p7 = scmp.ge.s32.totalorder %s13_s16, 6   ;;  %s2446_s13 = smov %s1943_s15 }
 0x22a   : > { %s2447_s14 = smov %s2450_s17  ;;  %s2448_s15 = smov %s2454_s18 }
 0x22b   :  { %12 = sbr.rel (!%p10_p7) target bundleno = 3 (0x3), region = 68 }

</bundles_post_ra>
